<compile_context>
chip_gen: v7x
topology: tpu7x:2x2x1
jax: 0.10.0
libtpu: 0.0.40
codegen_flags: <defaults>
</compile_context>

<pallas_src>
import jax
import jax.numpy as jnp
from jax.experimental import pallas as pl
from jax.experimental.pallas import tpu as pltpu


def _basic_block_kernel(x_ref, w1_ref, w2_ref, bn_ref, o_ref, xpad_ref, midpad_ref):
    # x_ref:      (1, H, W, C)      one batch element, native dtype (NHWC)
    # w1_ref:     (3, 3, C, P)      conv1 weight (HWIO), f32
    # w2_ref:     (3, 3, P, P)      conv2 weight (HWIO), f32
    # bn_ref:     (4, P)            rows: scale1, bias1, scale2, bias2 (folded BN)
    # o_ref:      (1, H, W, P)
    # xpad_ref:   (H+2, W+2, C)     VMEM scratch, zero-padded input
    # midpad_ref: (H+2, W+2, P)     VMEM scratch, zero-padded intermediate
    H, W, P = o_ref.shape[1], o_ref.shape[2], o_ref.shape[3]
    C = x_ref.shape[3]

    s1 = bn_ref[0:1, :]
    b1 = bn_ref[1:2, :]
    s2 = bn_ref[2:3, :]
    b2 = bn_ref[3:4, :]

    # ---- zero-padded copy of the input (SAME padding for conv1) ----
    xpad_ref[...] = jnp.zeros_like(xpad_ref)
    xpad_ref[1:H + 1, 1:W + 1, :] = x_ref[0].astype(jnp.float32)

    # ---- conv1 (3x3, stride 1, pad 1) as 9 accumulated MXU matmuls ----
    acc = jnp.zeros((H * W, P), jnp.float32)
    for dy in range(3):
        for dx in range(3):
            patch = xpad_ref[dy:dy + H, dx:dx + W, :].reshape(H * W, C)
            acc = acc + jnp.dot(patch, w1_ref[dy, dx],
                                preferred_element_type=jnp.float32)
    mid = jnp.maximum(acc * s1 + b1, 0.0)            # bn1 + relu, (H*W, P)

    # ---- zero-padded intermediate (SAME padding for conv2) ----
    midpad_ref[...] = jnp.zeros_like(midpad_ref)
    midpad_ref[1:H + 1, 1:W + 1, :] = mid.reshape(H, W, P)

    # ---- conv2 (3x3, stride 1, pad 1) ----
    acc2 = jnp.zeros((H * W, P), jnp.float32)
    for dy in range(3):
        for dx in range(3):
            patch = midpad_ref[dy:dy + H, dx:dx + W, :].reshape(H * W, P)
            acc2 = acc2 + jnp.dot(patch, w2_ref[dy, dx],
                                  preferred_element_type=jnp.float32)
    out = acc2 * s2 + b2                              # bn2

    # ---- residual add + final relu (identity path; requires C == P, stride 1) ----
    identity = x_ref[0].astype(jnp.float32).reshape(H * W, C)
    out = jnp.maximum(out + identity, 0.0)
    o_ref[...] = out.reshape(1, H, W, P).astype(o_ref.dtype)


def basic_block_forward(x_nchw, w1, w2, bn1, bn2, *, eps=1e-5):
    """BasicBlock forward (eval mode, stride=1, downsample=None).

    x_nchw: (N, C, H, W)   input, any float dtype (upcast in-kernel)
    w1:     (P, C, 3, 3)   conv1 weight (PyTorch OIHW, bias-free)
    w2:     (P, P, 3, 3)   conv2 weight
    bn1/2:  (gamma, beta, running_mean, running_var), each (P,)
    """
    N, C, H, W = x_nchw.shape
    P = w1.shape[0]
    assert w1.shape == (P, C, 3, 3) and w2.shape == (P, P, 3, 3)
    assert C == P, "identity path requires inplanes == planes (downsample=None)"

    # NCHW -> NHWC (channels on lanes); keep native dtype (no HBM upcast pass).
    x = jnp.transpose(x_nchw, (0, 2, 3, 1))

    # Conv weights OIHW -> HWIO, f32 (tiny, resident in VMEM across the grid).
    w1_hwio = jnp.transpose(w1, (2, 3, 1, 0)).astype(jnp.float32)
    w2_hwio = jnp.transpose(w2, (2, 3, 1, 0)).astype(jnp.float32)

    # Fold eval-mode BatchNorm into per-channel scale/bias.
    def fold(bn):
        g, b, m, v = bn
        s = g / jnp.sqrt(v + eps)
        return s, b - m * s

    s1, b1 = fold(bn1)
    s2, b2 = fold(bn2)
    bn_packed = jnp.stack([s1, b1, s2, b2], axis=0).astype(jnp.float32)  # (4, P)

    out = pl.pallas_call(
        _basic_block_kernel,
        out_shape=jax.ShapeDtypeStruct((N, H, W, P), x_nchw.dtype),
        grid_spec=pltpu.PrefetchScalarGridSpec(
            num_scalar_prefetch=0,
            grid=(N,),
            in_specs=[
                pl.BlockSpec((1, H, W, C), lambda n: (n, 0, 0, 0)),   # x slab
                pl.BlockSpec((3, 3, C, P), lambda n: (0, 0, 0, 0)),   # conv1 w
                pl.BlockSpec((3, 3, P, P), lambda n: (0, 0, 0, 0)),   # conv2 w
                pl.BlockSpec((4, P), lambda n: (0, 0)),               # folded BN
            ],
            out_specs=pl.BlockSpec((1, H, W, P), lambda n: (n, 0, 0, 0)),
            scratch_shapes=[
                pltpu.VMEM((H + 2, W + 2, C), jnp.float32),   # padded input
                pltpu.VMEM((H + 2, W + 2, P), jnp.float32),   # padded intermediate
            ],
        ),
        compiler_params=pltpu.CompilerParams(
            dimension_semantics=("parallel",)),
    )(x, w1_hwio, w2_hwio, bn_packed)

    return jnp.transpose(out, (0, 3, 1, 2))   # back to NCHW


def basic_block_ref(x_nchw, w1, w2, bn1, bn2, eps=1e-5):
    """Pure-JAX reference mirroring the PyTorch forward (eval mode)."""
    def conv(x, w):
        return jax.lax.conv_general_dilated(
            x, w, window_strides=(1, 1), padding=((1, 1), (1, 1)),
            dimension_numbers=("NCHW", "OIHW", "NCHW"))

    def bn(x, p):
        g, b, m, v = p
        g, b, m, v = (t[None, :, None, None] for t in (g, b, m, v))
        return (x - m) / jnp.sqrt(v + eps) * g + b

    out = jnp.maximum(bn(conv(x_nchw, w1), bn1), 0.0)
    out = bn(conv(out, w2), bn2)
    return jnp.maximum(out + x_nchw, 0.0)


if __name__ == "__main__":
    # Small shapes consistent with BasicBlock defaults (inplanes == planes, stride=1).
    N, C, H, W = 2, 8, 16, 16
    P = C

    key = jax.random.PRNGKey(0)
    ks = jax.random.split(key, 11)
    x = jax.random.normal(ks[0], (N, C, H, W), dtype=jnp.float32)
    w1 = jax.random.normal(ks[1], (P, C, 3, 3), dtype=jnp.float32) * 0.1
    w2 = jax.random.normal(ks[2], (P, P, 3, 3), dtype=jnp.float32) * 0.1
    bn1 = (jax.random.uniform(ks[3], (P,), jnp.float32, 0.5, 1.5),     # gamma
           jax.random.normal(ks[4], (P,), jnp.float32) * 0.1,          # beta
           jax.random.normal(ks[5], (P,), jnp.float32) * 0.1,          # running_mean
           jax.random.uniform(ks[6], (P,), jnp.float32, 0.5, 1.5))     # running_var
    bn2 = (jax.random.uniform(ks[7], (P,), jnp.float32, 0.5, 1.5),
           jax.random.normal(ks[8], (P,), jnp.float32) * 0.1,
           jax.random.normal(ks[9], (P,), jnp.float32) * 0.1,
           jax.random.uniform(ks[10], (P,), jnp.float32, 0.5, 1.5))

    y = basic_block_forward(x, w1, w2, bn1, bn2)
    jax.block_until_ready(y)

    y_ref = basic_block_ref(x, w1, w2, bn1, bn2)
    assert y.shape == (N, C, H, W)
    assert jnp.allclose(y, y_ref, atol=1e-4, rtol=1e-4), "mismatch vs reference"

    print("KERNEL_OK")
</pallas_src>

<mosaic_0001>
module attributes {stable_mosaic.version = 11 : i64} {
  func.func @_basic_block_kernel(%arg0: i32, %arg1: memref<1x16x16x8xf32, #tpu.memory_space<vmem>>, %arg2: memref<3x3x8x8xf32, #tpu.memory_space<vmem>>, %arg3: memref<3x3x8x8xf32, #tpu.memory_space<vmem>>, %arg4: memref<4x8xf32, #tpu.memory_space<vmem>>, %arg5: memref<1x16x16x8xf32, #tpu.memory_space<vmem>>, %arg6: memref<18x18x8xf32, #tpu.memory_space<vmem>>, %arg7: memref<18x18x8xf32, #tpu.memory_space<vmem>>) attributes {dimension_semantics = [#tpu.dimension_semantics<parallel>], iteration_bounds = array<i64: 2>, scalar_prefetch = 0 : i64, scratch_operands = 2 : i64, tpu.core_type = #tpu.core_type<tc>, window_params = [{transform_indices = @transform_0, window_bounds = array<i64: 1, 16, 16, 8>}, {pipeline_mode = #tpu.pipeline_mode<synchronous>, transform_indices = @transform_1, window_bounds = array<i64: 3, 3, 8, 8>}, {pipeline_mode = #tpu.pipeline_mode<synchronous>, transform_indices = @transform_2, window_bounds = array<i64: 3, 3, 8, 8>}, {pipeline_mode = #tpu.pipeline_mode<synchronous>, transform_indices = @transform_3, window_bounds = array<i64: 4, 8>}, {transform_indices = @transform_4, window_bounds = array<i64: 1, 16, 16, 8>}]} {
    %c0 = arith.constant 0 : index
    %c0_0 = arith.constant 0 : index
    %0 = vector.load %arg4[%c0, %c0_0] : memref<4x8xf32, #tpu.memory_space<vmem>>, vector<1x8xf32>
    %c1 = arith.constant 1 : index
    %c0_1 = arith.constant 0 : index
    %1 = vector.load %arg4[%c1, %c0_1] : memref<4x8xf32, #tpu.memory_space<vmem>>, vector<1x8xf32>
    %c2 = arith.constant 2 : index
    %c0_2 = arith.constant 0 : index
    %2 = vector.load %arg4[%c2, %c0_2] : memref<4x8xf32, #tpu.memory_space<vmem>>, vector<1x8xf32>
    %c3 = arith.constant 3 : index
    %c0_3 = arith.constant 0 : index
    %3 = vector.load %arg4[%c3, %c0_3] : memref<4x8xf32, #tpu.memory_space<vmem>>, vector<1x8xf32>
    %cst = arith.constant 0.000000e+00 : f32
    %4 = vector.broadcast %cst : f32 to vector<18x18x8xf32>
    %c0_4 = arith.constant 0 : index
    %c0_5 = arith.constant 0 : index
    %c0_6 = arith.constant 0 : index
    %5 = vector.load %arg6[%c0_4, %c0_5, %c0_6] : memref<18x18x8xf32, #tpu.memory_space<vmem>>, vector<18x18x8xf32>
    tpu.vector_store %arg6[%c0_4, %c0_5, %c0_6], %4 {strides = array<i32>} : memref<18x18x8xf32, #tpu.memory_space<vmem>>, vector<18x18x8xf32>,
    %c0_7 = arith.constant 0 : index
    %c0_8 = arith.constant 0 : index
    %c0_9 = arith.constant 0 : index
    %c0_10 = arith.constant 0 : index
    %6 = vector.load %arg1[%c0_7, %c0_8, %c0_9, %c0_10] : memref<1x16x16x8xf32, #tpu.memory_space<vmem>>, vector<1x16x16x8xf32>
    %7 = vector.shape_cast %6 : vector<1x16x16x8xf32> to vector<16x16x8xf32>
    %c1_11 = arith.constant 1 : index
    %c1_12 = arith.constant 1 : index
    %c0_13 = arith.constant 0 : index
    %8 = vector.load %arg6[%c1_11, %c1_12, %c0_13] : memref<18x18x8xf32, #tpu.memory_space<vmem>>, vector<16x16x8xf32>
    tpu.vector_store %arg6[%c1_11, %c1_12, %c0_13], %7 {strides = array<i32>} : memref<18x18x8xf32, #tpu.memory_space<vmem>>, vector<16x16x8xf32>,
    %cst_14 = arith.constant 0.000000e+00 : f32
    %9 = vector.broadcast %cst_14 : f32 to vector<256x8xf32>
    %c0_15 = arith.constant 0 : index
    %c0_16 = arith.constant 0 : index
    %c0_17 = arith.constant 0 : index
    %10 = vector.load %arg6[%c0_15, %c0_16, %c0_17] : memref<18x18x8xf32, #tpu.memory_space<vmem>>, vector<16x16x8xf32>
    %11 = vector.shape_cast %10 : vector<16x16x8xf32> to vector<256x8xf32>
    %c0_18 = arith.constant 0 : index
    %c0_19 = arith.constant 0 : index
    %c0_20 = arith.constant 0 : index
    %c0_21 = arith.constant 0 : index
    %12 = vector.load %arg2[%c0_18, %c0_19, %c0_20, %c0_21] : memref<3x3x8x8xf32, #tpu.memory_space<vmem>>, vector<1x1x8x8xf32>
    %13 = vector.shape_cast %12 : vector<1x1x8x8xf32> to vector<8x8xf32>
    %cst_22 = arith.constant dense<0.000000e+00> : vector<256x8xf32>
    %14 = tpu.matmul %11, %13, %cst_22 {dimension_numbers = #tpu.dot_dimension_numbers<[1], [0], [0], [1], [0, 0, 1, 1], [], []>} : vector<256x8xf32>, vector<8x8xf32>, vector<256x8xf32> -> vector<256x8xf32>
    %15 = arith.addf %9, %14 : vector<256x8xf32>
    %c0_23 = arith.constant 0 : index
    %c1_24 = arith.constant 1 : index
    %c0_25 = arith.constant 0 : index
    %16 = vector.load %arg6[%c0_23, %c1_24, %c0_25] : memref<18x18x8xf32, #tpu.memory_space<vmem>>, vector<16x16x8xf32>
    %17 = vector.shape_cast %16 : vector<16x16x8xf32> to vector<256x8xf32>
    %c0_26 = arith.constant 0 : index
    %c1_27 = arith.constant 1 : index
    %c0_28 = arith.constant 0 : index
    %c0_29 = arith.constant 0 : index
    %18 = vector.load %arg2[%c0_26, %c1_27, %c0_28, %c0_29] : memref<3x3x8x8xf32, #tpu.memory_space<vmem>>, vector<1x1x8x8xf32>
    %19 = vector.shape_cast %18 : vector<1x1x8x8xf32> to vector<8x8xf32>
    %cst_30 = arith.constant dense<0.000000e+00> : vector<256x8xf32>
    %20 = tpu.matmul %17, %19, %cst_30 {dimension_numbers = #tpu.dot_dimension_numbers<[1], [0], [0], [1], [0, 0, 1, 1], [], []>} : vector<256x8xf32>, vector<8x8xf32>, vector<256x8xf32> -> vector<256x8xf32>
    %21 = arith.addf %15, %20 : vector<256x8xf32>
    %c0_31 = arith.constant 0 : index
    %c2_32 = arith.constant 2 : index
    %c0_33 = arith.constant 0 : index
    %22 = vector.load %arg6[%c0_31, %c2_32, %c0_33] : memref<18x18x8xf32, #tpu.memory_space<vmem>>, vector<16x16x8xf32>
    %23 = vector.shape_cast %22 : vector<16x16x8xf32> to vector<256x8xf32>
    %c0_34 = arith.constant 0 : index
    %c2_35 = arith.constant 2 : index
    %c0_36 = arith.constant 0 : index
    %c0_37 = arith.constant 0 : index
    %24 = vector.load %arg2[%c0_34, %c2_35, %c0_36, %c0_37] : memref<3x3x8x8xf32, #tpu.memory_space<vmem>>, vector<1x1x8x8xf32>
    %25 = vector.shape_cast %24 : vector<1x1x8x8xf32> to vector<8x8xf32>
    %cst_38 = arith.constant dense<0.000000e+00> : vector<256x8xf32>
    %26 = tpu.matmul %23, %25, %cst_38 {dimension_numbers = #tpu.dot_dimension_numbers<[1], [0], [0], [1], [0, 0, 1, 1], [], []>} : vector<256x8xf32>, vector<8x8xf32>, vector<256x8xf32> -> vector<256x8xf32>
    %27 = arith.addf %21, %26 : vector<256x8xf32>
    %c1_39 = arith.constant 1 : index
    %c0_40 = arith.constant 0 : index
    %c0_41 = arith.constant 0 : index
    %28 = vector.load %arg6[%c1_39, %c0_40, %c0_41] : memref<18x18x8xf32, #tpu.memory_space<vmem>>, vector<16x16x8xf32>
    %29 = vector.shape_cast %28 : vector<16x16x8xf32> to vector<256x8xf32>
    %c1_42 = arith.constant 1 : index
    %c0_43 = arith.constant 0 : index
    %c0_44 = arith.constant 0 : index
    %c0_45 = arith.constant 0 : index
    %30 = vector.load %arg2[%c1_42, %c0_43, %c0_44, %c0_45] : memref<3x3x8x8xf32, #tpu.memory_space<vmem>>, vector<1x1x8x8xf32>
    %31 = vector.shape_cast %30 : vector<1x1x8x8xf32> to vector<8x8xf32>
    %cst_46 = arith.constant dense<0.000000e+00> : vector<256x8xf32>
    %32 = tpu.matmul %29, %31, %cst_46 {dimension_numbers = #tpu.dot_dimension_numbers<[1], [0], [0], [1], [0, 0, 1, 1], [], []>} : vector<256x8xf32>, vector<8x8xf32>, vector<256x8xf32> -> vector<256x8xf32>
    %33 = arith.addf %27, %32 : vector<256x8xf32>
    %c1_47 = arith.constant 1 : index
    %c1_48 = arith.constant 1 : index
    %c0_49 = arith.constant 0 : index
    %34 = vector.load %arg6[%c1_47, %c1_48, %c0_49] : memref<18x18x8xf32, #tpu.memory_space<vmem>>, vector<16x16x8xf32>
    %35 = vector.shape_cast %34 : vector<16x16x8xf32> to vector<256x8xf32>
    %c1_50 = arith.constant 1 : index
    %c1_51 = arith.constant 1 : index
    %c0_52 = arith.constant 0 : index
    %c0_53 = arith.constant 0 : index
    %36 = vector.load %arg2[%c1_50, %c1_51, %c0_52, %c0_53] : memref<3x3x8x8xf32, #tpu.memory_space<vmem>>, vector<1x1x8x8xf32>
    %37 = vector.shape_cast %36 : vector<1x1x8x8xf32> to vector<8x8xf32>
    %cst_54 = arith.constant dense<0.000000e+00> : vector<256x8xf32>
    %38 = tpu.matmul %35, %37, %cst_54 {dimension_numbers = #tpu.dot_dimension_numbers<[1], [0], [0], [1], [0, 0, 1, 1], [], []>} : vector<256x8xf32>, vector<8x8xf32>, vector<256x8xf32> -> vector<256x8xf32>
    %39 = arith.addf %33, %38 : vector<256x8xf32>
    %c1_55 = arith.constant 1 : index
    %c2_56 = arith.constant 2 : index
    %c0_57 = arith.constant 0 : index
    %40 = vector.load %arg6[%c1_55, %c2_56, %c0_57] : memref<18x18x8xf32, #tpu.memory_space<vmem>>, vector<16x16x8xf32>
    %41 = vector.shape_cast %40 : vector<16x16x8xf32> to vector<256x8xf32>
    %c1_58 = arith.constant 1 : index
    %c2_59 = arith.constant 2 : index
    %c0_60 = arith.constant 0 : index
    %c0_61 = arith.constant 0 : index
    %42 = vector.load %arg2[%c1_58, %c2_59, %c0_60, %c0_61] : memref<3x3x8x8xf32, #tpu.memory_space<vmem>>, vector<1x1x8x8xf32>
    %43 = vector.shape_cast %42 : vector<1x1x8x8xf32> to vector<8x8xf32>
    %cst_62 = arith.constant dense<0.000000e+00> : vector<256x8xf32>
    %44 = tpu.matmul %41, %43, %cst_62 {dimension_numbers = #tpu.dot_dimension_numbers<[1], [0], [0], [1], [0, 0, 1, 1], [], []>} : vector<256x8xf32>, vector<8x8xf32>, vector<256x8xf32> -> vector<256x8xf32>
    %45 = arith.addf %39, %44 : vector<256x8xf32>
    %c2_63 = arith.constant 2 : index
    %c0_64 = arith.constant 0 : index
    %c0_65 = arith.constant 0 : index
    %46 = vector.load %arg6[%c2_63, %c0_64, %c0_65] : memref<18x18x8xf32, #tpu.memory_space<vmem>>, vector<16x16x8xf32>
    %47 = vector.shape_cast %46 : vector<16x16x8xf32> to vector<256x8xf32>
    %c2_66 = arith.constant 2 : index
    %c0_67 = arith.constant 0 : index
    %c0_68 = arith.constant 0 : index
    %c0_69 = arith.constant 0 : index
    %48 = vector.load %arg2[%c2_66, %c0_67, %c0_68, %c0_69] : memref<3x3x8x8xf32, #tpu.memory_space<vmem>>, vector<1x1x8x8xf32>
    %49 = vector.shape_cast %48 : vector<1x1x8x8xf32> to vector<8x8xf32>
    %cst_70 = arith.constant dense<0.000000e+00> : vector<256x8xf32>
    %50 = tpu.matmul %47, %49, %cst_70 {dimension_numbers = #tpu.dot_dimension_numbers<[1], [0], [0], [1], [0, 0, 1, 1], [], []>} : vector<256x8xf32>, vector<8x8xf32>, vector<256x8xf32> -> vector<256x8xf32>
    %51 = arith.addf %45, %50 : vector<256x8xf32>
    %c2_71 = arith.constant 2 : index
    %c1_72 = arith.constant 1 : index
    %c0_73 = arith.constant 0 : index
    %52 = vector.load %arg6[%c2_71, %c1_72, %c0_73] : memref<18x18x8xf32, #tpu.memory_space<vmem>>, vector<16x16x8xf32>
    %53 = vector.shape_cast %52 : vector<16x16x8xf32> to vector<256x8xf32>
    %c2_74 = arith.constant 2 : index
    %c1_75 = arith.constant 1 : index
    %c0_76 = arith.constant 0 : index
    %c0_77 = arith.constant 0 : index
    %54 = vector.load %arg2[%c2_74, %c1_75, %c0_76, %c0_77] : memref<3x3x8x8xf32, #tpu.memory_space<vmem>>, vector<1x1x8x8xf32>
    %55 = vector.shape_cast %54 : vector<1x1x8x8xf32> to vector<8x8xf32>
    %cst_78 = arith.constant dense<0.000000e+00> : vector<256x8xf32>
    %56 = tpu.matmul %53, %55, %cst_78 {dimension_numbers = #tpu.dot_dimension_numbers<[1], [0], [0], [1], [0, 0, 1, 1], [], []>} : vector<256x8xf32>, vector<8x8xf32>, vector<256x8xf32> -> vector<256x8xf32>
    %57 = arith.addf %51, %56 : vector<256x8xf32>
    %c2_79 = arith.constant 2 : index
    %c2_80 = arith.constant 2 : index
    %c0_81 = arith.constant 0 : index
    %58 = vector.load %arg6[%c2_79, %c2_80, %c0_81] : memref<18x18x8xf32, #tpu.memory_space<vmem>>, vector<16x16x8xf32>
    %59 = vector.shape_cast %58 : vector<16x16x8xf32> to vector<256x8xf32>
    %c2_82 = arith.constant 2 : index
    %c2_83 = arith.constant 2 : index
    %c0_84 = arith.constant 0 : index
    %c0_85 = arith.constant 0 : index
    %60 = vector.load %arg2[%c2_82, %c2_83, %c0_84, %c0_85] : memref<3x3x8x8xf32, #tpu.memory_space<vmem>>, vector<1x1x8x8xf32>
    %61 = vector.shape_cast %60 : vector<1x1x8x8xf32> to vector<8x8xf32>
    %cst_86 = arith.constant dense<0.000000e+00> : vector<256x8xf32>
    %62 = tpu.matmul %59, %61, %cst_86 {dimension_numbers = #tpu.dot_dimension_numbers<[1], [0], [0], [1], [0, 0, 1, 1], [], []>} : vector<256x8xf32>, vector<8x8xf32>, vector<256x8xf32> -> vector<256x8xf32>
    %63 = arith.addf %57, %62 : vector<256x8xf32>
    %64 = vector.broadcast %0 : vector<1x8xf32> to vector<256x8xf32>
    %65 = arith.mulf %63, %64 : vector<256x8xf32>
    %66 = vector.broadcast %1 : vector<1x8xf32> to vector<256x8xf32>
    %67 = arith.addf %65, %66 : vector<256x8xf32>
    %cst_87 = arith.constant 0.000000e+00 : f32
    %68 = vector.broadcast %cst_87 : f32 to vector<256x8xf32>
    %69 = arith.maximumf %67, %68 : vector<256x8xf32>
    %cst_88 = arith.constant 0.000000e+00 : f32
    %70 = vector.broadcast %cst_88 : f32 to vector<18x18x8xf32>
    %c0_89 = arith.constant 0 : index
    %c0_90 = arith.constant 0 : index
    %c0_91 = arith.constant 0 : index
    %71 = vector.load %arg7[%c0_89, %c0_90, %c0_91] : memref<18x18x8xf32, #tpu.memory_space<vmem>>, vector<18x18x8xf32>
    tpu.vector_store %arg7[%c0_89, %c0_90, %c0_91], %70 {strides = array<i32>} : memref<18x18x8xf32, #tpu.memory_space<vmem>>, vector<18x18x8xf32>,
    %72 = vector.shape_cast %69 : vector<256x8xf32> to vector<16x16x8xf32>
    %c1_92 = arith.constant 1 : index
    %c1_93 = arith.constant 1 : index
    %c0_94 = arith.constant 0 : index
    %73 = vector.load %arg7[%c1_92, %c1_93, %c0_94] : memref<18x18x8xf32, #tpu.memory_space<vmem>>, vector<16x16x8xf32>
    tpu.vector_store %arg7[%c1_92, %c1_93, %c0_94], %72 {strides = array<i32>} : memref<18x18x8xf32, #tpu.memory_space<vmem>>, vector<16x16x8xf32>,
    %cst_95 = arith.constant 0.000000e+00 : f32
    %74 = vector.broadcast %cst_95 : f32 to vector<256x8xf32>
    %c0_96 = arith.constant 0 : index
    %c0_97 = arith.constant 0 : index
    %c0_98 = arith.constant 0 : index
    %75 = vector.load %arg7[%c0_96, %c0_97, %c0_98] : memref<18x18x8xf32, #tpu.memory_space<vmem>>, vector<16x16x8xf32>
    %76 = vector.shape_cast %75 : vector<16x16x8xf32> to vector<256x8xf32>
    %c0_99 = arith.constant 0 : index
    %c0_100 = arith.constant 0 : index
    %c0_101 = arith.constant 0 : index
    %c0_102 = arith.constant 0 : index
    %77 = vector.load %arg3[%c0_99, %c0_100, %c0_101, %c0_102] : memref<3x3x8x8xf32, #tpu.memory_space<vmem>>, vector<1x1x8x8xf32>
    %78 = vector.shape_cast %77 : vector<1x1x8x8xf32> to vector<8x8xf32>
    %cst_103 = arith.constant dense<0.000000e+00> : vector<256x8xf32>
    %79 = tpu.matmul %76, %78, %cst_103 {dimension_numbers = #tpu.dot_dimension_numbers<[1], [0], [0], [1], [0, 0, 1, 1], [], []>} : vector<256x8xf32>, vector<8x8xf32>, vector<256x8xf32> -> vector<256x8xf32>
    %80 = arith.addf %74, %79 : vector<256x8xf32>
    %c0_104 = arith.constant 0 : index
    %c1_105 = arith.constant 1 : index
    %c0_106 = arith.constant 0 : index
    %81 = vector.load %arg7[%c0_104, %c1_105, %c0_106] : memref<18x18x8xf32, #tpu.memory_space<vmem>>, vector<16x16x8xf32>
    %82 = vector.shape_cast %81 : vector<16x16x8xf32> to vector<256x8xf32>
    %c0_107 = arith.constant 0 : index
    %c1_108 = arith.constant 1 : index
    %c0_109 = arith.constant 0 : index
    %c0_110 = arith.constant 0 : index
    %83 = vector.load %arg3[%c0_107, %c1_108, %c0_109, %c0_110] : memref<3x3x8x8xf32, #tpu.memory_space<vmem>>, vector<1x1x8x8xf32>
    %84 = vector.shape_cast %83 : vector<1x1x8x8xf32> to vector<8x8xf32>
    %cst_111 = arith.constant dense<0.000000e+00> : vector<256x8xf32>
    %85 = tpu.matmul %82, %84, %cst_111 {dimension_numbers = #tpu.dot_dimension_numbers<[1], [0], [0], [1], [0, 0, 1, 1], [], []>} : vector<256x8xf32>, vector<8x8xf32>, vector<256x8xf32> -> vector<256x8xf32>
    %86 = arith.addf %80, %85 : vector<256x8xf32>
    %c0_112 = arith.constant 0 : index
    %c2_113 = arith.constant 2 : index
    %c0_114 = arith.constant 0 : index
    %87 = vector.load %arg7[%c0_112, %c2_113, %c0_114] : memref<18x18x8xf32, #tpu.memory_space<vmem>>, vector<16x16x8xf32>
    %88 = vector.shape_cast %87 : vector<16x16x8xf32> to vector<256x8xf32>
    %c0_115 = arith.constant 0 : index
    %c2_116 = arith.constant 2 : index
    %c0_117 = arith.constant 0 : index
    %c0_118 = arith.constant 0 : index
    %89 = vector.load %arg3[%c0_115, %c2_116, %c0_117, %c0_118] : memref<3x3x8x8xf32, #tpu.memory_space<vmem>>, vector<1x1x8x8xf32>
    %90 = vector.shape_cast %89 : vector<1x1x8x8xf32> to vector<8x8xf32>
    %cst_119 = arith.constant dense<0.000000e+00> : vector<256x8xf32>
    %91 = tpu.matmul %88, %90, %cst_119 {dimension_numbers = #tpu.dot_dimension_numbers<[1], [0], [0], [1], [0, 0, 1, 1], [], []>} : vector<256x8xf32>, vector<8x8xf32>, vector<256x8xf32> -> vector<256x8xf32>
    %92 = arith.addf %86, %91 : vector<256x8xf32>
    %c1_120 = arith.constant 1 : index
    %c0_121 = arith.constant 0 : index
    %c0_122 = arith.constant 0 : index
    %93 = vector.load %arg7[%c1_120, %c0_121, %c0_122] : memref<18x18x8xf32, #tpu.memory_space<vmem>>, vector<16x16x8xf32>
    %94 = vector.shape_cast %93 : vector<16x16x8xf32> to vector<256x8xf32>
    %c1_123 = arith.constant 1 : index
    %c0_124 = arith.constant 0 : index
    %c0_125 = arith.constant 0 : index
    %c0_126 = arith.constant 0 : index
    %95 = vector.load %arg3[%c1_123, %c0_124, %c0_125, %c0_126] : memref<3x3x8x8xf32, #tpu.memory_space<vmem>>, vector<1x1x8x8xf32>
    %96 = vector.shape_cast %95 : vector<1x1x8x8xf32> to vector<8x8xf32>
    %cst_127 = arith.constant dense<0.000000e+00> : vector<256x8xf32>
    %97 = tpu.matmul %94, %96, %cst_127 {dimension_numbers = #tpu.dot_dimension_numbers<[1], [0], [0], [1], [0, 0, 1, 1], [], []>} : vector<256x8xf32>, vector<8x8xf32>, vector<256x8xf32> -> vector<256x8xf32>
    %98 = arith.addf %92, %97 : vector<256x8xf32>
    %c1_128 = arith.constant 1 : index
    %c1_129 = arith.constant 1 : index
    %c0_130 = arith.constant 0 : index
    %99 = vector.load %arg7[%c1_128, %c1_129, %c0_130] : memref<18x18x8xf32, #tpu.memory_space<vmem>>, vector<16x16x8xf32>
    %100 = vector.shape_cast %99 : vector<16x16x8xf32> to vector<256x8xf32>
    %c1_131 = arith.constant 1 : index
    %c1_132 = arith.constant 1 : index
    %c0_133 = arith.constant 0 : index
    %c0_134 = arith.constant 0 : index
    %101 = vector.load %arg3[%c1_131, %c1_132, %c0_133, %c0_134] : memref<3x3x8x8xf32, #tpu.memory_space<vmem>>, vector<1x1x8x8xf32>
    %102 = vector.shape_cast %101 : vector<1x1x8x8xf32> to vector<8x8xf32>
    %cst_135 = arith.constant dense<0.000000e+00> : vector<256x8xf32>
    %103 = tpu.matmul %100, %102, %cst_135 {dimension_numbers = #tpu.dot_dimension_numbers<[1], [0], [0], [1], [0, 0, 1, 1], [], []>} : vector<256x8xf32>, vector<8x8xf32>, vector<256x8xf32> -> vector<256x8xf32>
    %104 = arith.addf %98, %103 : vector<256x8xf32>
    %c1_136 = arith.constant 1 : index
    %c2_137 = arith.constant 2 : index
    %c0_138 = arith.constant 0 : index
    %105 = vector.load %arg7[%c1_136, %c2_137, %c0_138] : memref<18x18x8xf32, #tpu.memory_space<vmem>>, vector<16x16x8xf32>
    %106 = vector.shape_cast %105 : vector<16x16x8xf32> to vector<256x8xf32>
    %c1_139 = arith.constant 1 : index
    %c2_140 = arith.constant 2 : index
    %c0_141 = arith.constant 0 : index
    %c0_142 = arith.constant 0 : index
    %107 = vector.load %arg3[%c1_139, %c2_140, %c0_141, %c0_142] : memref<3x3x8x8xf32, #tpu.memory_space<vmem>>, vector<1x1x8x8xf32>
    %108 = vector.shape_cast %107 : vector<1x1x8x8xf32> to vector<8x8xf32>
    %cst_143 = arith.constant dense<0.000000e+00> : vector<256x8xf32>
    %109 = tpu.matmul %106, %108, %cst_143 {dimension_numbers = #tpu.dot_dimension_numbers<[1], [0], [0], [1], [0, 0, 1, 1], [], []>} : vector<256x8xf32>, vector<8x8xf32>, vector<256x8xf32> -> vector<256x8xf32>
    %110 = arith.addf %104, %109 : vector<256x8xf32>
    %c2_144 = arith.constant 2 : index
    %c0_145 = arith.constant 0 : index
    %c0_146 = arith.constant 0 : index
    %111 = vector.load %arg7[%c2_144, %c0_145, %c0_146] : memref<18x18x8xf32, #tpu.memory_space<vmem>>, vector<16x16x8xf32>
    %112 = vector.shape_cast %111 : vector<16x16x8xf32> to vector<256x8xf32>
    %c2_147 = arith.constant 2 : index
    %c0_148 = arith.constant 0 : index
    %c0_149 = arith.constant 0 : index
    %c0_150 = arith.constant 0 : index
    %113 = vector.load %arg3[%c2_147, %c0_148, %c0_149, %c0_150] : memref<3x3x8x8xf32, #tpu.memory_space<vmem>>, vector<1x1x8x8xf32>
    %114 = vector.shape_cast %113 : vector<1x1x8x8xf32> to vector<8x8xf32>
    %cst_151 = arith.constant dense<0.000000e+00> : vector<256x8xf32>
    %115 = tpu.matmul %112, %114, %cst_151 {dimension_numbers = #tpu.dot_dimension_numbers<[1], [0], [0], [1], [0, 0, 1, 1], [], []>} : vector<256x8xf32>, vector<8x8xf32>, vector<256x8xf32> -> vector<256x8xf32>
    %116 = arith.addf %110, %115 : vector<256x8xf32>
    %c2_152 = arith.constant 2 : index
    %c1_153 = arith.constant 1 : index
    %c0_154 = arith.constant 0 : index
    %117 = vector.load %arg7[%c2_152, %c1_153, %c0_154] : memref<18x18x8xf32, #tpu.memory_space<vmem>>, vector<16x16x8xf32>
    %118 = vector.shape_cast %117 : vector<16x16x8xf32> to vector<256x8xf32>
    %c2_155 = arith.constant 2 : index
    %c1_156 = arith.constant 1 : index
    %c0_157 = arith.constant 0 : index
    %c0_158 = arith.constant 0 : index
    %119 = vector.load %arg3[%c2_155, %c1_156, %c0_157, %c0_158] : memref<3x3x8x8xf32, #tpu.memory_space<vmem>>, vector<1x1x8x8xf32>
    %120 = vector.shape_cast %119 : vector<1x1x8x8xf32> to vector<8x8xf32>
    %cst_159 = arith.constant dense<0.000000e+00> : vector<256x8xf32>
    %121 = tpu.matmul %118, %120, %cst_159 {dimension_numbers = #tpu.dot_dimension_numbers<[1], [0], [0], [1], [0, 0, 1, 1], [], []>} : vector<256x8xf32>, vector<8x8xf32>, vector<256x8xf32> -> vector<256x8xf32>
    %122 = arith.addf %116, %121 : vector<256x8xf32>
    %c2_160 = arith.constant 2 : index
    %c2_161 = arith.constant 2 : index
    %c0_162 = arith.constant 0 : index
    %123 = vector.load %arg7[%c2_160, %c2_161, %c0_162] : memref<18x18x8xf32, #tpu.memory_space<vmem>>, vector<16x16x8xf32>
    %124 = vector.shape_cast %123 : vector<16x16x8xf32> to vector<256x8xf32>
    %c2_163 = arith.constant 2 : index
    %c2_164 = arith.constant 2 : index
    %c0_165 = arith.constant 0 : index
    %c0_166 = arith.constant 0 : index
    %125 = vector.load %arg3[%c2_163, %c2_164, %c0_165, %c0_166] : memref<3x3x8x8xf32, #tpu.memory_space<vmem>>, vector<1x1x8x8xf32>
    %126 = vector.shape_cast %125 : vector<1x1x8x8xf32> to vector<8x8xf32>
    %cst_167 = arith.constant dense<0.000000e+00> : vector<256x8xf32>
    %127 = tpu.matmul %124, %126, %cst_167 {dimension_numbers = #tpu.dot_dimension_numbers<[1], [0], [0], [1], [0, 0, 1, 1], [], []>} : vector<256x8xf32>, vector<8x8xf32>, vector<256x8xf32> -> vector<256x8xf32>
    %128 = arith.addf %122, %127 : vector<256x8xf32>
    %129 = vector.broadcast %2 : vector<1x8xf32> to vector<256x8xf32>
    %130 = arith.mulf %128, %129 : vector<256x8xf32>
    %131 = vector.broadcast %3 : vector<1x8xf32> to vector<256x8xf32>
    %132 = arith.addf %130, %131 : vector<256x8xf32>
    %c0_168 = arith.constant 0 : index
    %c0_169 = arith.constant 0 : index
    %c0_170 = arith.constant 0 : index
    %c0_171 = arith.constant 0 : index
    %133 = vector.load %arg1[%c0_168, %c0_169, %c0_170, %c0_171] : memref<1x16x16x8xf32, #tpu.memory_space<vmem>>, vector<1x16x16x8xf32>
    %134 = vector.shape_cast %133 : vector<1x16x16x8xf32> to vector<16x16x8xf32>
    %135 = vector.shape_cast %134 : vector<16x16x8xf32> to vector<256x8xf32>
    %136 = arith.addf %132, %135 : vector<256x8xf32>
    %cst_172 = arith.constant 0.000000e+00 : f32
    %137 = vector.broadcast %cst_172 : f32 to vector<256x8xf32>
    %138 = arith.maximumf %136, %137 : vector<256x8xf32>
    %139 = vector.shape_cast %138 : vector<256x8xf32> to vector<1x16x16x8xf32>
    %c0_173 = arith.constant 0 : index
    %c0_174 = arith.constant 0 : index
    %c0_175 = arith.constant 0 : index
    %c0_176 = arith.constant 0 : index
    %140 = vector.load %arg5[%c0_173, %c0_174, %c0_175, %c0_176] : memref<1x16x16x8xf32, #tpu.memory_space<vmem>>, vector<1x16x16x8xf32>
    tpu.vector_store %arg5[%c0_173, %c0_174, %c0_175, %c0_176], %139 {strides = array<i32>} : memref<1x16x16x8xf32, #tpu.memory_space<vmem>>, vector<1x16x16x8xf32>,
    return
  }
  func.func @transform_0(%arg0: i32) -> (i32, i32, i32, i32) {
    %c0_i32 = arith.constant 0 : i32
    %c0_i32_0 = arith.constant 0 : i32
    %c0_i32_1 = arith.constant 0 : i32
    %c0_i32_2 = arith.constant 0 : i32
    return %arg0, %c0_i32, %c0_i32_0, %c0_i32_1 : i32, i32, i32, i32
  }
  func.func @transform_1(%arg0: i32) -> (i32, i32, i32, i32) {
    %c0_i32 = arith.constant 0 : i32
    %c0_i32_0 = arith.constant 0 : i32
    %c0_i32_1 = arith.constant 0 : i32
    %c0_i32_2 = arith.constant 0 : i32
    %c0_i32_3 = arith.constant 0 : i32
    return %c0_i32, %c0_i32_0, %c0_i32_1, %c0_i32_2 : i32, i32, i32, i32
  }
  func.func @transform_2(%arg0: i32) -> (i32, i32, i32, i32) {
    %c0_i32 = arith.constant 0 : i32
    %c0_i32_0 = arith.constant 0 : i32
    %c0_i32_1 = arith.constant 0 : i32
    %c0_i32_2 = arith.constant 0 : i32
    %c0_i32_3 = arith.constant 0 : i32
    return %c0_i32, %c0_i32_0, %c0_i32_1, %c0_i32_2 : i32, i32, i32, i32
  }
  func.func @transform_3(%arg0: i32) -> (i32, i32) {
    %c0_i32 = arith.constant 0 : i32
    %c0_i32_0 = arith.constant 0 : i32
    %c0_i32_1 = arith.constant 0 : i32
    return %c0_i32, %c0_i32_0 : i32, i32
  }
  func.func @transform_4(%arg0: i32) -> (i32, i32, i32, i32) {
    %c0_i32 = arith.constant 0 : i32
    %c0_i32_0 = arith.constant 0 : i32
    %c0_i32_1 = arith.constant 0 : i32
    %c0_i32_2 = arith.constant 0 : i32
    return %arg0, %c0_i32, %c0_i32_0, %c0_i32_1 : i32, i32, i32, i32
  }
}

</mosaic_0001>

<bundles_post_ra>
// kernel: tpu_custom_call.1
= control target key start
LH: loop header
LB: loop body
LE: loop exit
PB: predicated region body
PF: predicated region fallthrough
CT: control target
= control target key end

     0   :  { %s10265_s15 = smov 0   ;;  %s12442_s0 = inlined_call_operand.vmem [shape: f32[2,16,16,8], index: 0, kind: input, shape index: {}]   ;;  %s12443_s1 = inlined_call_operand.vmem [shape: f32[3,3,8,8], index: 1, kind: input, shape index: {}]   ;;  %s12444_s2 = inlined_call_operand.vmem [shape: f32[3,3,8,8], index: 2, kind: input, shape index: {}]   ;;  %s12445_s3 = inlined_call_operand.vmem [shape: f32[4,8], index: 3, kind: input, shape index: {}]   ;;  %s12446_s4 = inlined_call_operand.vmem [shape: f32[2,16,16,8], index: 4, kind: output, shape index: {}]  }
   0x1 LB: > { %s7607_s16 = sadd.s32 4294967295, %s10237_s15   ;;  %p7611_p0 = scmp.ge.s32.totalorder %s10237_s15, 1  ;;  %s10237_s15 = sphi %s10265_s15, %s14_s15  }
   0x2   : > { %p162_p1 = scmp.lt.s32.totalorder %s10237_s15, 3 }
   0x4   : > { %p163_p2 = pnand %p7611_p0, %p162_p1 }
   0x6   : > { %166 = sbr.rel (%p163_p2) target bundleno = 1603 (0x643), region = 36 }
   0xd   : > { %v10276_v0 = vld [vmem:[%s12443_s1 + $0x8] sm:$0xff]  ;;  %vm202_vm0 = vcmask 64512   ;;  %v10281_v1 = vld [vmem:[%s12443_s1] sm:$0xff]  ;;  %vm205_vm1 = vcmask 58368   ;;  %p10285_p3 = scmp.lt.s32.totalorder %s7607_s16, 1  ;;  %v10239_v2 = vmov 0.0  }
   0xe   : > { %8810 = vmatprep.subr.mxu0 %v10276_v0  ;;  %203 = vst.msk [vmem:[#allocation2] sm:$0xff] %vm202_vm0, %v10239_v2  ;;  %204 = vst.msk [vmem:[#allocation2 + $0x8] sm:$0xff] %vm202_vm0, %v10239_v2  ;;  %v10534_v9 = vld [vmem:[%s12443_s1 + $0x10] sm:$0xff] }
   0xf   : > { %207 = vst.msk [vmem:[#allocation2 + $0x18] sm:$0xff] %vm202_vm0, %v10239_v2  ;;  %208 = vst.msk [vmem:[#allocation2 + $0x20] sm:$0xff] %vm202_vm0, %v10239_v2  ;;  %8811 = vmatpush3.msra.mxu0 %v10276_v0  ;;  %s12720_s16 = smov (!%p10285_p3, %s7607_s16), 1 }
  0x10   : > { %210 = vst.msk [vmem:[#allocation2 + $0x30] sm:$0xff] %vm202_vm0, %v10239_v2  ;;  %211 = vst.msk [vmem:[#allocation2 + $0x38] sm:$0xff] %vm202_vm0, %v10239_v2  ;;  %8860 = vmatprep.subr.mxu0 %v10281_v1  ;;  %s8214_s22 = sshll.u32 %s12720_s16, 8 }
  0x11   : > { %213 = vst.msk [vmem:[#allocation2 + $0x48] sm:$0xff] %vm202_vm0, %v10239_v2  ;;  %214 = vst.msk [vmem:[#allocation2 + $0x50] sm:$0xff] %vm202_vm0, %v10239_v2  ;;  %s10520_s25 = scalar_lea.vmem %s12442_s0, %s8214_s22  ;;  %s12284_s23 = scalar_lea.vmem %s12446_s4, %s8214_s22 }
  0x12   : > { %216 = vst.msk [vmem:[#allocation2 + $0x60] sm:$0xff] %vm202_vm0, %v10239_v2  ;;  %217 = vst.msk [vmem:[#allocation2 + $0x68] sm:$0xff] %vm202_vm0, %v10239_v2  ;;  %v258_v3 = vld [vmem:[%s10520_s25] sm:$0xff]  ;;  %v259_v4 = vld [vmem:[%s10520_s25 + $0x8] sm:$0xff] }
  0x13   : > { %219 = vst.msk [vmem:[#allocation2 + $0x78] sm:$0xff] %vm202_vm0, %v10239_v2  ;;  %220 = vst.msk [vmem:[#allocation2 + $0x80] sm:$0xff] %vm202_vm0, %v10239_v2  ;;  %v260_v5 = vld [vmem:[%s10520_s25 + $0x10] sm:$0xff]  ;;  %v261_v6 = vld [vmem:[%s10520_s25 + $0x18] sm:$0xff] }
  0x14   : > { %222 = vst.msk [vmem:[#allocation2 + $0x90] sm:$0xff] %vm202_vm0, %v10239_v2  ;;  %223 = vst.msk [vmem:[#allocation2 + $0x98] sm:$0xff] %vm202_vm0, %v10239_v2  ;;  %v262_v7 = vld [vmem:[%s10520_s25 + $0x20] sm:$0xff]  ;;  %v263_v8 = vld [vmem:[%s10520_s25 + $0x28] sm:$0xff] }
  0x15   : > { %225 = vst.msk [vmem:[#allocation2 + $0xa8] sm:$0xff] %vm202_vm0, %v10239_v2  ;;  %226 = vst.msk [vmem:[#allocation2 + $0xb0] sm:$0xff] %vm202_vm0, %v10239_v2  ;;  %v356_v10 = vld [vmem:[#allocation2 + $0x1] sm:$0xff]  ;;  %v264_v12 = vld [vmem:[%s10520_s25 + $0x30] sm:$0xff] }
  0x16   : > { %228 = vst.msk [vmem:[#allocation2 + $0xc0] sm:$0xff] %vm202_vm0, %v10239_v2  ;;  %229 = vst.msk [vmem:[#allocation2 + $0xc8] sm:$0xff] %vm202_vm0, %v10239_v2  ;;  %8812 = vmatprep.mubr.msk.f32.mxu0 %vm202_vm0, %v356_v10  ;;  %v265_v13 = vld [vmem:[%s10520_s25 + $0x38] sm:$0xff]  ;;  %v266_v14 = vld [vmem:[%s10520_s25 + $0x40] sm:$0xff] }
  0x17   : > { %231 = vst.msk [vmem:[#allocation2 + $0xd8] sm:$0xff] %vm202_vm0, %v10239_v2  ;;  %232 = vst.msk [vmem:[#allocation2 + $0xe0] sm:$0xff] %vm202_vm0, %v10239_v2  ;;  %v267_v15 = vld [vmem:[%s10520_s25 + $0x48] sm:$0xff]  ;;  %v268_v16 = vld [vmem:[%s10520_s25 + $0x50] sm:$0xff] }
  0x18   : > { %234 = vst.msk [vmem:[#allocation2 + $0xf0] sm:$0xff] %vm202_vm0, %v10239_v2  ;;  %235 = vst.msk [vmem:[#allocation2 + $0xf8] sm:$0xff] %vm202_vm0, %v10239_v2  ;;  %v269_v17 = vld [vmem:[%s10520_s25 + $0x58] sm:$0xff]  ;;  %v270_v18 = vld [vmem:[%s10520_s25 + $0x60] sm:$0xff] }
  0x19   : > { %237 = vst.msk [vmem:[#allocation2 + $0x108] sm:$0xff] %vm202_vm0, %v10239_v2  ;;  %238 = vst.msk [vmem:[#allocation2 + $0x110] sm:$0xff] %vm202_vm0, %v10239_v2  ;;  %v271_v19 = vld [vmem:[%s10520_s25 + $0x68] sm:$0xff]  ;;  %v272_v20 = vld [vmem:[%s10520_s25 + $0x70] sm:$0xff] }
  0x1a   : > { %240 = vst.msk [vmem:[#allocation2 + $0x120] sm:$0xff] %vm202_vm0, %v10239_v2  ;;  %241 = vst.msk [vmem:[#allocation2 + $0x128] sm:$0xff] %vm202_vm0, %v10239_v2  ;;  %v273_v21 = vld [vmem:[%s10520_s25 + $0x78] sm:$0xff]  ;;  %v274_v22 = vld [vmem:[%s10520_s25 + $0x80] sm:$0xff] }
  0x1b   : > { %243 = vst.msk [vmem:[#allocation2 + $0x138] sm:$0xff] %vm202_vm0, %v10239_v2  ;;  %244 = vst.msk [vmem:[#allocation2 + $0x140] sm:$0xff] %vm202_vm0, %v10239_v2  ;;  %v275_v23 = vld [vmem:[%s10520_s25 + $0x88] sm:$0xff]  ;;  %v276_v24 = vld [vmem:[%s10520_s25 + $0x90] sm:$0xff] }
  0x1c   : > { %246 = vst.msk [vmem:[#allocation2 + $0x150] sm:$0xff] %vm202_vm0, %v10239_v2  ;;  %247 = vst.msk [vmem:[#allocation2 + $0x158] sm:$0xff] %vm202_vm0, %v10239_v2  ;;  %v277_v25 = vld [vmem:[%s10520_s25 + $0x98] sm:$0xff]  ;;  %v278_v26 = vld [vmem:[%s10520_s25 + $0xa0] sm:$0xff] }
  0x1d   : > { %249 = vst.msk [vmem:[#allocation2 + $0x168] sm:$0xff] %vm202_vm0, %v10239_v2  ;;  %250 = vst.msk [vmem:[#allocation2 + $0x170] sm:$0xff] %vm202_vm0, %v10239_v2  ;;  %v279_v27 = vld [vmem:[%s10520_s25 + $0xa8] sm:$0xff]  ;;  %v280_v31 = vld [vmem:[%s10520_s25 + $0xb0] sm:$0xff] }
  0x1e   : > { %252 = vst.msk [vmem:[#allocation2 + $0x180] sm:$0xff] %vm202_vm0, %v10239_v2  ;;  %253 = vst.msk [vmem:[#allocation2 + $0x188] sm:$0xff] %vm202_vm0, %v10239_v2  ;;  %v281_v32 = vld [vmem:[%s10520_s25 + $0xb8] sm:$0xff]  ;;  %v282_v37 = vld [vmem:[%s10520_s25 + $0xc0] sm:$0xff] }
  0x1f   : > { %255 = vst.msk [vmem:[#allocation2 + $0x198] sm:$0xff] %vm202_vm0, %v10239_v2  ;;  %256 = vst.msk [vmem:[#allocation2 + $0x1a0] sm:$0xff] %vm202_vm0, %v10239_v2  ;;  %v283_v38 = vld [vmem:[%s10520_s25 + $0xc8] sm:$0xff]  ;;  %v284_v39 = vld [vmem:[%s10520_s25 + $0xd0] sm:$0xff] }
  0x20   : > { %3846 = vst.msk [vmem:[#allocation3] sm:$0xff] %vm202_vm0, %v10239_v2  ;;  %3847 = vst.msk [vmem:[#allocation3 + $0x8] sm:$0xff] %vm202_vm0, %v10239_v2  ;;  %v285_v40 = vld [vmem:[%s10520_s25 + $0xd8] sm:$0xff]  ;;  %v286_v41 = vld [vmem:[%s10520_s25 + $0xe0] sm:$0xff] }
  0x21   : > { %3849 = vst.msk [vmem:[#allocation3 + $0x18] sm:$0xff] %vm202_vm0, %v10239_v2  ;;  %3850 = vst.msk [vmem:[#allocation3 + $0x20] sm:$0xff] %vm202_vm0, %v10239_v2  ;;  %v287_v42 = vld [vmem:[%s10520_s25 + $0xe8] sm:$0xff] }
  0x22   : > { %3852 = vst.msk [vmem:[#allocation3 + $0x30] sm:$0xff] %vm202_vm0, %v10239_v2  ;;  %3853 = vst.msk [vmem:[#allocation3 + $0x38] sm:$0xff] %vm202_vm0, %v10239_v2 }
  0x23   : > { %3855 = vst.msk [vmem:[#allocation3 + $0x48] sm:$0xff] %vm202_vm0, %v10239_v2  ;;  %3856 = vst.msk [vmem:[#allocation3 + $0x50] sm:$0xff] %vm202_vm0, %v10239_v2 }
  0x24   : > { %3858 = vst.msk [vmem:[#allocation3 + $0x60] sm:$0xff] %vm202_vm0, %v10239_v2  ;;  %3859 = vst.msk [vmem:[#allocation3 + $0x68] sm:$0xff] %vm202_vm0, %v10239_v2 }
  0x25   : > { %3861 = vst.msk [vmem:[#allocation3 + $0x78] sm:$0xff] %vm202_vm0, %v10239_v2  ;;  %3862 = vst.msk [vmem:[#allocation3 + $0x80] sm:$0xff] %vm202_vm0, %v10239_v2 }
  0x26   : > { %3864 = vst.msk [vmem:[#allocation3 + $0x90] sm:$0xff] %vm202_vm0, %v10239_v2  ;;  %3865 = vst.msk [vmem:[#allocation3 + $0x98] sm:$0xff] %vm202_vm0, %v10239_v2 }
  0x27   : > { %3867 = vst.msk [vmem:[#allocation3 + $0xa8] sm:$0xff] %vm202_vm0, %v10239_v2  ;;  %3868 = vst.msk [vmem:[#allocation3 + $0xb0] sm:$0xff] %vm202_vm0, %v10239_v2 }
  0x28   : > { %3870 = vst.msk [vmem:[#allocation3 + $0xc0] sm:$0xff] %vm202_vm0, %v10239_v2  ;;  %3871 = vst.msk [vmem:[#allocation3 + $0xc8] sm:$0xff] %vm202_vm0, %v10239_v2 }
  0x29   : > { %3873 = vst.msk [vmem:[#allocation3 + $0xd8] sm:$0xff] %vm202_vm0, %v10239_v2  ;;  %3874 = vst.msk [vmem:[#allocation3 + $0xe0] sm:$0xff] %vm202_vm0, %v10239_v2 }
  0x2a   : > { %3876 = vst.msk [vmem:[#allocation3 + $0xf0] sm:$0xff] %vm202_vm0, %v10239_v2  ;;  %3877 = vst.msk [vmem:[#allocation3 + $0xf8] sm:$0xff] %vm202_vm0, %v10239_v2 }
  0x2b   : > { %3879 = vst.msk [vmem:[#allocation3 + $0x108] sm:$0xff] %vm202_vm0, %v10239_v2  ;;  %3880 = vst.msk [vmem:[#allocation3 + $0x110] sm:$0xff] %vm202_vm0, %v10239_v2 }
  0x2c   : > { %3882 = vst.msk [vmem:[#allocation3 + $0x120] sm:$0xff] %vm202_vm0, %v10239_v2  ;;  %3883 = vst.msk [vmem:[#allocation3 + $0x128] sm:$0xff] %vm202_vm0, %v10239_v2 }
  0x2d   : > { %3885 = vst.msk [vmem:[#allocation3 + $0x138] sm:$0xff] %vm202_vm0, %v10239_v2  ;;  %3886 = vst.msk [vmem:[#allocation3 + $0x140] sm:$0xff] %vm202_vm0, %v10239_v2 }
  0x2e   : > { %3888 = vst.msk [vmem:[#allocation3 + $0x150] sm:$0xff] %vm202_vm0, %v10239_v2  ;;  %3889 = vst.msk [vmem:[#allocation3 + $0x158] sm:$0xff] %vm202_vm0, %v10239_v2 }
  0x2f   : > { %3891 = vst.msk [vmem:[#allocation3 + $0x168] sm:$0xff] %vm202_vm0, %v10239_v2  ;;  %3892 = vst.msk [vmem:[#allocation3 + $0x170] sm:$0xff] %vm202_vm0, %v10239_v2 }
  0x30   : > { %3894 = vst.msk [vmem:[#allocation3 + $0x180] sm:$0xff] %vm202_vm0, %v10239_v2  ;;  %3895 = vst.msk [vmem:[#allocation3 + $0x188] sm:$0xff] %vm202_vm0, %v10239_v2 }
  0x31   : > { %3897 = vst.msk [vmem:[#allocation3 + $0x198] sm:$0xff] %vm202_vm0, %v10239_v2  ;;  %3898 = vst.msk [vmem:[#allocation3 + $0x1a0] sm:$0xff] %vm202_vm0, %v10239_v2 }
  0x32   : > { %206 = vst.msk [vmem:[#allocation2 + $0x10] sm:$0x3] %vm205_vm1, %v10239_v2  ;;  %209 = vst.msk [vmem:[#allocation2 + $0x28] sm:$0x3] %vm205_vm1, %v10239_v2 }
  0x33   : > { %212 = vst.msk [vmem:[#allocation2 + $0x40] sm:$0x3] %vm205_vm1, %v10239_v2  ;;  %215 = vst.msk [vmem:[#allocation2 + $0x58] sm:$0x3] %vm205_vm1, %v10239_v2 }
  0x34   : > { %218 = vst.msk [vmem:[#allocation2 + $0x70] sm:$0x3] %vm205_vm1, %v10239_v2  ;;  %221 = vst.msk [vmem:[#allocation2 + $0x88] sm:$0x3] %vm205_vm1, %v10239_v2 }
  0x35   : > { %224 = vst.msk [vmem:[#allocation2 + $0xa0] sm:$0x3] %vm205_vm1, %v10239_v2  ;;  %227 = vst.msk [vmem:[#allocation2 + $0xb8] sm:$0x3] %vm205_vm1, %v10239_v2 }
  0x36   : > { %230 = vst.msk [vmem:[#allocation2 + $0xd0] sm:$0x3] %vm205_vm1, %v10239_v2  ;;  %233 = vst.msk [vmem:[#allocation2 + $0xe8] sm:$0x3] %vm205_vm1, %v10239_v2 }
  0x37   : > { %236 = vst.msk [vmem:[#allocation2 + $0x100] sm:$0x3] %vm205_vm1, %v10239_v2  ;;  %239 = vst.msk [vmem:[#allocation2 + $0x118] sm:$0x3] %vm205_vm1, %v10239_v2 }
  0x38   : > { %242 = vst.msk [vmem:[#allocation2 + $0x130] sm:$0x3] %vm205_vm1, %v10239_v2  ;;  %245 = vst.msk [vmem:[#allocation2 + $0x148] sm:$0x3] %vm205_vm1, %v10239_v2 }
  0x39   : > { %248 = vst.msk [vmem:[#allocation2 + $0x160] sm:$0x3] %vm205_vm1, %v10239_v2  ;;  %251 = vst.msk [vmem:[#allocation2 + $0x178] sm:$0x3] %vm205_vm1, %v10239_v2  ;;  %v357_v11 = vld [vmem:[#allocation2 + $0x9] sm:$0xff] }
  0x3a   : > { %254 = vst.msk [vmem:[#allocation2 + $0x190] sm:$0x3] %vm205_vm1, %v10239_v2  ;;  %257 = vst.msk [vmem:[#allocation2 + $0x1a8] sm:$0x3] %vm205_vm1, %v10239_v2  ;;  %8813 = vmatmul.mubr.msk.f32.vlgmr.msra.gmra.mrb[0].mxu0 %vm202_vm0, %v357_v11 }
  0x3b   : > { %3848 = vst.msk [vmem:[#allocation3 + $0x10] sm:$0x3] %vm205_vm1, %v10239_v2  ;;  %3851 = vst.msk [vmem:[#allocation3 + $0x28] sm:$0x3] %vm205_vm1, %v10239_v2  ;;  %8861 = vmatpush3.msra.mxu0 %v10281_v1 }
  0x3c   : > { %3854 = vst.msk [vmem:[#allocation3 + $0x40] sm:$0x3] %vm205_vm1, %v10239_v2  ;;  %3857 = vst.msk [vmem:[#allocation3 + $0x58] sm:$0x3] %vm205_vm1, %v10239_v2  ;;  %8910 = vmatprep.subr.mxu0 %v10534_v9 }
  0x3d   : > { %3860 = vst.msk [vmem:[#allocation3 + $0x70] sm:$0x3] %vm205_vm1, %v10239_v2  ;;  %3863 = vst.msk [vmem:[#allocation3 + $0x88] sm:$0x3] %vm205_vm1, %v10239_v2 }
  0x3e   : > { %3866 = vst.msk [vmem:[#allocation3 + $0xa0] sm:$0x3] %vm205_vm1, %v10239_v2  ;;  %3869 = vst.msk [vmem:[#allocation3 + $0xb8] sm:$0x3] %vm205_vm1, %v10239_v2 }
  0x3f   : > { %3872 = vst.msk [vmem:[#allocation3 + $0xd0] sm:$0x3] %vm205_vm1, %v10239_v2  ;;  %3875 = vst.msk [vmem:[#allocation3 + $0xe8] sm:$0x3] %vm205_vm1, %v10239_v2 }
  0x40   : > { %3878 = vst.msk [vmem:[#allocation3 + $0x100] sm:$0x3] %vm205_vm1, %v10239_v2  ;;  %3881 = vst.msk [vmem:[#allocation3 + $0x118] sm:$0x3] %vm205_vm1, %v10239_v2 }
  0x41   : > { %3884 = vst.msk [vmem:[#allocation3 + $0x130] sm:$0x3] %vm205_vm1, %v10239_v2  ;;  %3887 = vst.msk [vmem:[#allocation3 + $0x148] sm:$0x3] %vm205_vm1, %v10239_v2 }
  0x42   : > { %3890 = vst.msk [vmem:[#allocation3 + $0x160] sm:$0x3] %vm205_vm1, %v10239_v2  ;;  %3893 = vst.msk [vmem:[#allocation3 + $0x178] sm:$0x3] %vm205_vm1, %v10239_v2 }
  0x43   : > { %3896 = vst.msk [vmem:[#allocation3 + $0x190] sm:$0x3] %vm205_vm1, %v10239_v2  ;;  %3899 = vst.msk [vmem:[#allocation3 + $0x1a8] sm:$0x3] %vm205_vm1, %v10239_v2  ;;  %v323_v2 = vld [vmem:[#allocation2] sm:$0xff] }
  0x44   : > { %291 = vst.msk [vmem:[#allocation2 + $0x19] sm:$0xff] %vm202_vm0, %v258_v3  ;;  %292 = vst.msk [vmem:[#allocation2 + $0x21] sm:$0xff] %vm202_vm0, %v259_v4  ;;  %v324_v3 = vld [vmem:[#allocation2 + $0x8] sm:$0xff] }
  0x45   : > { %293 = vst.msk [vmem:[#allocation2 + $0x31] sm:$0xff] %vm202_vm0, %v260_v5  ;;  %294 = vst.msk [vmem:[#allocation2 + $0x39] sm:$0xff] %vm202_vm0, %v261_v6  ;;  %v10717_v5 = vld [vmem:[%s12443_s1 + $0x18] sm:$0xff] }
  0x46   : > { %295 = vst.msk [vmem:[#allocation2 + $0x49] sm:$0xff] %vm202_vm0, %v262_v7  ;;  %296 = vst.msk [vmem:[#allocation2 + $0x51] sm:$0xff] %vm202_vm0, %v263_v8 }
  0x47   : > { %297 = vst.msk [vmem:[#allocation2 + $0x61] sm:$0xff] %vm202_vm0, %v264_v12  ;;  %298 = vst.msk [vmem:[#allocation2 + $0x69] sm:$0xff] %vm202_vm0, %v265_v13 }
  0x48   : > { %299 = vst.msk [vmem:[#allocation2 + $0x79] sm:$0xff] %vm202_vm0, %v266_v14  ;;  %300 = vst.msk [vmem:[#allocation2 + $0x81] sm:$0xff] %vm202_vm0, %v267_v15 }
  0x49   : > { %301 = vst.msk [vmem:[#allocation2 + $0x91] sm:$0xff] %vm202_vm0, %v268_v16  ;;  %302 = vst.msk [vmem:[#allocation2 + $0x99] sm:$0xff] %vm202_vm0, %v269_v17 }
  0x4a   : > { %303 = vst.msk [vmem:[#allocation2 + $0xa9] sm:$0xff] %vm202_vm0, %v270_v18  ;;  %304 = vst.msk [vmem:[#allocation2 + $0xb1] sm:$0xff] %vm202_vm0, %v271_v19 }
  0x4b   : > { %305 = vst.msk [vmem:[#allocation2 + $0xc1] sm:$0xff] %vm202_vm0, %v272_v20  ;;  %306 = vst.msk [vmem:[#allocation2 + $0xc9] sm:$0xff] %vm202_vm0, %v273_v21  ;;  %v10572_v28 = vld [vmem:[#allocation2 + $0x19] sm:$0xff]  ;;  %v10574_v29 = vld [vmem:[#allocation2 + $0x21] sm:$0xff] }
  0x4c   : > { %307 = vst.msk [vmem:[#allocation2 + $0xd9] sm:$0xff] %vm202_vm0, %v274_v22  ;;  %308 = vst.msk [vmem:[#allocation2 + $0xe1] sm:$0xff] %vm202_vm0, %v275_v23  ;;  %v10576_v30 = vld [vmem:[#allocation2 + $0x31] sm:$0xff]  ;;  %8815 = vmatprep.mubr.msk.f32.mxu0 %vm202_vm0, %v10572_v28  ;;  %v10589_v33 = vld [vmem:[#allocation2 + $0x39] sm:$0xff] }
  0x4d   : > { %309 = vst.msk [vmem:[#allocation2 + $0xf1] sm:$0xff] %vm202_vm0, %v276_v24  ;;  %310 = vst.msk [vmem:[#allocation2 + $0xf9] sm:$0xff] %vm202_vm0, %v277_v25  ;;  %8816 = vmatmul.mubr.msk.f32.gmra.mrb[2].mxu0 %vm202_vm0, %v10574_v29  ;;  %v10593_v34 = vld [vmem:[#allocation2 + $0x49] sm:$0xff]  ;;  %v10599_v35 = vld [vmem:[#allocation2 + $0x51] sm:$0xff] }
  0x4e   : > { %311 = vst.msk [vmem:[#allocation2 + $0x109] sm:$0xff] %vm202_vm0, %v278_v26  ;;  %312 = vst.msk [vmem:[#allocation2 + $0x111] sm:$0xff] %vm202_vm0, %v279_v27  ;;  %8818 = vmatprep.mubr.msk.f32.mxu0 %vm202_vm0, %v10576_v30  ;;  %v10601_v36 = vld [vmem:[#allocation2 + $0x61] sm:$0xff]  ;;  %v10619_v43 = vld [vmem:[#allocation2 + $0x69] sm:$0xff] }
  0x4f   : > { %313 = vst.msk [vmem:[#allocation2 + $0x121] sm:$0xff] %vm202_vm0, %v280_v31  ;;  %314 = vst.msk [vmem:[#allocation2 + $0x129] sm:$0xff] %vm202_vm0, %v281_v32  ;;  %v10621_v44 = vld [vmem:[#allocation2 + $0x79] sm:$0xff]  ;;  %v10627_v45 = vld [vmem:[#allocation2 + $0x81] sm:$0xff] }
  0x50   : > { %315 = vst.msk [vmem:[#allocation2 + $0x139] sm:$0xff] %vm202_vm0, %v282_v37  ;;  %316 = vst.msk [vmem:[#allocation2 + $0x141] sm:$0xff] %vm202_vm0, %v283_v38  ;;  %v10629_v46 = vld [vmem:[#allocation2 + $0x91] sm:$0xff]  ;;  %v10635_v47 = vld [vmem:[#allocation2 + $0x99] sm:$0xff] }
  0x51   : > { %8819 = vmatmul.mubr.msk.f32.gmra.mrb[4].mxu0 %vm202_vm0, %v10589_v33  ;;  %317 = vst.msk [vmem:[#allocation2 + $0x151] sm:$0xff] %vm202_vm0, %v284_v39  ;;  %318 = vst.msk [vmem:[#allocation2 + $0x159] sm:$0xff] %vm202_vm0, %v285_v40  ;;  %v10637_v48 = vld [vmem:[#allocation2 + $0xa9] sm:$0xff]  ;;  %v10643_v49 = vld [vmem:[#allocation2 + $0xb1] sm:$0xff] }
  0x52   : > { %8821 = vmatprep.mubr.msk.f32.mxu0 %vm202_vm0, %v10593_v34  ;;  %319 = vst.msk [vmem:[#allocation2 + $0x169] sm:$0xff] %vm202_vm0, %v286_v41  ;;  %320 = vst.msk [vmem:[#allocation2 + $0x171] sm:$0xff] %vm202_vm0, %v287_v42  ;;  %v10645_v50 = vld [vmem:[#allocation2 + $0xc1] sm:$0xff]  ;;  %v10651_v51 = vld [vmem:[#allocation2 + $0xc9] sm:$0xff] }
  0x53   : > { %v10653_v52 = vld [vmem:[#allocation2 + $0xd9] sm:$0xff]  ;;  %v10659_v53 = vld [vmem:[#allocation2 + $0xe1] sm:$0xff]  ;;  %v10725_v7 = vld [vmem:[#allocation2 + $0x30] sm:$0xff] }
  0x54   : > { %v10661_v54 = vld [vmem:[#allocation2 + $0xf1] sm:$0xff]  ;;  %v10667_v55 = vld [vmem:[#allocation2 + $0xf9] sm:$0xff]  ;;  %v10734_v10 = vld [vmem:[#allocation2 + $0x48] sm:$0xff] }
  0x55   : > { %8822 = vmatmul.mubr.msk.f32.gmra.mrb[6].mxu0 %vm202_vm0, %v10599_v35  ;;  %v10669_v56 = vld [vmem:[#allocation2 + $0x109] sm:$0xff]  ;;  %v10675_v57 = vld [vmem:[#allocation2 + $0x111] sm:$0xff]  ;;  %v10723_v6 = vld [vmem:[#allocation2 + $0x20] sm:$0xff] }
  0x56   : > { %8824 = vmatprep.mubr.msk.f32.mxu0 %vm202_vm0, %v10601_v36  ;;  %v10677_v58 = vld [vmem:[#allocation2 + $0x121] sm:$0xff]  ;;  %v10683_v59 = vld [vmem:[#allocation2 + $0x129] sm:$0xff]  ;;  %v10712_v4 = vld [vmem:[#allocation2 + $0x18] sm:$0xff] }
  0x57   : > { %v10685_v60 = vld [vmem:[#allocation2 + $0x139] sm:$0xff]  ;;  %v10691_v61 = vld [vmem:[#allocation2 + $0x141] sm:$0xff]  ;;  %v10758_v15 = vld [vmem:[#allocation2 + $0x90] sm:$0xff] }
  0x58   : > { %v10693_v62 = vld [vmem:[#allocation2 + $0x151] sm:$0xff]  ;;  %v10699_v63 = vld [vmem:[#allocation2 + $0x159] sm:$0xff]  ;;  %v10748_v12 = vld [vmem:[#allocation2 + $0x68] sm:$0xff] }
  0x59   : > { %8825 = vmatmul.mubr.msk.f32.gmra.mrb[8].mxu0 %vm202_vm0, %v10619_v43  ;;  %12561 = vst [vmem:[#allocation4_spill] sm:$0xff] %v10693_v62  ;;  %12562 = vst [vmem:[#allocation5_spill] sm:$0xff] %v10699_v63  ;;  %v10701_v0 = vld [vmem:[#allocation2 + $0x169] sm:$0xff]  ;;  %v10707_v1 = vld [vmem:[#allocation2 + $0x171] sm:$0xff] }
  0x5a   : > { %8827 = vmatprep.mubr.msk.f32.mxu0 %vm202_vm0, %v10621_v44  ;;  %12563 = vst [vmem:[#allocation6_spill] sm:$0xff] %v10701_v0  ;;  %12564 = vst [vmem:[#allocation7_spill] sm:$0xff] %v10707_v1  ;;  %v10732_v8 = vld [vmem:[#allocation2 + $0x38] sm:$0xff]  ;;  %v10742_v11 = vld [vmem:[#allocation2 + $0x60] sm:$0xff] }
  0x5b   : > { %v10750_v13 = vld [vmem:[#allocation2 + $0x78] sm:$0xff]  ;;  %v10756_v14 = vld [vmem:[#allocation2 + $0x80] sm:$0xff]  ;;  %v10766_v17 = vld [vmem:[#allocation2 + $0xa8] sm:$0xff] }
  0x5c   : > { %v10764_v16 = vld [vmem:[#allocation2 + $0x98] sm:$0xff]  ;;  %v10772_v18 = vld [vmem:[#allocation2 + $0xb0] sm:$0xff]  ;;  %v10774_v19 = vld [vmem:[#allocation2 + $0xc0] sm:$0xff] }
  0x5d   : > { %8828 = vmatmul.mubr.msk.f32.gmra.mrb[10].mxu0 %vm202_vm0, %v10627_v45  ;;  %v10780_v20 = vld [vmem:[#allocation2 + $0xc8] sm:$0xff]  ;;  %v10782_v21 = vld [vmem:[#allocation2 + $0xd8] sm:$0xff]  ;;  %v10788_v22 = vld [vmem:[#allocation2 + $0xe0] sm:$0xff] }
  0x5e   : > { %8830 = vmatprep.mubr.msk.f32.mxu0 %vm202_vm0, %v10629_v46  ;;  %v10790_v23 = vld [vmem:[#allocation2 + $0xf0] sm:$0xff]  ;;  %v10796_v24 = vld [vmem:[#allocation2 + $0xf8] sm:$0xff]  ;;  %v10798_v25 = vld [vmem:[#allocation2 + $0x108] sm:$0xff] }
  0x5f   : > { %v10804_v26 = vld [vmem:[#allocation2 + $0x110] sm:$0xff]  ;;  %v10806_v27 = vld [vmem:[#allocation2 + $0x120] sm:$0xff]  ;;  %v10812_v31 = vld [vmem:[#allocation2 + $0x128] sm:$0xff] }
  0x60   : > { %v10814_v32 = vld [vmem:[#allocation2 + $0x138] sm:$0xff]  ;;  %v10820_v37 = vld [vmem:[#allocation2 + $0x140] sm:$0xff]  ;;  %v10822_v38 = vld [vmem:[#allocation2 + $0x150] sm:$0xff] }
  0x61   : > { %8831 = vmatmul.mubr.msk.f32.gmra.mrb[12].mxu0 %vm202_vm0, %v10635_v47  ;;  %v288_v39 = vld [vmem:[%s10520_s25 + $0xf0] sm:$0xff]  ;;  %v289_v40 = vld [vmem:[%s10520_s25 + $0xf8] sm:$0xff]  ;;  %v10834_v42 = vld [vmem:[#allocation2 + $0x168] sm:$0xff] }
  0x62   : > { %8833 = vmatprep.mubr.msk.f32.mxu0 %vm202_vm0, %v10637_v48  ;;  %321 = vst.msk [vmem:[#allocation2 + $0x181] sm:$0xff] %vm202_vm0, %v288_v39  ;;  %322 = vst.msk [vmem:[#allocation2 + $0x189] sm:$0xff] %vm202_vm0, %v289_v40  ;;  %v10832_v41 = vld [vmem:[#allocation2 + $0x158] sm:$0xff]  ;;  %v1033_v39 = vld [vmem:[#allocation2 + $0xa] sm:$0xff] }
  0x63   : > { %v10845_v40 = vld [vmem:[#allocation2 + $0x1a] sm:$0xff] }
  0x64   : > { %12565 = vst [vmem:[#allocation8_spill] sm:$0xff] %v10845_v40 }
  0x65   : > { %8834 = vmatmul.mubr.msk.f32.gmra.mrb[14].mxu0 %vm202_vm0, %v10643_v49 }
  0x66   : > { %8836 = vmatprep.mubr.msk.f32.mxu0 %vm202_vm0, %v10645_v50 }
  0x69   : > { %8837 = vmatmul.mubr.msk.f32.gmra.mrb[16].mxu0 %vm202_vm0, %v10651_v51 }
  0x6a   : > { %8839 = vmatprep.mubr.msk.f32.mxu0 %vm202_vm0, %v10653_v52 }
  0x6d   : > { %8840 = vmatmul.mubr.msk.f32.gmra.mrb[18].mxu0 %vm202_vm0, %v10659_v53 }
  0x6e   : > { %8842 = vmatprep.mubr.msk.f32.mxu0 %vm202_vm0, %v10661_v54 }
  0x71   : > { %8843 = vmatmul.mubr.msk.f32.gmra.mrb[20].mxu0 %vm202_vm0, %v10667_v55 }
  0x72   : > { %8845 = vmatprep.mubr.msk.f32.mxu0 %vm202_vm0, %v10669_v56 }
  0x75   : > { %8846 = vmatmul.mubr.msk.f32.gmra.mrb[22].mxu0 %vm202_vm0, %v10675_v57 }
  0x76   : > { %8848 = vmatprep.mubr.msk.f32.mxu0 %vm202_vm0, %v10677_v58 }
  0x79   : > { %8849 = vmatmul.mubr.msk.f32.gmra.mrb[24].mxu0 %vm202_vm0, %v10683_v59 }
  0x7a   : > { %8851 = vmatprep.mubr.msk.f32.mxu0 %vm202_vm0, %v10685_v60 }
  0x7d   : > { %8852 = vmatmul.mubr.msk.f32.gmra.mrb[26].mxu0 %vm202_vm0, %v10691_v61 }
  0x7e   : > { %8854 = vmatprep.mubr.msk.f32.mxu0 %vm202_vm0, %v10693_v62 }
  0x81   : > { %8855 = vmatmul.mubr.msk.f32.gmra.mrb[28].mxu0 %vm202_vm0, %v10699_v63  ;;  %v10858_v63 = vld [vmem:[#allocation2 + $0x32] sm:$0xff] }
  0x82   : > { %8857 = vmatprep.mubr.msk.f32.mxu0 %vm202_vm0, %v10701_v0  ;;  %v10856_v0 = vld [vmem:[#allocation2 + $0x22] sm:$0xff]  ;;  %12567 = vst [vmem:[#allocation10_spill] sm:$0xff] %v10858_v63 }
  0x83   : > { %12566 = vst [vmem:[#allocation9_spill] sm:$0xff] %v10856_v0 }
  0x85   : > { %8858 = vmatmul.mubr.msk.f32.gmra.mrb[30].mxu0 %vm202_vm0, %v10707_v1  ;;  %v10850_v1 = vld [vmem:[%s12443_s1 + $0x20] sm:$0xff] }
  0x86   : > { %8862 = vmatprep.mubr.msk.f32.mxu0 %vm202_vm0, %v323_v2  ;;  %v10840_v2 = vld [vmem:[#allocation2 + $0x170] sm:$0xff] }
  0x89   : > { %8863 = vmatmul.mubr.msk.f32.vlgmr.msra.gmra.mrb[0].mxu0 %vm202_vm0, %v324_v3  ;;  %v1032_v3 = vld [vmem:[#allocation2 + $0x2] sm:$0xff] }
  0x8a   : > { %8911 = vmatpush3.msra.mxu0 %v10534_v9  ;;  %8865 = vmatprep.mubr.msk.f32.mxu0 %vm202_vm0, %v10712_v4  ;;  %v10740_v9 = vld [vmem:[#allocation2 + $0x50] sm:$0xff] }
  0x8b   : > { %8960 = vmatprep.subr.mxu0 %v10717_v5 }
  0x8d   : > { %8866 = vmatmul.mubr.msk.f32.gmra.mrb[2].mxu0 %vm202_vm0, %v10723_v6 }
  0x8e   : > { %8868 = vmatprep.mubr.msk.f32.mxu0 %vm202_vm0, %v10725_v7 }
  0x91   : > { %8869 = vmatmul.mubr.msk.f32.gmra.mrb[4].mxu0 %vm202_vm0, %v10732_v8 }
  0x92   : > { %8871 = vmatprep.mubr.msk.f32.mxu0 %vm202_vm0, %v10734_v10 }
  0x95   : > { %8872 = vmatmul.mubr.msk.f32.gmra.mrb[6].mxu0 %vm202_vm0, %v10740_v9 }
  0x96   : > { %8874 = vmatprep.mubr.msk.f32.mxu0 %vm202_vm0, %v10742_v11 }
  0x99   : > { %8875 = vmatmul.mubr.msk.f32.gmra.mrb[8].mxu0 %vm202_vm0, %v10748_v12 }
  0x9a   : > { %8877 = vmatprep.mubr.msk.f32.mxu0 %vm202_vm0, %v10750_v13 }
  0x9d   : > { %8878 = vmatmul.mubr.msk.f32.gmra.mrb[10].mxu0 %vm202_vm0, %v10756_v14 }
  0x9e   : > { %8880 = vmatprep.mubr.msk.f32.mxu0 %vm202_vm0, %v10758_v15 }
  0xa1   : > { %8881 = vmatmul.mubr.msk.f32.gmra.mrb[12].mxu0 %vm202_vm0, %v10764_v16 }
  0xa2   : > { %8883 = vmatprep.mubr.msk.f32.mxu0 %vm202_vm0, %v10766_v17 }
  0xa5   : > { %8884 = vmatmul.mubr.msk.f32.gmra.mrb[14].mxu0 %vm202_vm0, %v10772_v18 }
  0xa6   : > { %8886 = vmatprep.mubr.msk.f32.mxu0 %vm202_vm0, %v10774_v19 }
  0xa9   : > { %8887 = vmatmul.mubr.msk.f32.gmra.mrb[16].mxu0 %vm202_vm0, %v10780_v20 }
  0xaa   : > { %8889 = vmatprep.mubr.msk.f32.mxu0 %vm202_vm0, %v10782_v21 }
  0xad   : > { %8890 = vmatmul.mubr.msk.f32.gmra.mrb[18].mxu0 %vm202_vm0, %v10788_v22 }
  0xae   : > { %8892 = vmatprep.mubr.msk.f32.mxu0 %vm202_vm0, %v10790_v23 }
  0xb1   : > { %8893 = vmatmul.mubr.msk.f32.gmra.mrb[20].mxu0 %vm202_vm0, %v10796_v24 }
  0xb2   : > { %8895 = vmatprep.mubr.msk.f32.mxu0 %vm202_vm0, %v10798_v25 }
  0xb5   : > { %8896 = vmatmul.mubr.msk.f32.gmra.mrb[22].mxu0 %vm202_vm0, %v10804_v26 }
  0xb6   : > { %8898 = vmatprep.mubr.msk.f32.mxu0 %vm202_vm0, %v10806_v27 }
  0xb9   : > { %8899 = vmatmul.mubr.msk.f32.gmra.mrb[24].mxu0 %vm202_vm0, %v10812_v31 }
  0xba   : > { %8901 = vmatprep.mubr.msk.f32.mxu0 %vm202_vm0, %v10814_v32 }
  0xbd   : > { %8902 = vmatmul.mubr.msk.f32.gmra.mrb[26].mxu0 %vm202_vm0, %v10820_v37 }
  0xbe   : > { %8904 = vmatprep.mubr.msk.f32.mxu0 %vm202_vm0, %v10822_v38 }
  0xc1   : > { %8905 = vmatmul.mubr.msk.f32.gmra.mrb[28].mxu0 %vm202_vm0, %v10832_v41 }
  0xc2   : > { %8907 = vmatprep.mubr.msk.f32.mxu0 %vm202_vm0, %v10834_v42 }
  0xc5   : > { %8908 = vmatmul.mubr.msk.f32.gmra.mrb[30].mxu0 %vm202_vm0, %v10840_v2 }
  0xc6   : > { %8912 = vmatprep.mubr.msk.f32.mxu0 %vm202_vm0, %v1032_v3  ;;  %v10865_v3 = vld [vmem:[#allocation2 + $0x3a] sm:$0xff] }
  0xc7   : > { %12568 = vst [vmem:[#allocation11_spill] sm:$0xff] %v10865_v3 }
  0xc9   : > { %8913 = vmatmul.mubr.msk.f32.vlgmr.msra.gmra.mrb[0].mxu0 %vm202_vm0, %v1033_v39  ;;  %v10867_v39 = vld [vmem:[#allocation2 + $0x4a] sm:$0xff] }
  0xca   : > { %8961 = vmatpush3.msra.mxu0 %v10717_v5  ;;  %8915 = vmatprep.mubr.msk.f32.mxu0 %vm202_vm0, %v10845_v40  ;;  %12569 = vst [vmem:[#allocation12_spill] sm:$0xff] %v10867_v39  ;;  %v10873_v5 = vld [vmem:[#allocation2 + $0x52] sm:$0xff]  ;;  %v10875_v40 = vld [vmem:[#allocation2 + $0x62] sm:$0xff] }
  0xcb   : > { %9010 = vmatprep.subr.mxu0 %v10850_v1  ;;  %12570 = vst [vmem:[#allocation13_spill] sm:$0xff] %v10873_v5  ;;  %12571 = vst [vmem:[#allocation14_spill] sm:$0xff] %v10875_v40 }
  0xcd   : > { %8916 = vmatmul.mubr.msk.f32.gmra.mrb[2].mxu0 %vm202_vm0, %v10856_v0  ;;  %v10883_v0 = vld [vmem:[#allocation2 + $0x7a] sm:$0xff] }
  0xce   : > { %8918 = vmatprep.mubr.msk.f32.mxu0 %vm202_vm0, %v10858_v63  ;;  %v10881_v63 = vld [vmem:[#allocation2 + $0x6a] sm:$0xff]  ;;  %12573 = vst [vmem:[#allocation16_spill] sm:$0xff] %v10883_v0 }
  0xcf   : > { %12572 = vst [vmem:[#allocation15_spill] sm:$0xff] %v10881_v63 }
  0xd1   : > { %8919 = vmatmul.mubr.msk.f32.gmra.mrb[4].mxu0 %vm202_vm0, %v10865_v3  ;;  %v10891_v3 = vld [vmem:[#allocation2 + $0x92] sm:$0xff] }
  0xd2   : > { %8921 = vmatprep.mubr.msk.f32.mxu0 %vm202_vm0, %v10867_v39  ;;  %v10889_v39 = vld [vmem:[#allocation2 + $0x82] sm:$0xff]  ;;  %12575 = vst [vmem:[#allocation18_spill] sm:$0xff] %v10891_v3 }
  0xd3   : > { %12574 = vst [vmem:[#allocation17_spill] sm:$0xff] %v10889_v39 }
  0xd5   : > { %8922 = vmatmul.mubr.msk.f32.gmra.mrb[6].mxu0 %vm202_vm0, %v10873_v5  ;;  %v10899_v5 = vld [vmem:[#allocation2 + $0xaa] sm:$0xff] }
  0xd6   : > { %8924 = vmatprep.mubr.msk.f32.mxu0 %vm202_vm0, %v10875_v40  ;;  %v10897_v40 = vld [vmem:[#allocation2 + $0x9a] sm:$0xff]  ;;  %12577 = vst [vmem:[#allocation20_spill] sm:$0xff] %v10899_v5 }
  0xd7   : > { %12576 = vst [vmem:[#allocation19_spill] sm:$0xff] %v10897_v40 }
  0xd9   : > { %8925 = vmatmul.mubr.msk.f32.gmra.mrb[8].mxu0 %vm202_vm0, %v10881_v63  ;;  %v10907_v63 = vld [vmem:[#allocation2 + $0xc2] sm:$0xff] }
  0xda   : > { %8927 = vmatprep.mubr.msk.f32.mxu0 %vm202_vm0, %v10883_v0  ;;  %v10905_v0 = vld [vmem:[#allocation2 + $0xb2] sm:$0xff]  ;;  %12579 = vst [vmem:[#allocation22_spill] sm:$0xff] %v10907_v63 }
  0xdb   : > { %12578 = vst [vmem:[#allocation21_spill] sm:$0xff] %v10905_v0 }
  0xdd   : > { %8928 = vmatmul.mubr.msk.f32.gmra.mrb[10].mxu0 %vm202_vm0, %v10889_v39  ;;  %v10915_v39 = vld [vmem:[#allocation2 + $0xda] sm:$0xff] }
  0xde   : > { %8930 = vmatprep.mubr.msk.f32.mxu0 %vm202_vm0, %v10891_v3  ;;  %v10913_v3 = vld [vmem:[#allocation2 + $0xca] sm:$0xff]  ;;  %12581 = vst [vmem:[#allocation24_spill] sm:$0xff] %v10915_v39 }
  0xdf   : > { %12580 = vst [vmem:[#allocation23_spill] sm:$0xff] %v10913_v3 }
  0xe1   : > { %8931 = vmatmul.mubr.msk.f32.gmra.mrb[12].mxu0 %vm202_vm0, %v10897_v40  ;;  %v10923_v40 = vld [vmem:[#allocation2 + $0xf2] sm:$0xff] }
  0xe2   : > { %8933 = vmatprep.mubr.msk.f32.mxu0 %vm202_vm0, %v10899_v5  ;;  %v10921_v5 = vld [vmem:[#allocation2 + $0xe2] sm:$0xff]  ;;  %12583 = vst [vmem:[#allocation26_spill] sm:$0xff] %v10923_v40 }
  0xe3   : > { %12582 = vst [vmem:[#allocation25_spill] sm:$0xff] %v10921_v5 }
  0xe5   : > { %8934 = vmatmul.mubr.msk.f32.gmra.mrb[14].mxu0 %vm202_vm0, %v10905_v0  ;;  %v10931_v0 = vld [vmem:[#allocation2 + $0x10a] sm:$0xff] }
  0xe6   : > { %8936 = vmatprep.mubr.msk.f32.mxu0 %vm202_vm0, %v10907_v63  ;;  %v10929_v63 = vld [vmem:[#allocation2 + $0xfa] sm:$0xff]  ;;  %12585 = vst [vmem:[#allocation28_spill] sm:$0xff] %v10931_v0 }
  0xe7   : > { %12584 = vst [vmem:[#allocation27_spill] sm:$0xff] %v10929_v63 }
  0xe9   : > { %8937 = vmatmul.mubr.msk.f32.gmra.mrb[16].mxu0 %vm202_vm0, %v10913_v3  ;;  %v10939_v3 = vld [vmem:[#allocation2 + $0x122] sm:$0xff] }
  0xea   : > { %8939 = vmatprep.mubr.msk.f32.mxu0 %vm202_vm0, %v10915_v39  ;;  %v10937_v39 = vld [vmem:[#allocation2 + $0x112] sm:$0xff]  ;;  %12587 = vst [vmem:[#allocation30_spill] sm:$0xff] %v10939_v3 }
  0xeb   : > { %12586 = vst [vmem:[#allocation29_spill] sm:$0xff] %v10937_v39 }
  0xed   : > { %8940 = vmatmul.mubr.msk.f32.gmra.mrb[18].mxu0 %vm202_vm0, %v10921_v5  ;;  %v10947_v5 = vld [vmem:[#allocation2 + $0x13a] sm:$0xff] }
  0xee   : > { %8942 = vmatprep.mubr.msk.f32.mxu0 %vm202_vm0, %v10923_v40  ;;  %v10945_v40 = vld [vmem:[#allocation2 + $0x12a] sm:$0xff]  ;;  %12588 = vst [vmem:[#allocation31_spill] sm:$0xff] %v10947_v5 }
  0xf1   : > { %8943 = vmatmul.mubr.msk.f32.gmra.mrb[20].mxu0 %vm202_vm0, %v10929_v63  ;;  %v10955_v63 = vld [vmem:[#allocation2 + $0x152] sm:$0xff] }
  0xf2   : > { %8945 = vmatprep.mubr.msk.f32.mxu0 %vm202_vm0, %v10931_v0  ;;  %v10953_v0 = vld [vmem:[#allocation2 + $0x142] sm:$0xff]  ;;  %12589 = vst [vmem:[#allocation32_spill] sm:$0xff] %v10955_v63 }
  0xf5   : > { %8946 = vmatmul.mubr.msk.f32.gmra.mrb[22].mxu0 %vm202_vm0, %v10937_v39  ;;  %v10963_v39 = vld [vmem:[#allocation2 + $0x16a] sm:$0xff] }
  0xf6   : > { %8948 = vmatprep.mubr.msk.f32.mxu0 %vm202_vm0, %v10939_v3  ;;  %v10961_v3 = vld [vmem:[#allocation2 + $0x15a] sm:$0xff]  ;;  %12590 = vst [vmem:[#allocation33_spill] sm:$0xff] %v10963_v39 }
  0xf9   : > { %8949 = vmatmul.mubr.msk.f32.gmra.mrb[24].mxu0 %vm202_vm0, %v10945_v40 }
  0xfa   : > { %8951 = vmatprep.mubr.msk.f32.mxu0 %vm202_vm0, %v10947_v5  ;;  %v10969_v5 = vld [vmem:[#allocation2 + $0x172] sm:$0xff] }
  0xfd   : > { %8952 = vmatmul.mubr.msk.f32.gmra.mrb[26].mxu0 %vm202_vm0, %v10953_v0 }
  0xfe   : > { %8954 = vmatprep.mubr.msk.f32.mxu0 %vm202_vm0, %v10955_v63  ;;  %v7780_v63 = vld [vmem:[%s12443_s1 + $0x28] sm:$0xff] }
 0x101   : > { %8955 = vmatmul.mubr.msk.f32.gmra.mrb[28].mxu0 %vm202_vm0, %v10961_v3 }
 0x102   : > { %8957 = vmatprep.mubr.msk.f32.mxu0 %vm202_vm0, %v10963_v39 }
 0x105   : > { %8958 = vmatmul.mubr.msk.f32.gmra.mrb[30].mxu0 %vm202_vm0, %v10969_v5 }
 0x106   : > { %8962 = vmatprep.mubr.msk.f32.mxu0 %vm202_vm0, %v10712_v4  ;;  %v11041_v4 = vld [vmem:[#allocation2 + $0x188] sm:$0xff] }
 0x109   : > { %8963 = vmatmul.mubr.msk.f32.vlgmr.msra.gmra.mrb[0].mxu0 %vm202_vm0, %v10723_v6  ;;  %v7813_v6 = vld [vmem:[%s12443_s1 + $0x30] sm:$0xff] }
 0x10a   : > { %9011 = vmatpush3.msra.mxu0 %v10850_v1  ;;  %8965 = vmatprep.mubr.msk.f32.mxu0 %vm202_vm0, %v10725_v7  ;;  %v11035_v1 = vld [vmem:[#allocation2 + $0x180] sm:$0xff] }
 0x10b   : > { %9060 = vmatprep.subr.mxu0 %v7780_v63 }
 0x10d   : > { %8966 = vmatmul.mubr.msk.f32.gmra.mrb[2].mxu0 %vm202_vm0, %v10732_v8 }
 0x10e   : > { %8968 = vmatprep.mubr.msk.f32.mxu0 %vm202_vm0, %v10734_v10 }
 0x111   : > { %8969 = vmatmul.mubr.msk.f32.gmra.mrb[4].mxu0 %vm202_vm0, %v10740_v9 }
 0x112   : > { %8971 = vmatprep.mubr.msk.f32.mxu0 %vm202_vm0, %v10742_v11 }
 0x115   : > { %8972 = vmatmul.mubr.msk.f32.gmra.mrb[6].mxu0 %vm202_vm0, %v10748_v12 }
 0x116   : > { %8974 = vmatprep.mubr.msk.f32.mxu0 %vm202_vm0, %v10750_v13 }
 0x119   : > { %8975 = vmatmul.mubr.msk.f32.gmra.mrb[8].mxu0 %vm202_vm0, %v10756_v14 }
 0x11a   : > { %8977 = vmatprep.mubr.msk.f32.mxu0 %vm202_vm0, %v10758_v15 }
 0x11d   : > { %8978 = vmatmul.mubr.msk.f32.gmra.mrb[10].mxu0 %vm202_vm0, %v10764_v16 }
 0x11e   : > { %8980 = vmatprep.mubr.msk.f32.mxu0 %vm202_vm0, %v10766_v17 }
 0x121   : > { %8981 = vmatmul.mubr.msk.f32.gmra.mrb[12].mxu0 %vm202_vm0, %v10772_v18 }
 0x122   : > { %8983 = vmatprep.mubr.msk.f32.mxu0 %vm202_vm0, %v10774_v19 }
 0x125   : > { %8984 = vmatmul.mubr.msk.f32.gmra.mrb[14].mxu0 %vm202_vm0, %v10780_v20 }
 0x126   : > { %8986 = vmatprep.mubr.msk.f32.mxu0 %vm202_vm0, %v10782_v21 }
 0x129   : > { %8987 = vmatmul.mubr.msk.f32.gmra.mrb[16].mxu0 %vm202_vm0, %v10788_v22 }
 0x12a   : > { %8989 = vmatprep.mubr.msk.f32.mxu0 %vm202_vm0, %v10790_v23 }
 0x12d   : > { %8990 = vmatmul.mubr.msk.f32.gmra.mrb[18].mxu0 %vm202_vm0, %v10796_v24 }
 0x12e   : > { %8992 = vmatprep.mubr.msk.f32.mxu0 %vm202_vm0, %v10798_v25 }
 0x131   : > { %8993 = vmatmul.mubr.msk.f32.gmra.mrb[20].mxu0 %vm202_vm0, %v10804_v26 }
 0x132   : > { %8995 = vmatprep.mubr.msk.f32.mxu0 %vm202_vm0, %v10806_v27 }
 0x135   : > { %8996 = vmatmul.mubr.msk.f32.gmra.mrb[22].mxu0 %vm202_vm0, %v10812_v31 }
 0x136   : > { %8998 = vmatprep.mubr.msk.f32.mxu0 %vm202_vm0, %v10814_v32 }
 0x139   : > { %8999 = vmatmul.mubr.msk.f32.gmra.mrb[24].mxu0 %vm202_vm0, %v10820_v37 }
 0x13a   : > { %9001 = vmatprep.mubr.msk.f32.mxu0 %vm202_vm0, %v10822_v38 }
 0x13d   : > { %9002 = vmatmul.mubr.msk.f32.gmra.mrb[26].mxu0 %vm202_vm0, %v10832_v41 }
 0x13e   : > { %9004 = vmatprep.mubr.msk.f32.mxu0 %vm202_vm0, %v10834_v42 }
 0x141   : > { %9005 = vmatmul.mubr.msk.f32.gmra.mrb[28].mxu0 %vm202_vm0, %v10840_v2 }
 0x142   : > { %9007 = vmatprep.mubr.msk.f32.mxu0 %vm202_vm0, %v11035_v1 }
 0x145   : > { %9008 = vmatmul.mubr.msk.f32.gmra.mrb[30].mxu0 %vm202_vm0, %v11041_v4 }
 0x146   : > { %9012 = vmatprep.mubr.msk.f32.mxu0 %vm202_vm0, %v10572_v28  ;;  %v12591_v28 = vld [vmem:[#allocation5_spill] sm:$0xff] }
 0x149   : > { %9013 = vmatmul.mubr.msk.f32.vlgmr.msra.gmra.mrb[0].mxu0 %vm202_vm0, %v10574_v29  ;;  %v12592_v29 = vld [vmem:[#allocation6_spill] sm:$0xff] }
 0x14a   : > { %9061 = vmatpush3.msra.mxu0 %v7780_v63  ;;  %9015 = vmatprep.mubr.msk.f32.mxu0 %vm202_vm0, %v10576_v30  ;;  %v11106_v30 = vld [vmem:[#allocation2 + $0x181] sm:$0xff]  ;;  %v7846_v63 = vld [vmem:[%s12443_s1 + $0x38] sm:$0xff] }
 0x14b   : > { %9110 = vmatprep.subr.mxu0 %v7813_v6  ;;  %12593 = vst [vmem:[#allocation34_spill] sm:$0xff] %v11106_v30 }
 0x14d   : > { %9016 = vmatmul.mubr.msk.f32.gmra.mrb[2].mxu0 %vm202_vm0, %v10589_v33  ;;  %v12594_v33 = vld [vmem:[#allocation7_spill] sm:$0xff] }
 0x14e   : > { %9018 = vmatprep.mubr.msk.f32.mxu0 %vm202_vm0, %v10593_v34  ;;  %v11112_v34 = vld [vmem:[#allocation2 + $0x189] sm:$0xff] }
 0x14f   : > { %12595 = vst [vmem:[#allocation35_spill] sm:$0xff] %v11112_v34 }
 0x151   : > { %9019 = vmatmul.mubr.msk.f32.gmra.mrb[4].mxu0 %vm202_vm0, %v10599_v35  ;;  %v12596_v35 = vld [vmem:[#allocation8_spill] sm:$0xff] }
 0x152   : > { %9021 = vmatprep.mubr.msk.f32.mxu0 %vm202_vm0, %v10601_v36 }
 0x155   : > { %9022 = vmatmul.mubr.msk.f32.gmra.mrb[6].mxu0 %vm202_vm0, %v10619_v43 }
 0x156   : > { %9024 = vmatprep.mubr.msk.f32.mxu0 %vm202_vm0, %v10621_v44 }
 0x159   : > { %9025 = vmatmul.mubr.msk.f32.gmra.mrb[8].mxu0 %vm202_vm0, %v10627_v45 }
 0x15a   : > { %9027 = vmatprep.mubr.msk.f32.mxu0 %vm202_vm0, %v10629_v46 }
 0x15d   : > { %9028 = vmatmul.mubr.msk.f32.gmra.mrb[10].mxu0 %vm202_vm0, %v10635_v47 }
 0x15e   : > { %9030 = vmatprep.mubr.msk.f32.mxu0 %vm202_vm0, %v10637_v48 }
 0x161   : > { %9031 = vmatmul.mubr.msk.f32.gmra.mrb[12].mxu0 %vm202_vm0, %v10643_v49 }
 0x162   : > { %9033 = vmatprep.mubr.msk.f32.mxu0 %vm202_vm0, %v10645_v50 }
 0x165   : > { %9034 = vmatmul.mubr.msk.f32.gmra.mrb[14].mxu0 %vm202_vm0, %v10651_v51 }
 0x166   : > { %9036 = vmatprep.mubr.msk.f32.mxu0 %vm202_vm0, %v10653_v52 }
 0x169   : > { %9037 = vmatmul.mubr.msk.f32.gmra.mrb[16].mxu0 %vm202_vm0, %v10659_v53 }
 0x16a   : > { %9039 = vmatprep.mubr.msk.f32.mxu0 %vm202_vm0, %v10661_v54 }
 0x16d   : > { %9040 = vmatmul.mubr.msk.f32.gmra.mrb[18].mxu0 %vm202_vm0, %v10667_v55 }
 0x16e   : > { %9042 = vmatprep.mubr.msk.f32.mxu0 %vm202_vm0, %v10669_v56 }
 0x171   : > { %9043 = vmatmul.mubr.msk.f32.gmra.mrb[20].mxu0 %vm202_vm0, %v10675_v57 }
 0x172   : > { %9045 = vmatprep.mubr.msk.f32.mxu0 %vm202_vm0, %v10677_v58 }
 0x175   : > { %9046 = vmatmul.mubr.msk.f32.gmra.mrb[22].mxu0 %vm202_vm0, %v10683_v59 }
 0x176   : > { %9048 = vmatprep.mubr.msk.f32.mxu0 %vm202_vm0, %v10685_v60 }
 0x179   : > { %9049 = vmatmul.mubr.msk.f32.gmra.mrb[24].mxu0 %vm202_vm0, %v10691_v61 }
 0x17a   : > { %9051 = vmatprep.mubr.msk.f32.mxu0 %vm202_vm0, %v10693_v62  ;;  %v12603_v62 = vld [vmem:[#allocation15_spill] sm:$0xff] }
 0x17d   : > { %9052 = vmatmul.mubr.msk.f32.gmra.mrb[26].mxu0 %vm202_vm0, %v12591_v28  ;;  %v12600_v28 = vld [vmem:[#allocation12_spill] sm:$0xff] }
 0x17e   : > { %9054 = vmatprep.mubr.msk.f32.mxu0 %vm202_vm0, %v12592_v29  ;;  %v12597_v29 = vld [vmem:[#allocation9_spill] sm:$0xff] }
 0x181   : > { %9055 = vmatmul.mubr.msk.f32.gmra.mrb[28].mxu0 %vm202_vm0, %v12594_v33  ;;  %v12598_v33 = vld [vmem:[#allocation10_spill] sm:$0xff] }
 0x182   : > { %9057 = vmatprep.mubr.msk.f32.mxu0 %vm202_vm0, %v11106_v30  ;;  %v12599_v30 = vld [vmem:[#allocation11_spill] sm:$0xff] }
 0x185   : > { %9058 = vmatmul.mubr.msk.f32.gmra.mrb[30].mxu0 %vm202_vm0, %v11112_v34  ;;  %v12601_v34 = vld [vmem:[#allocation13_spill] sm:$0xff] }
 0x186   : > { %9062 = vmatprep.mubr.msk.f32.mxu0 %vm202_vm0, %v12596_v35  ;;  %v12602_v35 = vld [vmem:[#allocation14_spill] sm:$0xff] }
 0x189   : > { %9063 = vmatmul.mubr.msk.f32.vlgmr.msra.gmra.mrb[0].mxu0 %vm202_vm0, %v12597_v29  ;;  %v12605_v29 = vld [vmem:[#allocation17_spill] sm:$0xff] }
 0x18a   : > { %9111 = vmatpush3.msra.mxu0 %v7813_v6  ;;  %9065 = vmatprep.mubr.msk.f32.mxu0 %vm202_vm0, %v12598_v33  ;;  %v12604_v6 = vld [vmem:[#allocation16_spill] sm:$0xff]  ;;  %v12606_v33 = vld [vmem:[#allocation18_spill] sm:$0xff] }
 0x18b   : > { %9160 = vmatprep.subr.mxu0 %v7846_v63 }
 0x18d   : > { %9066 = vmatmul.mubr.msk.f32.gmra.mrb[2].mxu0 %vm202_vm0, %v12599_v30  ;;  %v12607_v30 = vld [vmem:[#allocation19_spill] sm:$0xff] }
 0x18e   : > { %9068 = vmatprep.mubr.msk.f32.mxu0 %vm202_vm0, %v12600_v28  ;;  %v12608_v28 = vld [vmem:[#allocation20_spill] sm:$0xff] }
 0x191   : > { %9069 = vmatmul.mubr.msk.f32.gmra.mrb[4].mxu0 %vm202_vm0, %v12601_v34  ;;  %v12609_v34 = vld [vmem:[#allocation21_spill] sm:$0xff] }
 0x192   : > { %9071 = vmatprep.mubr.msk.f32.mxu0 %vm202_vm0, %v12602_v35  ;;  %v12610_v35 = vld [vmem:[#allocation22_spill] sm:$0xff] }
 0x195   : > { %9072 = vmatmul.mubr.msk.f32.gmra.mrb[6].mxu0 %vm202_vm0, %v12603_v62  ;;  %v12611_v62 = vld [vmem:[#allocation23_spill] sm:$0xff] }
 0x196   : > { %9074 = vmatprep.mubr.msk.f32.mxu0 %vm202_vm0, %v12604_v6  ;;  %v12612_v6 = vld [vmem:[#allocation24_spill] sm:$0xff] }
 0x199   : > { %9075 = vmatmul.mubr.msk.f32.gmra.mrb[8].mxu0 %vm202_vm0, %v12605_v29  ;;  %v12613_v29 = vld [vmem:[#allocation25_spill] sm:$0xff] }
 0x19a   : > { %9077 = vmatprep.mubr.msk.f32.mxu0 %vm202_vm0, %v12606_v33  ;;  %v12614_v33 = vld [vmem:[#allocation26_spill] sm:$0xff] }
 0x19d   : > { %9078 = vmatmul.mubr.msk.f32.gmra.mrb[10].mxu0 %vm202_vm0, %v12607_v30  ;;  %v12615_v30 = vld [vmem:[#allocation27_spill] sm:$0xff] }
 0x19e   : > { %9080 = vmatprep.mubr.msk.f32.mxu0 %vm202_vm0, %v12608_v28  ;;  %v12616_v28 = vld [vmem:[#allocation28_spill] sm:$0xff] }
 0x1a1   : > { %9081 = vmatmul.mubr.msk.f32.gmra.mrb[12].mxu0 %vm202_vm0, %v12609_v34  ;;  %v12617_v34 = vld [vmem:[#allocation29_spill] sm:$0xff] }
 0x1a2   : > { %9083 = vmatprep.mubr.msk.f32.mxu0 %vm202_vm0, %v12610_v35  ;;  %v12618_v35 = vld [vmem:[#allocation30_spill] sm:$0xff] }
 0x1a5   : > { %9084 = vmatmul.mubr.msk.f32.gmra.mrb[14].mxu0 %vm202_vm0, %v12611_v62 }
 0x1a6   : > { %9086 = vmatprep.mubr.msk.f32.mxu0 %vm202_vm0, %v12612_v6  ;;  %v12619_v6 = vld [vmem:[#allocation31_spill] sm:$0xff] }
 0x1a9   : > { %9087 = vmatmul.mubr.msk.f32.gmra.mrb[16].mxu0 %vm202_vm0, %v12613_v29 }
 0x1aa   : > { %9089 = vmatprep.mubr.msk.f32.mxu0 %vm202_vm0, %v12614_v33  ;;  %v12620_v33 = vld [vmem:[#allocation32_spill] sm:$0xff] }
 0x1ad   : > { %9090 = vmatmul.mubr.msk.f32.gmra.mrb[18].mxu0 %vm202_vm0, %v12615_v30 }
 0x1ae   : > { %9092 = vmatprep.mubr.msk.f32.mxu0 %vm202_vm0, %v12616_v28 }
 0x1b1   : > { %9093 = vmatmul.mubr.msk.f32.gmra.mrb[20].mxu0 %vm202_vm0, %v12617_v34  ;;  %v11177_v34 = vld [vmem:[#allocation2 + $0x182] sm:$0xff] }
 0x1b2   : > { %9095 = vmatprep.mubr.msk.f32.mxu0 %vm202_vm0, %v12618_v35 }
 0x1b5   : > { %9096 = vmatmul.mubr.msk.f32.gmra.mrb[22].mxu0 %vm202_vm0, %v10945_v40 }
 0x1b6   : > { %9098 = vmatprep.mubr.msk.f32.mxu0 %vm202_vm0, %v12619_v6  ;;  %v11183_v6 = vld [vmem:[#allocation2 + $0x18a] sm:$0xff] }
 0x1b9   : > { %9099 = vmatmul.mubr.msk.f32.gmra.mrb[24].mxu0 %vm202_vm0, %v10953_v0 }
 0x1ba   : > { %9101 = vmatprep.mubr.msk.f32.mxu0 %vm202_vm0, %v12620_v33 }
 0x1bd   : > { %9102 = vmatmul.mubr.msk.f32.gmra.mrb[26].mxu0 %vm202_vm0, %v10961_v3 }
 0x1be   : > { %9104 = vmatprep.mubr.msk.f32.mxu0 %vm202_vm0, %v10963_v39  ;;  %v7879_v39 = vld [vmem:[%s12443_s1 + $0x40] sm:$0xff] }
 0x1c1   : > { %9105 = vmatmul.mubr.msk.f32.gmra.mrb[28].mxu0 %vm202_vm0, %v10969_v5 }
 0x1c2   : > { %9107 = vmatprep.mubr.msk.f32.mxu0 %vm202_vm0, %v11177_v34 }
 0x1c5   : > { %9108 = vmatmul.mubr.msk.f32.gmra.mrb[30].mxu0 %vm202_vm0, %v11183_v6 }
 0x1c6   : > { %9112 = vmatprep.mubr.msk.f32.mxu0 %vm202_vm0, %v10725_v7  ;;  %v2611_v7 = vld [vmem:[#allocation2 + $0x198] sm:$0xff] }
 0x1c9   : > { %9113 = vmatmul.mubr.msk.f32.vlgmr.msra.gmra.mrb[0].mxu0 %vm202_vm0, %v10732_v8  ;;  %v2612_v8 = vld [vmem:[#allocation2 + $0x1a0] sm:$0xff] }
 0x1ca   : > { %9161 = vmatpush3.msra.mxu0 %v7846_v63  ;;  %9115 = vmatprep.mubr.msk.f32.mxu0 %vm202_vm0, %v10734_v10  ;;  %v2968_v10 = vld [vmem:[#allocation2 + $0x31] sm:$0xff] }
 0x1cb   : > { %9210 = vmatprep.subr.mxu0 %v7879_v39 }
 0x1cd   : > { %9116 = vmatmul.mubr.msk.f32.gmra.mrb[2].mxu0 %vm202_vm0, %v10740_v9  ;;  %v2969_v9 = vld [vmem:[#allocation2 + $0x39] sm:$0xff] }
 0x1ce   : > { %9118 = vmatprep.mubr.msk.f32.mxu0 %vm202_vm0, %v10742_v11  ;;  %v2970_v11 = vld [vmem:[#allocation2 + $0x49] sm:$0xff] }
 0x1d1   : > { %9119 = vmatmul.mubr.msk.f32.gmra.mrb[4].mxu0 %vm202_vm0, %v10748_v12  ;;  %v2971_v12 = vld [vmem:[#allocation2 + $0x51] sm:$0xff] }
 0x1d2   : > { %9121 = vmatprep.mubr.msk.f32.mxu0 %vm202_vm0, %v10750_v13  ;;  %v12639_v13 = vld [vmem:[#allocation22_spill] sm:$0xff] }
 0x1d5   : > { %9122 = vmatmul.mubr.msk.f32.gmra.mrb[6].mxu0 %vm202_vm0, %v10756_v14  ;;  %v12640_v14 = vld [vmem:[#allocation24_spill] sm:$0xff] }
 0x1d6   : > { %9124 = vmatprep.mubr.msk.f32.mxu0 %vm202_vm0, %v10758_v15  ;;  %v12641_v15 = vld [vmem:[#allocation26_spill] sm:$0xff] }
 0x1d9   : > { %9125 = vmatmul.mubr.msk.f32.gmra.mrb[8].mxu0 %vm202_vm0, %v10764_v16  ;;  %v12642_v16 = vld [vmem:[#allocation29_spill] sm:$0xff] }
 0x1da   : > { %9127 = vmatprep.mubr.msk.f32.mxu0 %vm202_vm0, %v10766_v17  ;;  %v12644_v17 = vld [vmem:[#allocation33_spill] sm:$0xff] }
 0x1dd   : > { %9128 = vmatmul.mubr.msk.f32.gmra.mrb[10].mxu0 %vm202_vm0, %v10772_v18  ;;  %v3385_v18 = vld [vmem:[#allocation2 + $0x19a] sm:$0xff] }
 0x1de   : > { %9130 = vmatprep.mubr.msk.f32.mxu0 %vm202_vm0, %v10774_v19  ;;  %v7914_v19 = vld [vmem:[%s12444_s2 + $0x8] sm:$0xff] }
 0x1df   : > { %9260 = vmatprep.subr.mxu1 %v7914_v19 }
 0x1e0   : > { %9261 = vmatpush3.msra.mxu1 %v7914_v19 }
 0x1e1   : > { %9131 = vmatmul.mubr.msk.f32.gmra.mrb[12].mxu0 %vm202_vm0, %v10780_v20  ;;  %v3966_v20 = vld [vmem:[#allocation3 + $0x1] sm:$0xff] }
 0x1e2   : > { %9133 = vmatprep.mubr.msk.f32.mxu0 %vm202_vm0, %v10782_v21  ;;  %9262 = vmatprep.mubr.msk.f32.mxu1 %vm202_vm0, %v3966_v20  ;;  %v3967_v21 = vld [vmem:[#allocation3 + $0x9] sm:$0xff] }
 0x1e3   : > { %9263 = vmatmul.mubr.msk.f32.vlgmr.msra.gmra.mrb[0].mxu1 %vm202_vm0, %v3967_v21 }
 0x1e5   : > { %9134 = vmatmul.mubr.msk.f32.gmra.mrb[14].mxu0 %vm202_vm0, %v10788_v22  ;;  %v3965_v22 = vld [vmem:[%s12444_s2] sm:$0xff] }
 0x1e6   : > { %9136 = vmatprep.mubr.msk.f32.mxu0 %vm202_vm0, %v10790_v23  ;;  %9310 = vmatprep.subr.mxu1 %v3965_v22  ;;  %v11383_v23 = vld [vmem:[%s12444_s2 + $0x10] sm:$0xff] }
 0x1e7   : > { %9311 = vmatpush3.msra.mxu1 %v3965_v22 }
 0x1e8   : > { %9360 = vmatprep.subr.mxu1 %v11383_v23 }
 0x1e9   : > { %9137 = vmatmul.mubr.msk.f32.gmra.mrb[16].mxu0 %vm202_vm0, %v10796_v24  ;;  %v11389_v24 = vld [vmem:[%s12445_s3] ss:$0 sm:$0xff] }
 0x1ea   : > { %9139 = vmatprep.mubr.msk.f32.mxu0 %vm202_vm0, %v10798_v25  ;;  %v11394_v25 = vld [vmem:[%s12445_s3 + $0x1] ss:$0 sm:$0xff] }
 0x1ed   : > { %9140 = vmatmul.mubr.msk.f32.gmra.mrb[18].mxu0 %vm202_vm0, %v10804_v26 }
 0x1ee   : > { %9142 = vmatprep.mubr.msk.f32.mxu0 %vm202_vm0, %v10806_v27 }
 0x1f1   : > { %9143 = vmatmul.mubr.msk.f32.gmra.mrb[20].mxu0 %vm202_vm0, %v10812_v31 }
 0x1f2   : > { %9145 = vmatprep.mubr.msk.f32.mxu0 %vm202_vm0, %v10814_v32 }
 0x1f5   : > { %9146 = vmatmul.mubr.msk.f32.gmra.mrb[22].mxu0 %vm202_vm0, %v10820_v37 }
 0x1f6   : > { %9148 = vmatprep.mubr.msk.f32.mxu0 %vm202_vm0, %v10822_v38 }
 0x1f9   : > { %9149 = vmatmul.mubr.msk.f32.gmra.mrb[24].mxu0 %vm202_vm0, %v10832_v41 }
 0x1fa   : > { %9151 = vmatprep.mubr.msk.f32.mxu0 %vm202_vm0, %v10834_v42 }
 0x1fd   : > { %9152 = vmatmul.mubr.msk.f32.gmra.mrb[26].mxu0 %vm202_vm0, %v10840_v2 }
 0x1fe   : > { %9154 = vmatprep.mubr.msk.f32.mxu0 %vm202_vm0, %v11035_v1 }
 0x201   : > { %9155 = vmatmul.mubr.msk.f32.gmra.mrb[28].mxu0 %vm202_vm0, %v11041_v4 }
 0x202   : > { %9157 = vmatprep.mubr.msk.f32.mxu0 %vm202_vm0, %v2611_v7 }
 0x205   : > { %9158 = vmatmul.mubr.msk.f32.gmra.mrb[30].mxu0 %vm202_vm0, %v2612_v8 }
 0x206   : > { %9162 = vmatprep.mubr.msk.f32.mxu0 %vm202_vm0, %v2968_v10 }
 0x209   : > { %9163 = vmatmul.mubr.msk.f32.vlgmr.msra.gmra.mrb[0].mxu0 %vm202_vm0, %v2969_v9 }
 0x20a   : > { %9211 = vmatpush3.msra.mxu0 %v7879_v39  ;;  %9165 = vmatprep.mubr.msk.f32.mxu0 %vm202_vm0, %v2970_v11 }
 0x20d   : > { %9166 = vmatmul.mubr.msk.f32.gmra.mrb[2].mxu0 %vm202_vm0, %v2971_v12 }
 0x20e   : > { %9168 = vmatprep.mubr.msk.f32.mxu0 %vm202_vm0, %v10601_v36  ;;  %v12621_v36 = vld [vmem:[#allocation4_spill] sm:$0xff] }
 0x211   : > { %9169 = vmatmul.mubr.msk.f32.gmra.mrb[4].mxu0 %vm202_vm0, %v10619_v43  ;;  %v12622_v43 = vld [vmem:[#allocation5_spill] sm:$0xff] }
 0x212   : > { %9171 = vmatprep.mubr.msk.f32.mxu0 %vm202_vm0, %v10621_v44  ;;  %v12623_v44 = vld [vmem:[#allocation6_spill] sm:$0xff] }
 0x215   : > { %9172 = vmatmul.mubr.msk.f32.gmra.mrb[6].mxu0 %vm202_vm0, %v10627_v45  ;;  %v12624_v45 = vld [vmem:[#allocation7_spill] sm:$0xff] }
 0x216   : > { %9174 = vmatprep.mubr.msk.f32.mxu0 %vm202_vm0, %v10629_v46  ;;  %v12625_v46 = vld [vmem:[#allocation34_spill] sm:$0xff] }
 0x219   : > { %9175 = vmatmul.mubr.msk.f32.gmra.mrb[8].mxu0 %vm202_vm0, %v10635_v47  ;;  %v2998_v47 = vld [vmem:[#allocation2 + $0x199] sm:$0xff] }
 0x21a   : > { %9177 = vmatprep.mubr.msk.f32.mxu0 %vm202_vm0, %v10637_v48  ;;  %v12626_v48 = vld [vmem:[#allocation35_spill] sm:$0xff] }
 0x21d   : > { %9178 = vmatmul.mubr.msk.f32.gmra.mrb[10].mxu0 %vm202_vm0, %v10643_v49  ;;  %v2999_v49 = vld [vmem:[#allocation2 + $0x1a1] sm:$0xff] }
 0x21e   : > { %9180 = vmatprep.mubr.msk.f32.mxu0 %vm202_vm0, %v10645_v50  ;;  %v12627_v50 = vld [vmem:[#allocation10_spill] sm:$0xff] }
 0x221   : > { %9181 = vmatmul.mubr.msk.f32.gmra.mrb[12].mxu0 %vm202_vm0, %v10651_v51  ;;  %v12628_v51 = vld [vmem:[#allocation11_spill] sm:$0xff] }
 0x222   : > { %9183 = vmatprep.mubr.msk.f32.mxu0 %vm202_vm0, %v10653_v52  ;;  %v12629_v52 = vld [vmem:[#allocation12_spill] sm:$0xff] }
 0x225   : > { %9184 = vmatmul.mubr.msk.f32.gmra.mrb[14].mxu0 %vm202_vm0, %v10659_v53  ;;  %v12630_v53 = vld [vmem:[#allocation13_spill] sm:$0xff] }
 0x226   : > { %9186 = vmatprep.mubr.msk.f32.mxu0 %vm202_vm0, %v10661_v54  ;;  %v12631_v54 = vld [vmem:[#allocation14_spill] sm:$0xff] }
 0x229   : > { %9187 = vmatmul.mubr.msk.f32.gmra.mrb[16].mxu0 %vm202_vm0, %v10667_v55  ;;  %v12632_v55 = vld [vmem:[#allocation15_spill] sm:$0xff] }
 0x22a   : > { %9189 = vmatprep.mubr.msk.f32.mxu0 %vm202_vm0, %v10669_v56  ;;  %v12633_v56 = vld [vmem:[#allocation16_spill] sm:$0xff] }
 0x22d   : > { %9190 = vmatmul.mubr.msk.f32.gmra.mrb[18].mxu0 %vm202_vm0, %v10675_v57  ;;  %v12634_v57 = vld [vmem:[#allocation17_spill] sm:$0xff] }
 0x22e   : > { %9192 = vmatprep.mubr.msk.f32.mxu0 %vm202_vm0, %v10677_v58  ;;  %v12635_v58 = vld [vmem:[#allocation18_spill] sm:$0xff] }
 0x231   : > { %9193 = vmatmul.mubr.msk.f32.gmra.mrb[20].mxu0 %vm202_vm0, %v10683_v59  ;;  %v12636_v59 = vld [vmem:[#allocation19_spill] sm:$0xff] }
 0x232   : > { %9195 = vmatprep.mubr.msk.f32.mxu0 %vm202_vm0, %v10685_v60  ;;  %v12637_v60 = vld [vmem:[#allocation20_spill] sm:$0xff] }
 0x235   : > { %9196 = vmatmul.mubr.msk.f32.gmra.mrb[22].mxu0 %vm202_vm0, %v10691_v61  ;;  %v12638_v61 = vld [vmem:[#allocation21_spill] sm:$0xff] }
 0x236   : > { %9198 = vmatprep.mubr.msk.f32.mxu0 %vm202_vm0, %v12621_v36 }
 0x239   : > { %9199 = vmatmul.mubr.msk.f32.gmra.mrb[24].mxu0 %vm202_vm0, %v12622_v43 }
 0x23a   : > { %9201 = vmatprep.mubr.msk.f32.mxu0 %vm202_vm0, %v12623_v44 }
 0x23d   : > { %9202 = vmatmul.mubr.msk.f32.gmra.mrb[26].mxu0 %vm202_vm0, %v12624_v45 }
 0x23e   : > { %9204 = vmatprep.mubr.msk.f32.mxu0 %vm202_vm0, %v12625_v46 }
 0x241   : > { %9205 = vmatmul.mubr.msk.f32.gmra.mrb[28].mxu0 %vm202_vm0, %v12626_v48 }
 0x242   : > { %9207 = vmatprep.mubr.msk.f32.mxu0 %vm202_vm0, %v2998_v47 }
 0x245   : > { %9208 = vmatmul.mubr.msk.f32.gmra.mrb[30].mxu0 %vm202_vm0, %v2999_v49 }
 0x246   : > { %9212 = vmatprep.mubr.msk.f32.mxu0 %vm202_vm0, %v12627_v50 }
 0x249   : > { %9213 = vmatmul.mubr.msk.f32.vlgmr.msra.gmra.mrb[0].mxu0 %vm202_vm0, %v12628_v51 }
 0x24a   : > { %9215 = vmatprep.mubr.msk.f32.mxu0 %vm202_vm0, %v12629_v52 }
 0x24d   : > { %9216 = vmatmul.mubr.msk.f32.gmra.mrb[2].mxu0 %vm202_vm0, %v12630_v53 }
 0x24e   : > { %9218 = vmatprep.mubr.msk.f32.mxu0 %vm202_vm0, %v12631_v54 }
 0x251   : > { %9219 = vmatmul.mubr.msk.f32.gmra.mrb[4].mxu0 %vm202_vm0, %v12632_v55 }
 0x252   : > { %9221 = vmatprep.mubr.msk.f32.mxu0 %vm202_vm0, %v12633_v56 }
 0x255   : > { %9222 = vmatmul.mubr.msk.f32.gmra.mrb[6].mxu0 %vm202_vm0, %v12634_v57 }
 0x256   : > { %9224 = vmatprep.mubr.msk.f32.mxu0 %vm202_vm0, %v12635_v58 }
 0x259   : > { %9225 = vmatmul.mubr.msk.f32.gmra.mrb[8].mxu0 %vm202_vm0, %v12636_v59 }
 0x25a   : > { %9227 = vmatprep.mubr.msk.f32.mxu0 %vm202_vm0, %v12637_v60 }
 0x25d   : > { %9228 = vmatmul.mubr.msk.f32.gmra.mrb[10].mxu0 %vm202_vm0, %v12638_v61 }
 0x25e   : > { %9230 = vmatprep.mubr.msk.f32.mxu0 %vm202_vm0, %v12639_v13 }
 0x261   : > { %9231 = vmatmul.mubr.msk.f32.gmra.mrb[12].mxu0 %vm202_vm0, %v12611_v62  ;;  %v12643_v62 = vld [vmem:[#allocation31_spill] sm:$0xff] }
 0x262   : > { %9233 = vmatprep.mubr.msk.f32.mxu0 %vm202_vm0, %v12640_v14 }
 0x265   : > { %9234 = vmatmul.mubr.msk.f32.gmra.mrb[14].mxu0 %vm202_vm0, %v12613_v29 }
 0x266   : > { %9236 = vmatprep.mubr.msk.f32.mxu0 %vm202_vm0, %v12641_v15 }
 0x269   : > { %9237 = vmatmul.mubr.msk.f32.gmra.mrb[16].mxu0 %vm202_vm0, %v12615_v30 }
 0x26a   : > { %9239 = vmatprep.mubr.msk.f32.mxu0 %vm202_vm0, %v12616_v28 }
 0x26d   : > { %9240 = vmatmul.mubr.msk.f32.gmra.mrb[18].mxu0 %vm202_vm0, %v12642_v16 }
 0x26e   : > { %9242 = vmatprep.mubr.msk.f32.mxu0 %vm202_vm0, %v12618_v35 }
 0x271   : > { %9243 = vmatmul.mubr.msk.f32.gmra.mrb[20].mxu0 %vm202_vm0, %v10945_v40 }
 0x272   : > { %9245 = vmatprep.mubr.msk.f32.mxu0 %vm202_vm0, %v12643_v62 }
 0x275   : > { %9246 = vmatmul.mubr.msk.f32.gmra.mrb[22].mxu0 %vm202_vm0, %v10953_v0  ;;  %v3386_v0 = vld [vmem:[#allocation2 + $0x1a2] sm:$0xff] }
 0x276   : > { %9248 = vmatprep.mubr.msk.f32.mxu0 %vm202_vm0, %v12620_v33 }
 0x279   : > { %9249 = vmatmul.mubr.msk.f32.gmra.mrb[24].mxu0 %vm202_vm0, %v10961_v3 }
 0x27a   : > { %9251 = vmatprep.mubr.msk.f32.mxu0 %vm202_vm0, %v12644_v17 }
 0x27d   : > { %9252 = vmatmul.mubr.msk.f32.gmra.mrb[26].mxu0 %vm202_vm0, %v10969_v5 }
 0x27e   : > { %9254 = vmatprep.mubr.msk.f32.mxu0 %vm202_vm0, %v11177_v34 }
 0x281   : > { %9255 = vmatmul.mubr.msk.f32.gmra.mrb[28].mxu0 %vm202_vm0, %v11183_v6 }
 0x282   : > { %9257 = vmatprep.mubr.msk.f32.mxu0 %vm202_vm0, %v3385_v18 }
 0x285   : > { %9258 = vmatmul.mubr.msk.f32.gmra.mrb[30].mxu0 %vm202_vm0, %v3386_v0 }
 0x31c   : > { %v9214_v26 = vpop.f32.mrb[0].mxu0 }
 0x31d   : > { %v3747_v27 = vmul.f32 %v9214_v26, %v11389_v24  ;;  %v3551_v31 = vpop.f32.mrb[1].mxu0 }
 0x31e   : > { %v3746_v32 = vmul.f32 %v11389_v24, %v3551_v31 }
 0x31f   : > { %v3783_v37 = vadd.f32 %v11394_v25, %v3747_v27 }
 0x320   : > { %v3782_v38 = vadd.f32 %v11394_v25, %v3746_v32  ;;  %v9217_v41 = vpop.f32.mrb[2].mxu0 }
 0x321   : > { %v3815_v42 = vmax.f32 %v3783_v37, 0.0  ;;  %v3749_v2 = vmul.f32 %v9217_v41, %v11389_v24  ;;  %v3561_v40 = vpop.f32.mrb[3].mxu0 }
 0x322   : > { %v3814_v3 = vmax.f32 %v3782_v38, 0.0  ;;  %v3748_v39 = vmul.f32 %v11389_v24, %v3561_v40 }
 0x323   : > { %3902 = vst.msk [vmem:[#allocation3 + $0x21] sm:$0xff] %vm202_vm0, %v3815_v42  ;;  %v3785_v5 = vadd.f32 %v11394_v25, %v3749_v2 }
 0x324   : > { %3901 = vst.msk [vmem:[#allocation3 + $0x19] sm:$0xff] %vm202_vm0, %v3814_v3  ;;  %v3784_v1 = vadd.f32 %v11394_v25, %v3748_v39  ;;  %v9220_v4 = vpop.f32.mrb[4].mxu0 }
 0x325   : > { %v3817_v28 = vmax.f32 %v3785_v5, 0.0  ;;  %v3751_v30 = vmul.f32 %v9220_v4, %v11389_v24  ;;  %v3571_v33 = vpop.f32.mrb[5].mxu0 }
 0x326   : > { %v3816_v34 = vmax.f32 %v3784_v1, 0.0  ;;  %v3750_v63 = vmul.f32 %v11389_v24, %v3571_v33 }
 0x327   : > { %3904 = vst.msk [vmem:[#allocation3 + $0x39] sm:$0xff] %vm202_vm0, %v3817_v28  ;;  %v3787_v35 = vadd.f32 %v11394_v25, %v3751_v30 }
 0x328   : > { %3903 = vst.msk [vmem:[#allocation3 + $0x31] sm:$0xff] %vm202_vm0, %v3816_v34  ;;  %v3786_v6 = vadd.f32 %v11394_v25, %v3750_v63  ;;  %v9223_v29 = vpop.f32.mrb[6].mxu0 }
 0x329   : > { %v3819_v7 = vmax.f32 %v3787_v35, 0.0  ;;  %v3753_v8 = vmul.f32 %v9223_v29, %v11389_v24  ;;  %v3581_v10 = vpop.f32.mrb[7].mxu0 }
 0x32a   : > { %v3818_v9 = vmax.f32 %v3786_v6, 0.0  ;;  %v3752_v11 = vmul.f32 %v11389_v24, %v3581_v10  ;;  %v11422_v45 = vld [vmem:[#allocation3 + $0x21] sm:$0xff] }
 0x32b   : > { %3906 = vst.msk [vmem:[#allocation3 + $0x51] sm:$0xff] %vm202_vm0, %v3819_v7  ;;  %v3789_v12 = vadd.f32 %v11394_v25, %v3753_v8  ;;  %v11416_v36 = vld [vmem:[#allocation3 + $0x19] sm:$0xff] }
 0x32c   : > { %3905 = vst.msk [vmem:[#allocation3 + $0x49] sm:$0xff] %vm202_vm0, %v3818_v9  ;;  %v3788_v43 = vadd.f32 %v11394_v25, %v3752_v11  ;;  %v9226_v44 = vpop.f32.mrb[8].mxu0  ;;  %9265 = vmatprep.mubr.msk.f32.mxu1 %vm202_vm0, %v11416_v36 }
 0x32d   : > { %v3821_v46 = vmax.f32 %v3789_v12, 0.0  ;;  %v3755_v47 = vmul.f32 %v9226_v44, %v11389_v24  ;;  %v3591_v48 = vpop.f32.mrb[9].mxu0  ;;  %9266 = vmatmul.mubr.msk.f32.gmra.mrb[2].mxu1 %vm202_vm0, %v11422_v45 }
 0x32e   : > { %v3820_v49 = vmax.f32 %v3788_v43, 0.0  ;;  %v3754_v50 = vmul.f32 %v11389_v24, %v3591_v48  ;;  %v11436_v55 = vld [vmem:[#allocation3 + $0x39] sm:$0xff] }
 0x32f   : > { %3908 = vst.msk [vmem:[#allocation3 + $0x69] sm:$0xff] %vm202_vm0, %v3821_v46  ;;  %v3791_v51 = vadd.f32 %v11394_v25, %v3755_v47  ;;  %v11430_v52 = vld [vmem:[#allocation3 + $0x31] sm:$0xff] }
 0x330   : > { %3907 = vst.msk [vmem:[#allocation3 + $0x61] sm:$0xff] %vm202_vm0, %v3820_v49  ;;  %v3790_v53 = vadd.f32 %v11394_v25, %v3754_v50  ;;  %v9229_v54 = vpop.f32.mrb[10].mxu0  ;;  %9268 = vmatprep.mubr.msk.f32.mxu1 %vm202_vm0, %v11430_v52 }
 0x331   : > { %v3823_v56 = vmax.f32 %v3791_v51, 0.0  ;;  %v3757_v57 = vmul.f32 %v9229_v54, %v11389_v24  ;;  %v3601_v58 = vpop.f32.mrb[11].mxu0  ;;  %9269 = vmatmul.mubr.msk.f32.gmra.mrb[4].mxu1 %vm202_vm0, %v11436_v55 }
 0x332   : > { %v3822_v59 = vmax.f32 %v3790_v53, 0.0  ;;  %v3756_v60 = vmul.f32 %v11389_v24, %v3601_v58  ;;  %v11450_v16 = vld [vmem:[#allocation3 + $0x51] sm:$0xff] }
 0x333   : > { %3910 = vst.msk [vmem:[#allocation3 + $0x81] sm:$0xff] %vm202_vm0, %v3823_v56  ;;  %v3793_v61 = vadd.f32 %v11394_v25, %v3757_v57  ;;  %v11444_v13 = vld [vmem:[#allocation3 + $0x49] sm:$0xff] }
 0x334   : > { %3909 = vst.msk [vmem:[#allocation3 + $0x79] sm:$0xff] %vm202_vm0, %v3822_v59  ;;  %v3792_v14 = vadd.f32 %v11394_v25, %v3756_v60  ;;  %v9232_v15 = vpop.f32.mrb[12].mxu0  ;;  %9271 = vmatprep.mubr.msk.f32.mxu1 %vm202_vm0, %v11444_v13 }
 0x335   : > { %v3825_v62 = vmax.f32 %v3793_v61, 0.0  ;;  %v3759_v17 = vmul.f32 %v9232_v15, %v11389_v24  ;;  %v3611_v18 = vpop.f32.mrb[13].mxu0  ;;  %9272 = vmatmul.mubr.msk.f32.gmra.mrb[6].mxu1 %vm202_vm0, %v11450_v16 }
 0x336   : > { %v3824_v0 = vmax.f32 %v3792_v14, 0.0  ;;  %v3758_v19 = vmul.f32 %v11389_v24, %v3611_v18  ;;  %v11464_v27 = vld [vmem:[#allocation3 + $0x69] sm:$0xff] }
 0x337   : > { %3912 = vst.msk [vmem:[#allocation3 + $0x99] sm:$0xff] %vm202_vm0, %v3825_v62  ;;  %v3795_v20 = vadd.f32 %v11394_v25, %v3759_v17  ;;  %v11458_v21 = vld [vmem:[#allocation3 + $0x61] sm:$0xff] }
 0x338   : > { %3911 = vst.msk [vmem:[#allocation3 + $0x91] sm:$0xff] %vm202_vm0, %v3824_v0  ;;  %v3794_v22 = vadd.f32 %v11394_v25, %v3758_v19  ;;  %v9235_v26 = vpop.f32.mrb[14].mxu0  ;;  %9274 = vmatprep.mubr.msk.f32.mxu1 %vm202_vm0, %v11458_v21 }
 0x339   : > { %v3827_v31 = vmax.f32 %v3795_v20, 0.0  ;;  %v3761_v32 = vmul.f32 %v9235_v26, %v11389_v24  ;;  %v3621_v37 = vpop.f32.mrb[15].mxu0  ;;  %9275 = vmatmul.mubr.msk.f32.gmra.mrb[8].mxu1 %vm202_vm0, %v11464_v27 }
 0x33a   : > { %v3826_v38 = vmax.f32 %v3794_v22, 0.0  ;;  %v3760_v41 = vmul.f32 %v11389_v24, %v3621_v37  ;;  %v11478_v39 = vld [vmem:[#allocation3 + $0x81] sm:$0xff] }
 0x33b   : > { %3914 = vst.msk [vmem:[#allocation3 + $0xb1] sm:$0xff] %vm202_vm0, %v3827_v31  ;;  %v3797_v42 = vadd.f32 %v11394_v25, %v3761_v32  ;;  %v11472_v2 = vld [vmem:[#allocation3 + $0x79] sm:$0xff] }
 0x33c   : > { %3913 = vst.msk [vmem:[#allocation3 + $0xa9] sm:$0xff] %vm202_vm0, %v3826_v38  ;;  %v3796_v40 = vadd.f32 %v11394_v25, %v3760_v41  ;;  %v9238_v3 = vpop.f32.mrb[16].mxu0  ;;  %9277 = vmatprep.mubr.msk.f32.mxu1 %vm202_vm0, %v11472_v2 }
 0x33d   : > { %v3829_v5 = vmax.f32 %v3797_v42, 0.0  ;;  %v3763_v1 = vmul.f32 %v9238_v3, %v11389_v24  ;;  %v3631_v4 = vpop.f32.mrb[17].mxu0  ;;  %9278 = vmatmul.mubr.msk.f32.gmra.mrb[10].mxu1 %vm202_vm0, %v11478_v39 }
 0x33e   : > { %v3828_v28 = vmax.f32 %v3796_v40, 0.0  ;;  %v3762_v30 = vmul.f32 %v11389_v24, %v3631_v4  ;;  %v11492_v6 = vld [vmem:[#allocation3 + $0x99] sm:$0xff] }
 0x33f   : > { %3916 = vst.msk [vmem:[#allocation3 + $0xc9] sm:$0xff] %vm202_vm0, %v3829_v5  ;;  %v3799_v33 = vadd.f32 %v11394_v25, %v3763_v1  ;;  %v11486_v34 = vld [vmem:[#allocation3 + $0x91] sm:$0xff] }
 0x340   : > { %3915 = vst.msk [vmem:[#allocation3 + $0xc1] sm:$0xff] %vm202_vm0, %v3828_v28  ;;  %v3798_v63 = vadd.f32 %v11394_v25, %v3762_v30  ;;  %v9241_v35 = vpop.f32.mrb[18].mxu0  ;;  %9280 = vmatprep.mubr.msk.f32.mxu1 %vm202_vm0, %v11486_v34 }
 0x341   : > { %v3831_v29 = vmax.f32 %v3799_v33, 0.0  ;;  %v3765_v7 = vmul.f32 %v9241_v35, %v11389_v24  ;;  %v3641_v8 = vpop.f32.mrb[19].mxu0  ;;  %9281 = vmatmul.mubr.msk.f32.gmra.mrb[12].mxu1 %vm202_vm0, %v11492_v6 }
 0x342   : > { %v3830_v10 = vmax.f32 %v3798_v63, 0.0  ;;  %v3764_v9 = vmul.f32 %v11389_v24, %v3641_v8  ;;  %v11506_v46 = vld [vmem:[#allocation3 + $0xb1] sm:$0xff] }
 0x343   : > { %3918 = vst.msk [vmem:[#allocation3 + $0xe1] sm:$0xff] %vm202_vm0, %v3831_v29  ;;  %v3801_v11 = vadd.f32 %v11394_v25, %v3765_v7  ;;  %v11500_v12 = vld [vmem:[#allocation3 + $0xa9] sm:$0xff] }
 0x344   : > { %3917 = vst.msk [vmem:[#allocation3 + $0xd9] sm:$0xff] %vm202_vm0, %v3830_v10  ;;  %v3800_v43 = vadd.f32 %v11394_v25, %v3764_v9  ;;  %v9244_v44 = vpop.f32.mrb[20].mxu0  ;;  %9283 = vmatprep.mubr.msk.f32.mxu1 %vm202_vm0, %v11500_v12 }
 0x345   : > { %v3833_v47 = vmax.f32 %v3801_v11, 0.0  ;;  %v3767_v48 = vmul.f32 %v9244_v44, %v11389_v24  ;;  %v3651_v49 = vpop.f32.mrb[21].mxu0  ;;  %9284 = vmatmul.mubr.msk.f32.gmra.mrb[14].mxu1 %vm202_vm0, %v11506_v46 }
 0x346   : > { %v3832_v50 = vmax.f32 %v3800_v43, 0.0  ;;  %v3766_v51 = vmul.f32 %v11389_v24, %v3651_v49  ;;  %v11520_v58 = vld [vmem:[#allocation3 + $0xc9] sm:$0xff] }
 0x347   : > { %3920 = vst.msk [vmem:[#allocation3 + $0xf9] sm:$0xff] %vm202_vm0, %v3833_v47  ;;  %v3803_v53 = vadd.f32 %v11394_v25, %v3767_v48  ;;  %v11514_v54 = vld [vmem:[#allocation3 + $0xc1] sm:$0xff] }
 0x348   : > { %3919 = vst.msk [vmem:[#allocation3 + $0xf1] sm:$0xff] %vm202_vm0, %v3832_v50  ;;  %v3802_v56 = vadd.f32 %v11394_v25, %v3766_v51  ;;  %v9247_v57 = vpop.f32.mrb[22].mxu0  ;;  %9286 = vmatprep.mubr.msk.f32.mxu1 %vm202_vm0, %v11514_v54 }
 0x349   : > { %v3835_v59 = vmax.f32 %v3803_v53, 0.0  ;;  %v3769_v60 = vmul.f32 %v9247_v57, %v11389_v24  ;;  %v3661_v61 = vpop.f32.mrb[23].mxu0  ;;  %9287 = vmatmul.mubr.msk.f32.gmra.mrb[16].mxu1 %vm202_vm0, %v11520_v58 }
 0x34a   : > { %v3834_v14 = vmax.f32 %v3802_v56, 0.0  ;;  %v3768_v15 = vmul.f32 %v11389_v24, %v3661_v61  ;;  %v11534_v19 = vld [vmem:[#allocation3 + $0xe1] sm:$0xff] }
 0x34b   : > { %3922 = vst.msk [vmem:[#allocation3 + $0x111] sm:$0xff] %vm202_vm0, %v3835_v59  ;;  %v3805_v62 = vadd.f32 %v11394_v25, %v3769_v60  ;;  %v11528_v17 = vld [vmem:[#allocation3 + $0xd9] sm:$0xff] }
 0x34c   : > { %3921 = vst.msk [vmem:[#allocation3 + $0x109] sm:$0xff] %vm202_vm0, %v3834_v14  ;;  %v3804_v18 = vadd.f32 %v11394_v25, %v3768_v15  ;;  %v9250_v0 = vpop.f32.mrb[24].mxu0  ;;  %9289 = vmatprep.mubr.msk.f32.mxu1 %vm202_vm0, %v11528_v17 }
 0x34d   : > { %v3837_v20 = vmax.f32 %v3805_v62, 0.0  ;;  %v3771_v22 = vmul.f32 %v9250_v0, %v11389_v24  ;;  %v3671_v26 = vpop.f32.mrb[25].mxu0  ;;  %9290 = vmatmul.mubr.msk.f32.gmra.mrb[18].mxu1 %vm202_vm0, %v11534_v19  ;;  %v3933_v0 = vld [vmem:[#allocation3] sm:$0xff] }
 0x34e   : > { %v3836_v31 = vmax.f32 %v3804_v18, 0.0  ;;  %v3770_v32 = vmul.f32 %v11389_v24, %v3671_v26  ;;  %v11548_v40 = vld [vmem:[#allocation3 + $0xf9] sm:$0xff]  ;;  %v11616_v26 = vld [vmem:[%s12444_s2 + $0x18] sm:$0xff] }
 0x34f   : > { %3924 = vst.msk [vmem:[#allocation3 + $0x129] sm:$0xff] %vm202_vm0, %v3837_v20  ;;  %v3807_v37 = vadd.f32 %v11394_v25, %v3771_v22  ;;  %v11542_v38 = vld [vmem:[#allocation3 + $0xf1] sm:$0xff]  ;;  %v3934_v22 = vld [vmem:[#allocation3 + $0x8] sm:$0xff] }
 0x350   : > { %3923 = vst.msk [vmem:[#allocation3 + $0x121] sm:$0xff] %vm202_vm0, %v3836_v31  ;;  %v3806_v41 = vadd.f32 %v11394_v25, %v3770_v32  ;;  %v9253_v42 = vpop.f32.mrb[26].mxu0  ;;  %9292 = vmatprep.mubr.msk.f32.mxu1 %vm202_vm0, %v11542_v38  ;;  %v11619_v31 = vld [vmem:[#allocation3 + $0x18] sm:$0xff]  ;;  %v11625_v32 = vld [vmem:[#allocation3 + $0x20] sm:$0xff] }
 0x351   : > { %v3839_v3 = vmax.f32 %v3807_v37, 0.0  ;;  %v3773_v5 = vmul.f32 %v9253_v42, %v11389_v24  ;;  %v3681_v1 = vpop.f32.mrb[27].mxu0  ;;  %9293 = vmatmul.mubr.msk.f32.gmra.mrb[20].mxu1 %vm202_vm0, %v11548_v40  ;;  %v11629_v37 = vld [vmem:[#allocation3 + $0x30] sm:$0xff] }
 0x352   : > { %v3838_v4 = vmax.f32 %v3806_v41, 0.0  ;;  %v3772_v28 = vmul.f32 %v11389_v24, %v3681_v1  ;;  %v11562_v29 = vld [vmem:[#allocation3 + $0x111] sm:$0xff] }
 0x353   : > { %3926 = vst.msk [vmem:[#allocation3 + $0x141] sm:$0xff] %vm202_vm0, %v3839_v3  ;;  %v3809_v30 = vadd.f32 %v11394_v25, %v3773_v5  ;;  %v11556_v33 = vld [vmem:[#allocation3 + $0x109] sm:$0xff]  ;;  %v11633_v41 = vld [vmem:[#allocation3 + $0x38] sm:$0xff]  ;;  %v11645_v3 = vld [vmem:[#allocation3 + $0x60] sm:$0xff] }
 0x354   : > { %3925 = vst.msk [vmem:[#allocation3 + $0x139] sm:$0xff] %vm202_vm0, %v3838_v4  ;;  %v3808_v63 = vadd.f32 %v11394_v25, %v3772_v28  ;;  %v9256_v35 = vpop.f32.mrb[28].mxu0  ;;  %9295 = vmatprep.mubr.msk.f32.mxu1 %vm202_vm0, %v11556_v33  ;;  %v11641_v42 = vld [vmem:[#allocation3 + $0x50] sm:$0xff]  ;;  %v11649_v5 = vld [vmem:[#allocation3 + $0x68] sm:$0xff]  ;;  %v11653_v1 = vld [vmem:[#allocation3 + $0x78] sm:$0xff] }
 0x355   : > { %v3841_v7 = vmax.f32 %v3809_v30, 0.0  ;;  %v3775_v8 = vmul.f32 %v9256_v35, %v11389_v24  ;;  %v3691_v10 = vpop.f32.mrb[29].mxu0  ;;  %9296 = vmatmul.mubr.msk.f32.gmra.mrb[22].mxu1 %vm202_vm0, %v11562_v29  ;;  %v11657_v4 = vld [vmem:[#allocation3 + $0x80] sm:$0xff]  ;;  %v11661_v28 = vld [vmem:[#allocation3 + $0x90] sm:$0xff]  ;;  %v11665_v30 = vld [vmem:[#allocation3 + $0x98] sm:$0xff] }
 0x356   : > { %v3840_v9 = vmax.f32 %v3808_v63, 0.0  ;;  %v3774_v11 = vmul.f32 %v11389_v24, %v3691_v10  ;;  %v11576_v49 = vld [vmem:[#allocation3 + $0x129] sm:$0xff]  ;;  %v11685_v10 = vld [vmem:[#allocation3 + $0xd8] sm:$0xff] }
 0x357   : > { %3928 = vst.msk [vmem:[#allocation3 + $0x159] sm:$0xff] %vm202_vm0, %v3841_v7  ;;  %v3811_v43 = vadd.f32 %v11394_v25, %v3775_v8  ;;  %v11570_v44 = vld [vmem:[#allocation3 + $0x121] sm:$0xff]  ;;  %v11673_v35 = vld [vmem:[#allocation3 + $0xb0] sm:$0xff] }
 0x358   : > { %3927 = vst.msk [vmem:[#allocation3 + $0x151] sm:$0xff] %vm202_vm0, %v3840_v9  ;;  %v3810_v47 = vadd.f32 %v11394_v25, %v3774_v11  ;;  %v9259_v48 = vpop.f32.mrb[30].mxu0  ;;  %9298 = vmatprep.mubr.msk.f32.mxu1 %vm202_vm0, %v11570_v44  ;;  %v11669_v63 = vld [vmem:[#allocation3 + $0xa8] sm:$0xff]  ;;  %v11677_v7 = vld [vmem:[#allocation3 + $0xc0] sm:$0xff]  ;;  %v11693_v11 = vld [vmem:[#allocation3 + $0xf0] sm:$0xff] }
 0x359   : > { %v3843_v50 = vmax.f32 %v3811_v43, 0.0  ;;  %v3777_v51 = vmul.f32 %v9259_v48, %v11389_v24  ;;  %v3701_v53 = vpop.f32.mrb[31].mxu0  ;;  %9299 = vmatmul.mubr.msk.f32.gmra.mrb[24].mxu1 %vm202_vm0, %v11576_v49  ;;  %v11681_v8 = vld [vmem:[#allocation3 + $0xc8] sm:$0xff]  ;;  %v11689_v9 = vld [vmem:[#allocation3 + $0xe0] sm:$0xff]  ;;  %v11697_v43 = vld [vmem:[#allocation3 + $0xf8] sm:$0xff] }
 0x35a   : > { %v3842_v56 = vmax.f32 %v3810_v47, 0.0  ;;  %v3776_v57 = vmul.f32 %v11389_v24, %v3701_v53  ;;  %v11590_v14 = vld [vmem:[#allocation3 + $0x141] sm:$0xff]  ;;  %v11705_v48 = vld [vmem:[#allocation3 + $0x110] sm:$0xff] }
 0x35b   : > { %3930 = vst.msk [vmem:[#allocation3 + $0x171] sm:$0xff] %vm202_vm0, %v3843_v50  ;;  %v3813_v59 = vadd.f32 %v11394_v25, %v3777_v51  ;;  %v11584_v60 = vld [vmem:[#allocation3 + $0x139] sm:$0xff]  ;;  %v11701_v47 = vld [vmem:[#allocation3 + $0x108] sm:$0xff] }
 0x35c   : > { %3929 = vst.msk [vmem:[#allocation3 + $0x169] sm:$0xff] %vm202_vm0, %v3842_v56  ;;  %v3812_v61 = vadd.f32 %v11394_v25, %v3776_v57  ;;  %9301 = vmatprep.mubr.msk.f32.mxu1 %vm202_vm0, %v11584_v60  ;;  %v11709_v50 = vld [vmem:[#allocation3 + $0x120] sm:$0xff]  ;;  %v11713_v51 = vld [vmem:[#allocation3 + $0x128] sm:$0xff]  ;;  %v11717_v53 = vld [vmem:[#allocation3 + $0x138] sm:$0xff] }
 0x35d   : > { %v3845_v15 = vmax.f32 %v3813_v59, 0.0  ;;  %9302 = vmatmul.mubr.msk.f32.gmra.mrb[26].mxu1 %vm202_vm0, %v11590_v14  ;;  %v11721_v56 = vld [vmem:[#allocation3 + $0x140] sm:$0xff] }
 0x35e   : > { %v3844_v24 = vmax.f32 %v3812_v61, 0.0  ;;  %v11600_v25 = vld [vmem:[#allocation3 + $0x159] sm:$0xff] }
 0x35f   : > { %3932 = vst.msk [vmem:[#allocation3 + $0x189] sm:$0xff] %vm202_vm0, %v3845_v15  ;;  %v11595_v62 = vld [vmem:[#allocation3 + $0x151] sm:$0xff]  ;;  %v4642_v15 = vld [vmem:[#allocation3 + $0x2] sm:$0xff] }
 0x360   : > { %3931 = vst.msk [vmem:[#allocation3 + $0x181] sm:$0xff] %vm202_vm0, %v3844_v24  ;;  %9304 = vmatprep.mubr.msk.f32.mxu1 %vm202_vm0, %v11595_v62  ;;  %v11725_v57 = vld [vmem:[#allocation3 + $0x150] sm:$0xff]  ;;  %v11729_v59 = vld [vmem:[#allocation3 + $0x158] sm:$0xff] }
 0x361   : > { %9305 = vmatmul.mubr.msk.f32.gmra.mrb[28].mxu1 %vm202_vm0, %v11600_v25 }
 0x362   : > { %v11608_v20 = vld [vmem:[#allocation3 + $0x171] sm:$0xff] }
 0x363   : > { %v11604_v18 = vld [vmem:[#allocation3 + $0x169] sm:$0xff]  ;;  %12646 = vst [vmem:[#allocation9_spill] sm:$0xff] %v11608_v20 }
 0x364   : > { %12645 = vst [vmem:[#allocation8_spill] sm:$0xff] %v11604_v18  ;;  %9307 = vmatprep.mubr.msk.f32.mxu1 %vm202_vm0, %v11604_v18  ;;  %v11733_v61 = vld [vmem:[#allocation3 + $0x168] sm:$0xff]  ;;  %v11737_v24 = vld [vmem:[#allocation3 + $0x170] sm:$0xff] }
 0x365   : > { %9308 = vmatmul.mubr.msk.f32.gmra.mrb[30].mxu1 %vm202_vm0, %v11608_v20  ;;  %v11748_v20 = vld [vmem:[#allocation3 + $0x1a] sm:$0xff]  ;;  %v11754_v18 = vld [vmem:[#allocation3 + $0x22] sm:$0xff] }
 0x366   : > { %9312 = vmatprep.mubr.msk.f32.mxu1 %vm202_vm0, %v3933_v0  ;;  %v4643_v0 = vld [vmem:[#allocation3 + $0xa] sm:$0xff]  ;;  %12647 = vst [vmem:[#allocation23_spill] sm:$0xff] %v11748_v20  ;;  %12648 = vst [vmem:[#allocation25_spill] sm:$0xff] %v11754_v18 }
 0x369   : > { %9313 = vmatmul.mubr.msk.f32.vlgmr.msra.gmra.mrb[0].mxu1 %vm202_vm0, %v3934_v22  ;;  %v11745_v22 = vld [vmem:[%s12444_s2 + $0x20] sm:$0xff] }
 0x36a   : > { %9361 = vmatpush3.msra.mxu1 %v11383_v23  ;;  %9315 = vmatprep.mubr.msk.f32.mxu1 %vm202_vm0, %v11619_v31  ;;  %v11637_v23 = vld [vmem:[#allocation3 + $0x48] sm:$0xff] }
 0x36b   : > { %9410 = vmatprep.subr.mxu1 %v11616_v26 }
 0x36d   : > { %9316 = vmatmul.mubr.msk.f32.gmra.mrb[2].mxu1 %vm202_vm0, %v11625_v32 }
 0x36e   : > { %9318 = vmatprep.mubr.msk.f32.mxu1 %vm202_vm0, %v11629_v37 }
 0x371   : > { %9319 = vmatmul.mubr.msk.f32.gmra.mrb[4].mxu1 %vm202_vm0, %v11633_v41 }
 0x372   : > { %9321 = vmatprep.mubr.msk.f32.mxu1 %vm202_vm0, %v11637_v23 }
 0x375   : > { %9322 = vmatmul.mubr.msk.f32.gmra.mrb[6].mxu1 %vm202_vm0, %v11641_v42 }
 0x376   : > { %9324 = vmatprep.mubr.msk.f32.mxu1 %vm202_vm0, %v11645_v3 }
 0x379   : > { %9325 = vmatmul.mubr.msk.f32.gmra.mrb[8].mxu1 %vm202_vm0, %v11649_v5 }
 0x37a   : > { %9327 = vmatprep.mubr.msk.f32.mxu1 %vm202_vm0, %v11653_v1 }
 0x37d   : > { %9328 = vmatmul.mubr.msk.f32.gmra.mrb[10].mxu1 %vm202_vm0, %v11657_v4 }
 0x37e   : > { %9330 = vmatprep.mubr.msk.f32.mxu1 %vm202_vm0, %v11661_v28 }
 0x381   : > { %9331 = vmatmul.mubr.msk.f32.gmra.mrb[12].mxu1 %vm202_vm0, %v11665_v30 }
 0x382   : > { %9333 = vmatprep.mubr.msk.f32.mxu1 %vm202_vm0, %v11669_v63 }
 0x385   : > { %9334 = vmatmul.mubr.msk.f32.gmra.mrb[14].mxu1 %vm202_vm0, %v11673_v35 }
 0x386   : > { %9336 = vmatprep.mubr.msk.f32.mxu1 %vm202_vm0, %v11677_v7 }
 0x389   : > { %9337 = vmatmul.mubr.msk.f32.gmra.mrb[16].mxu1 %vm202_vm0, %v11681_v8 }
 0x38a   : > { %9339 = vmatprep.mubr.msk.f32.mxu1 %vm202_vm0, %v11685_v10 }
 0x38d   : > { %9340 = vmatmul.mubr.msk.f32.gmra.mrb[18].mxu1 %vm202_vm0, %v11689_v9 }
 0x38e   : > { %9342 = vmatprep.mubr.msk.f32.mxu1 %vm202_vm0, %v11693_v11 }
 0x391   : > { %9343 = vmatmul.mubr.msk.f32.gmra.mrb[20].mxu1 %vm202_vm0, %v11697_v43 }
 0x392   : > { %9345 = vmatprep.mubr.msk.f32.mxu1 %vm202_vm0, %v11701_v47 }
 0x395   : > { %9346 = vmatmul.mubr.msk.f32.gmra.mrb[22].mxu1 %vm202_vm0, %v11705_v48 }
 0x396   : > { %9348 = vmatprep.mubr.msk.f32.mxu1 %vm202_vm0, %v11709_v50 }
 0x399   : > { %9349 = vmatmul.mubr.msk.f32.gmra.mrb[24].mxu1 %vm202_vm0, %v11713_v51 }
 0x39a   : > { %9351 = vmatprep.mubr.msk.f32.mxu1 %vm202_vm0, %v11717_v53 }
 0x39d   : > { %9352 = vmatmul.mubr.msk.f32.gmra.mrb[26].mxu1 %vm202_vm0, %v11721_v56 }
 0x39e   : > { %9354 = vmatprep.mubr.msk.f32.mxu1 %vm202_vm0, %v11725_v57 }
 0x3a1   : > { %9355 = vmatmul.mubr.msk.f32.gmra.mrb[28].mxu1 %vm202_vm0, %v11729_v59 }
 0x3a2   : > { %9357 = vmatprep.mubr.msk.f32.mxu1 %vm202_vm0, %v11733_v61 }
 0x3a5   : > { %9358 = vmatmul.mubr.msk.f32.gmra.mrb[30].mxu1 %vm202_vm0, %v11737_v24 }
 0x3a6   : > { %9362 = vmatprep.mubr.msk.f32.mxu1 %vm202_vm0, %v4642_v15  ;;  %v11758_v15 = vld [vmem:[#allocation3 + $0x32] sm:$0xff] }
 0x3a7   : > { %12649 = vst [vmem:[#allocation27_spill] sm:$0xff] %v11758_v15 }
 0x3a9   : > { %9363 = vmatmul.mubr.msk.f32.vlgmr.msra.gmra.mrb[0].mxu1 %vm202_vm0, %v4643_v0  ;;  %v11762_v0 = vld [vmem:[#allocation3 + $0x3a] sm:$0xff] }
 0x3aa   : > { %9411 = vmatpush3.msra.mxu1 %v11616_v26  ;;  %9365 = vmatprep.mubr.msk.f32.mxu1 %vm202_vm0, %v11748_v20  ;;  %12650 = vst [vmem:[#allocation28_spill] sm:$0xff] %v11762_v0  ;;  %v11766_v26 = vld [vmem:[#allocation3 + $0x4a] sm:$0xff]  ;;  %v11770_v20 = vld [vmem:[#allocation3 + $0x52] sm:$0xff] }
 0x3ab   : > { %9460 = vmatprep.subr.mxu1 %v11745_v22  ;;  %12651 = vst [vmem:[#allocation30_spill] sm:$0xff] %v11766_v26  ;;  %12652 = vst [vmem:[#allocation32_spill] sm:$0xff] %v11770_v20 }
 0x3ad   : > { %9366 = vmatmul.mubr.msk.f32.gmra.mrb[2].mxu1 %vm202_vm0, %v11754_v18  ;;  %v11774_v18 = vld [vmem:[#allocation3 + $0x62] sm:$0xff] }
 0x3ae   : > { %9368 = vmatprep.mubr.msk.f32.mxu1 %vm202_vm0, %v11758_v15  ;;  %12653 = vst [vmem:[#allocation4_spill] sm:$0xff] %v11774_v18  ;;  %v11778_v15 = vld [vmem:[#allocation3 + $0x6a] sm:$0xff] }
 0x3af   : > { %12654 = vst [vmem:[#allocation5_spill] sm:$0xff] %v11778_v15 }
 0x3b1   : > { %9369 = vmatmul.mubr.msk.f32.gmra.mrb[4].mxu1 %vm202_vm0, %v11762_v0  ;;  %v11782_v0 = vld [vmem:[#allocation3 + $0x7a] sm:$0xff] }
 0x3b2   : > { %9371 = vmatprep.mubr.msk.f32.mxu1 %vm202_vm0, %v11766_v26  ;;  %12655 = vst [vmem:[#allocation6_spill] sm:$0xff] %v11782_v0  ;;  %v11786_v26 = vld [vmem:[#allocation3 + $0x82] sm:$0xff] }
 0x3b3   : > { %12656 = vst [vmem:[#allocation7_spill] sm:$0xff] %v11786_v26 }
 0x3b5   : > { %9372 = vmatmul.mubr.msk.f32.gmra.mrb[6].mxu1 %vm202_vm0, %v11770_v20  ;;  %v11790_v20 = vld [vmem:[#allocation3 + $0x92] sm:$0xff] }
 0x3b6   : > { %9374 = vmatprep.mubr.msk.f32.mxu1 %vm202_vm0, %v11774_v18  ;;  %12657 = vst [vmem:[#allocation34_spill] sm:$0xff] %v11790_v20  ;;  %v11794_v18 = vld [vmem:[#allocation3 + $0x9a] sm:$0xff] }
 0x3b7   : > { %12658 = vst [vmem:[#allocation35_spill] sm:$0xff] %v11794_v18 }
 0x3b9   : > { %9375 = vmatmul.mubr.msk.f32.gmra.mrb[8].mxu1 %vm202_vm0, %v11778_v15  ;;  %v11798_v15 = vld [vmem:[#allocation3 + $0xaa] sm:$0xff] }
 0x3ba   : > { %9377 = vmatprep.mubr.msk.f32.mxu1 %vm202_vm0, %v11782_v0  ;;  %12659 = vst [vmem:[#allocation10_spill] sm:$0xff] %v11798_v15  ;;  %v11802_v0 = vld [vmem:[#allocation3 + $0xb2] sm:$0xff] }
 0x3bb   : > { %12660 = vst [vmem:[#allocation11_spill] sm:$0xff] %v11802_v0 }
 0x3bd   : > { %9378 = vmatmul.mubr.msk.f32.gmra.mrb[10].mxu1 %vm202_vm0, %v11786_v26  ;;  %v11806_v26 = vld [vmem:[#allocation3 + $0xc2] sm:$0xff] }
 0x3be   : > { %9380 = vmatprep.mubr.msk.f32.mxu1 %vm202_vm0, %v11790_v20  ;;  %12661 = vst [vmem:[#allocation12_spill] sm:$0xff] %v11806_v26  ;;  %v11810_v20 = vld [vmem:[#allocation3 + $0xca] sm:$0xff] }
 0x3bf   : > { %12662 = vst [vmem:[#allocation13_spill] sm:$0xff] %v11810_v20 }
 0x3c1   : > { %9381 = vmatmul.mubr.msk.f32.gmra.mrb[12].mxu1 %vm202_vm0, %v11794_v18  ;;  %v11814_v18 = vld [vmem:[#allocation3 + $0xda] sm:$0xff] }
 0x3c2   : > { %9383 = vmatprep.mubr.msk.f32.mxu1 %vm202_vm0, %v11798_v15  ;;  %12663 = vst [vmem:[#allocation14_spill] sm:$0xff] %v11814_v18  ;;  %v11818_v15 = vld [vmem:[#allocation3 + $0xe2] sm:$0xff] }
 0x3c3   : > { %12664 = vst [vmem:[#allocation15_spill] sm:$0xff] %v11818_v15 }
 0x3c5   : > { %9384 = vmatmul.mubr.msk.f32.gmra.mrb[14].mxu1 %vm202_vm0, %v11802_v0  ;;  %v11822_v0 = vld [vmem:[#allocation3 + $0xf2] sm:$0xff] }
 0x3c6   : > { %9386 = vmatprep.mubr.msk.f32.mxu1 %vm202_vm0, %v11806_v26  ;;  %12665 = vst [vmem:[#allocation16_spill] sm:$0xff] %v11822_v0  ;;  %v11826_v26 = vld [vmem:[#allocation3 + $0xfa] sm:$0xff] }
 0x3c7   : > { %12666 = vst [vmem:[#allocation17_spill] sm:$0xff] %v11826_v26 }
 0x3c9   : > { %9387 = vmatmul.mubr.msk.f32.gmra.mrb[16].mxu1 %vm202_vm0, %v11810_v20  ;;  %v11830_v20 = vld [vmem:[#allocation3 + $0x10a] sm:$0xff] }
 0x3ca   : > { %9389 = vmatprep.mubr.msk.f32.mxu1 %vm202_vm0, %v11814_v18  ;;  %12667 = vst [vmem:[#allocation18_spill] sm:$0xff] %v11830_v20  ;;  %v11834_v18 = vld [vmem:[#allocation3 + $0x112] sm:$0xff] }
 0x3cb   : > { %12668 = vst [vmem:[#allocation19_spill] sm:$0xff] %v11834_v18 }
 0x3cd   : > { %9390 = vmatmul.mubr.msk.f32.gmra.mrb[18].mxu1 %vm202_vm0, %v11818_v15  ;;  %v11838_v15 = vld [vmem:[#allocation3 + $0x122] sm:$0xff] }
 0x3ce   : > { %9392 = vmatprep.mubr.msk.f32.mxu1 %vm202_vm0, %v11822_v0  ;;  %12669 = vst [vmem:[#allocation20_spill] sm:$0xff] %v11838_v15  ;;  %v11842_v0 = vld [vmem:[#allocation3 + $0x12a] sm:$0xff] }
 0x3cf   : > { %12670 = vst [vmem:[#allocation21_spill] sm:$0xff] %v11842_v0 }
 0x3d1   : > { %9393 = vmatmul.mubr.msk.f32.gmra.mrb[20].mxu1 %vm202_vm0, %v11826_v26  ;;  %v11846_v26 = vld [vmem:[#allocation3 + $0x13a] sm:$0xff] }
 0x3d2   : > { %9395 = vmatprep.mubr.msk.f32.mxu1 %vm202_vm0, %v11830_v20  ;;  %12671 = vst [vmem:[#allocation22_spill] sm:$0xff] %v11846_v26  ;;  %v11850_v20 = vld [vmem:[#allocation3 + $0x142] sm:$0xff] }
 0x3d5   : > { %9396 = vmatmul.mubr.msk.f32.gmra.mrb[22].mxu1 %vm202_vm0, %v11834_v18  ;;  %v11854_v18 = vld [vmem:[#allocation3 + $0x152] sm:$0xff] }
 0x3d6   : > { %9398 = vmatprep.mubr.msk.f32.mxu1 %vm202_vm0, %v11838_v15  ;;  %12672 = vst [vmem:[#allocation24_spill] sm:$0xff] %v11854_v18  ;;  %v11858_v15 = vld [vmem:[#allocation3 + $0x15a] sm:$0xff] }
 0x3d9   : > { %9399 = vmatmul.mubr.msk.f32.gmra.mrb[24].mxu1 %vm202_vm0, %v11842_v0  ;;  %v11862_v0 = vld [vmem:[#allocation3 + $0x16a] sm:$0xff] }
 0x3da   : > { %9401 = vmatprep.mubr.msk.f32.mxu1 %vm202_vm0, %v11846_v26  ;;  %12673 = vst [vmem:[#allocation26_spill] sm:$0xff] %v11862_v0  ;;  %v11866_v26 = vld [vmem:[#allocation3 + $0x172] sm:$0xff] }
 0x3dd   : > { %9402 = vmatmul.mubr.msk.f32.gmra.mrb[26].mxu1 %vm202_vm0, %v11850_v20 }
 0x3de   : > { %9404 = vmatprep.mubr.msk.f32.mxu1 %vm202_vm0, %v11854_v18  ;;  %v8078_v18 = vld [vmem:[%s12444_s2 + $0x28] sm:$0xff] }
 0x3e1   : > { %9405 = vmatmul.mubr.msk.f32.gmra.mrb[28].mxu1 %vm202_vm0, %v11858_v15 }
 0x3e2   : > { %9407 = vmatprep.mubr.msk.f32.mxu1 %vm202_vm0, %v11862_v0 }
 0x3e5   : > { %9408 = vmatmul.mubr.msk.f32.gmra.mrb[30].mxu1 %vm202_vm0, %v11866_v26 }
 0x3e6   : > { %9412 = vmatprep.mubr.msk.f32.mxu1 %vm202_vm0, %v11619_v31  ;;  %v11934_v31 = vld [vmem:[#allocation3 + $0x180] sm:$0xff] }
 0x3e9   : > { %9413 = vmatmul.mubr.msk.f32.vlgmr.msra.gmra.mrb[0].mxu1 %vm202_vm0, %v11625_v32  ;;  %v11938_v32 = vld [vmem:[#allocation3 + $0x188] sm:$0xff] }
 0x3ea   : > { %9461 = vmatpush3.msra.mxu1 %v11745_v22  ;;  %9415 = vmatprep.mubr.msk.f32.mxu1 %vm202_vm0, %v11629_v37  ;;  %v8111_v22 = vld [vmem:[%s12444_s2 + $0x30] sm:$0xff] }
 0x3eb   : > { %9510 = vmatprep.subr.mxu1 %v8078_v18 }
 0x3ed   : > { %9416 = vmatmul.mubr.msk.f32.gmra.mrb[2].mxu1 %vm202_vm0, %v11633_v41 }
 0x3ee   : > { %9418 = vmatprep.mubr.msk.f32.mxu1 %vm202_vm0, %v11637_v23 }
 0x3f1   : > { %9419 = vmatmul.mubr.msk.f32.gmra.mrb[4].mxu1 %vm202_vm0, %v11641_v42 }
 0x3f2   : > { %9421 = vmatprep.mubr.msk.f32.mxu1 %vm202_vm0, %v11645_v3 }
 0x3f5   : > { %9422 = vmatmul.mubr.msk.f32.gmra.mrb[6].mxu1 %vm202_vm0, %v11649_v5 }
 0x3f6   : > { %9424 = vmatprep.mubr.msk.f32.mxu1 %vm202_vm0, %v11653_v1 }
 0x3f9   : > { %9425 = vmatmul.mubr.msk.f32.gmra.mrb[8].mxu1 %vm202_vm0, %v11657_v4 }
 0x3fa   : > { %9427 = vmatprep.mubr.msk.f32.mxu1 %vm202_vm0, %v11661_v28 }
 0x3fd   : > { %9428 = vmatmul.mubr.msk.f32.gmra.mrb[10].mxu1 %vm202_vm0, %v11665_v30 }
 0x3fe   : > { %9430 = vmatprep.mubr.msk.f32.mxu1 %vm202_vm0, %v11669_v63 }
 0x401   : > { %9431 = vmatmul.mubr.msk.f32.gmra.mrb[12].mxu1 %vm202_vm0, %v11673_v35 }
 0x402   : > { %9433 = vmatprep.mubr.msk.f32.mxu1 %vm202_vm0, %v11677_v7 }
 0x405   : > { %9434 = vmatmul.mubr.msk.f32.gmra.mrb[14].mxu1 %vm202_vm0, %v11681_v8 }
 0x406   : > { %9436 = vmatprep.mubr.msk.f32.mxu1 %vm202_vm0, %v11685_v10 }
 0x409   : > { %9437 = vmatmul.mubr.msk.f32.gmra.mrb[16].mxu1 %vm202_vm0, %v11689_v9 }
 0x40a   : > { %9439 = vmatprep.mubr.msk.f32.mxu1 %vm202_vm0, %v11693_v11 }
 0x40d   : > { %9440 = vmatmul.mubr.msk.f32.gmra.mrb[18].mxu1 %vm202_vm0, %v11697_v43 }
 0x40e   : > { %9442 = vmatprep.mubr.msk.f32.mxu1 %vm202_vm0, %v11701_v47 }
 0x411   : > { %9443 = vmatmul.mubr.msk.f32.gmra.mrb[20].mxu1 %vm202_vm0, %v11705_v48 }
 0x412   : > { %9445 = vmatprep.mubr.msk.f32.mxu1 %vm202_vm0, %v11709_v50 }
 0x415   : > { %9446 = vmatmul.mubr.msk.f32.gmra.mrb[22].mxu1 %vm202_vm0, %v11713_v51 }
 0x416   : > { %9448 = vmatprep.mubr.msk.f32.mxu1 %vm202_vm0, %v11717_v53 }
 0x419   : > { %9449 = vmatmul.mubr.msk.f32.gmra.mrb[24].mxu1 %vm202_vm0, %v11721_v56 }
 0x41a   : > { %9451 = vmatprep.mubr.msk.f32.mxu1 %vm202_vm0, %v11725_v57 }
 0x41d   : > { %9452 = vmatmul.mubr.msk.f32.gmra.mrb[26].mxu1 %vm202_vm0, %v11729_v59 }
 0x41e   : > { %9454 = vmatprep.mubr.msk.f32.mxu1 %vm202_vm0, %v11733_v61 }
 0x421   : > { %9455 = vmatmul.mubr.msk.f32.gmra.mrb[28].mxu1 %vm202_vm0, %v11737_v24 }
 0x422   : > { %9457 = vmatprep.mubr.msk.f32.mxu1 %vm202_vm0, %v11934_v31 }
 0x425   : > { %9458 = vmatmul.mubr.msk.f32.gmra.mrb[30].mxu1 %vm202_vm0, %v11938_v32 }
 0x426   : > { %9462 = vmatprep.mubr.msk.f32.mxu1 %vm202_vm0, %v11416_v36  ;;  %v12674_v36 = vld [vmem:[#allocation8_spill] sm:$0xff] }
 0x429   : > { %9463 = vmatmul.mubr.msk.f32.vlgmr.msra.gmra.mrb[0].mxu1 %vm202_vm0, %v11422_v45  ;;  %v12675_v45 = vld [vmem:[#allocation9_spill] sm:$0xff] }
 0x42a   : > { %9511 = vmatpush3.msra.mxu1 %v8078_v18  ;;  %9465 = vmatprep.mubr.msk.f32.mxu1 %vm202_vm0, %v11430_v52  ;;  %v12005_v52 = vld [vmem:[#allocation3 + $0x181] sm:$0xff] }
 0x42b   : > { %9560 = vmatprep.subr.mxu1 %v8111_v22  ;;  %v12684_v18 = vld [vmem:[#allocation6_spill] sm:$0xff] }
 0x42d   : > { %9466 = vmatmul.mubr.msk.f32.gmra.mrb[2].mxu1 %vm202_vm0, %v11436_v55  ;;  %v12009_v55 = vld [vmem:[#allocation3 + $0x189] sm:$0xff] }
 0x42e   : > { %9468 = vmatprep.mubr.msk.f32.mxu1 %vm202_vm0, %v11444_v13  ;;  %v12676_v13 = vld [vmem:[#allocation23_spill] sm:$0xff] }
 0x431   : > { %9469 = vmatmul.mubr.msk.f32.gmra.mrb[4].mxu1 %vm202_vm0, %v11450_v16  ;;  %v8144_v16 = vld [vmem:[%s12444_s2 + $0x38] sm:$0xff] }
 0x432   : > { %9471 = vmatprep.mubr.msk.f32.mxu1 %vm202_vm0, %v11458_v21  ;;  %v12677_v21 = vld [vmem:[#allocation25_spill] sm:$0xff] }
 0x435   : > { %9472 = vmatmul.mubr.msk.f32.gmra.mrb[6].mxu1 %vm202_vm0, %v11464_v27  ;;  %v12678_v27 = vld [vmem:[#allocation27_spill] sm:$0xff] }
 0x436   : > { %9474 = vmatprep.mubr.msk.f32.mxu1 %vm202_vm0, %v11472_v2  ;;  %v12679_v2 = vld [vmem:[#allocation28_spill] sm:$0xff] }
 0x439   : > { %9475 = vmatmul.mubr.msk.f32.gmra.mrb[8].mxu1 %vm202_vm0, %v11478_v39  ;;  %v12680_v39 = vld [vmem:[#allocation30_spill] sm:$0xff] }
 0x43a   : > { %9477 = vmatprep.mubr.msk.f32.mxu1 %vm202_vm0, %v11486_v34  ;;  %v12681_v34 = vld [vmem:[#allocation32_spill] sm:$0xff] }
 0x43d   : > { %9478 = vmatmul.mubr.msk.f32.gmra.mrb[10].mxu1 %vm202_vm0, %v11492_v6  ;;  %v12682_v6 = vld [vmem:[#allocation4_spill] sm:$0xff] }
 0x43e   : > { %9480 = vmatprep.mubr.msk.f32.mxu1 %vm202_vm0, %v11500_v12  ;;  %v12683_v12 = vld [vmem:[#allocation5_spill] sm:$0xff] }
 0x441   : > { %9481 = vmatmul.mubr.msk.f32.gmra.mrb[12].mxu1 %vm202_vm0, %v11506_v46 }
 0x442   : > { %9483 = vmatprep.mubr.msk.f32.mxu1 %vm202_vm0, %v11514_v54 }
 0x445   : > { %9484 = vmatmul.mubr.msk.f32.gmra.mrb[14].mxu1 %vm202_vm0, %v11520_v58 }
 0x446   : > { %9486 = vmatprep.mubr.msk.f32.mxu1 %vm202_vm0, %v11528_v17 }
 0x449   : > { %9487 = vmatmul.mubr.msk.f32.gmra.mrb[16].mxu1 %vm202_vm0, %v11534_v19 }
 0x44a   : > { %9489 = vmatprep.mubr.msk.f32.mxu1 %vm202_vm0, %v11542_v38 }
 0x44d   : > { %9490 = vmatmul.mubr.msk.f32.gmra.mrb[18].mxu1 %vm202_vm0, %v11548_v40 }
 0x44e   : > { %9492 = vmatprep.mubr.msk.f32.mxu1 %vm202_vm0, %v11556_v33 }
 0x451   : > { %9493 = vmatmul.mubr.msk.f32.gmra.mrb[20].mxu1 %vm202_vm0, %v11562_v29 }
 0x452   : > { %9495 = vmatprep.mubr.msk.f32.mxu1 %vm202_vm0, %v11570_v44 }
 0x455   : > { %9496 = vmatmul.mubr.msk.f32.gmra.mrb[22].mxu1 %vm202_vm0, %v11576_v49 }
 0x456   : > { %9498 = vmatprep.mubr.msk.f32.mxu1 %vm202_vm0, %v11584_v60 }
 0x459   : > { %9499 = vmatmul.mubr.msk.f32.gmra.mrb[24].mxu1 %vm202_vm0, %v11590_v14 }
 0x45a   : > { %9501 = vmatprep.mubr.msk.f32.mxu1 %vm202_vm0, %v11595_v62 }
 0x45d   : > { %9502 = vmatmul.mubr.msk.f32.gmra.mrb[26].mxu1 %vm202_vm0, %v11600_v25 }
 0x45e   : > { %9504 = vmatprep.mubr.msk.f32.mxu1 %vm202_vm0, %v12674_v36 }
 0x461   : > { %9505 = vmatmul.mubr.msk.f32.gmra.mrb[28].mxu1 %vm202_vm0, %v12675_v45 }
 0x462   : > { %9507 = vmatprep.mubr.msk.f32.mxu1 %vm202_vm0, %v12005_v52 }
 0x465   : > { %9508 = vmatmul.mubr.msk.f32.gmra.mrb[30].mxu1 %vm202_vm0, %v12009_v55 }
 0x466   : > { %9512 = vmatprep.mubr.msk.f32.mxu1 %vm202_vm0, %v12676_v13  ;;  %v12686_v13 = vld [vmem:[#allocation34_spill] sm:$0xff] }
 0x469   : > { %9513 = vmatmul.mubr.msk.f32.vlgmr.msra.gmra.mrb[0].mxu1 %vm202_vm0, %v12677_v21  ;;  %v12687_v21 = vld [vmem:[#allocation35_spill] sm:$0xff] }
 0x46a   : > { %9561 = vmatpush3.msra.mxu1 %v8111_v22  ;;  %9515 = vmatprep.mubr.msk.f32.mxu1 %vm202_vm0, %v12678_v27  ;;  %v12685_v22 = vld [vmem:[#allocation7_spill] sm:$0xff] }
 0x46b   : > { %9610 = vmatprep.subr.mxu1 %v8144_v16 }
 0x46d   : > { %9516 = vmatmul.mubr.msk.f32.gmra.mrb[2].mxu1 %vm202_vm0, %v12679_v2 }
 0x46e   : > { %9518 = vmatprep.mubr.msk.f32.mxu1 %vm202_vm0, %v12680_v39  ;;  %v12688_v39 = vld [vmem:[#allocation10_spill] sm:$0xff] }
 0x471   : > { %9519 = vmatmul.mubr.msk.f32.gmra.mrb[4].mxu1 %vm202_vm0, %v12681_v34  ;;  %v12689_v34 = vld [vmem:[#allocation11_spill] sm:$0xff] }
 0x472   : > { %9521 = vmatprep.mubr.msk.f32.mxu1 %vm202_vm0, %v12682_v6  ;;  %v12690_v6 = vld [vmem:[#allocation12_spill] sm:$0xff] }
 0x475   : > { %9522 = vmatmul.mubr.msk.f32.gmra.mrb[6].mxu1 %vm202_vm0, %v12683_v12  ;;  %v12691_v12 = vld [vmem:[#allocation13_spill] sm:$0xff] }
 0x476   : > { %9524 = vmatprep.mubr.msk.f32.mxu1 %vm202_vm0, %v12684_v18  ;;  %v12692_v18 = vld [vmem:[#allocation14_spill] sm:$0xff] }
 0x479   : > { %9525 = vmatmul.mubr.msk.f32.gmra.mrb[8].mxu1 %vm202_vm0, %v12685_v22  ;;  %v12693_v22 = vld [vmem:[#allocation15_spill] sm:$0xff] }
 0x47a   : > { %9527 = vmatprep.mubr.msk.f32.mxu1 %vm202_vm0, %v12686_v13  ;;  %v12694_v13 = vld [vmem:[#allocation16_spill] sm:$0xff] }
 0x47d   : > { %9528 = vmatmul.mubr.msk.f32.gmra.mrb[10].mxu1 %vm202_vm0, %v12687_v21  ;;  %v12695_v21 = vld [vmem:[#allocation17_spill] sm:$0xff] }
 0x47e   : > { %9530 = vmatprep.mubr.msk.f32.mxu1 %vm202_vm0, %v12688_v39  ;;  %v12696_v39 = vld [vmem:[#allocation18_spill] sm:$0xff] }
 0x481   : > { %9531 = vmatmul.mubr.msk.f32.gmra.mrb[12].mxu1 %vm202_vm0, %v12689_v34  ;;  %v12697_v34 = vld [vmem:[#allocation19_spill] sm:$0xff] }
 0x482   : > { %9533 = vmatprep.mubr.msk.f32.mxu1 %vm202_vm0, %v12690_v6  ;;  %v12698_v6 = vld [vmem:[#allocation20_spill] sm:$0xff] }
 0x485   : > { %9534 = vmatmul.mubr.msk.f32.gmra.mrb[14].mxu1 %vm202_vm0, %v12691_v12  ;;  %v12699_v12 = vld [vmem:[#allocation21_spill] sm:$0xff] }
 0x486   : > { %9536 = vmatprep.mubr.msk.f32.mxu1 %vm202_vm0, %v12692_v18  ;;  %v12700_v18 = vld [vmem:[#allocation22_spill] sm:$0xff] }
 0x489   : > { %9537 = vmatmul.mubr.msk.f32.gmra.mrb[16].mxu1 %vm202_vm0, %v12693_v22 }
 0x48a   : > { %9539 = vmatprep.mubr.msk.f32.mxu1 %vm202_vm0, %v12694_v13  ;;  %v12701_v13 = vld [vmem:[#allocation24_spill] sm:$0xff] }
 0x48d   : > { %9540 = vmatmul.mubr.msk.f32.gmra.mrb[18].mxu1 %vm202_vm0, %v12695_v21 }
 0x48e   : > { %9542 = vmatprep.mubr.msk.f32.mxu1 %vm202_vm0, %v12696_v39 }
 0x491   : > { %9543 = vmatmul.mubr.msk.f32.gmra.mrb[20].mxu1 %vm202_vm0, %v12697_v34 }
 0x492   : > { %9545 = vmatprep.mubr.msk.f32.mxu1 %vm202_vm0, %v12698_v6  ;;  %v12076_v6 = vld [vmem:[#allocation3 + $0x182] sm:$0xff] }
 0x495   : > { %9546 = vmatmul.mubr.msk.f32.gmra.mrb[22].mxu1 %vm202_vm0, %v12699_v12 }
 0x496   : > { %9548 = vmatprep.mubr.msk.f32.mxu1 %vm202_vm0, %v12700_v18  ;;  %v12080_v18 = vld [vmem:[#allocation3 + $0x18a] sm:$0xff] }
 0x499   : > { %9549 = vmatmul.mubr.msk.f32.gmra.mrb[24].mxu1 %vm202_vm0, %v11850_v20 }
 0x49a   : > { %9551 = vmatprep.mubr.msk.f32.mxu1 %vm202_vm0, %v12701_v13 }
 0x49d   : > { %9552 = vmatmul.mubr.msk.f32.gmra.mrb[26].mxu1 %vm202_vm0, %v11858_v15 }
 0x49e   : > { %9554 = vmatprep.mubr.msk.f32.mxu1 %vm202_vm0, %v11862_v0  ;;  %v8177_v0 = vld [vmem:[%s12444_s2 + $0x40] sm:$0xff] }
 0x4a1   : > { %9555 = vmatmul.mubr.msk.f32.gmra.mrb[28].mxu1 %vm202_vm0, %v11866_v26 }
 0x4a2   : > { %9557 = vmatprep.mubr.msk.f32.mxu1 %vm202_vm0, %v12076_v6 }
 0x4a5   : > { %9558 = vmatmul.mubr.msk.f32.gmra.mrb[30].mxu1 %vm202_vm0, %v12080_v18 }
 0x4a6   : > { %9562 = vmatprep.mubr.msk.f32.mxu1 %vm202_vm0, %v11629_v37  ;;  %v6221_v37 = vld [vmem:[#allocation3 + $0x198] sm:$0xff] }
 0x4a9   : > { %9563 = vmatmul.mubr.msk.f32.vlgmr.msra.gmra.mrb[0].mxu1 %vm202_vm0, %v11633_v41  ;;  %v6222_v41 = vld [vmem:[#allocation3 + $0x1a0] sm:$0xff] }
 0x4aa   : > { %9611 = vmatpush3.msra.mxu1 %v8144_v16  ;;  %9565 = vmatprep.mubr.msk.f32.mxu1 %vm202_vm0, %v11637_v23  ;;  %v6578_v23 = vld [vmem:[#allocation3 + $0x31] sm:$0xff]  ;;  %v7426_v16 = vld [vmem:[%s10520_s25 + $0x10] sm:$0xff] }
 0x4ab   : > { %9660 = vmatprep.subr.mxu1 %v8177_v0 }
 0x4ad   : > { %9566 = vmatmul.mubr.msk.f32.gmra.mrb[2].mxu1 %vm202_vm0, %v11641_v42  ;;  %v6579_v42 = vld [vmem:[#allocation3 + $0x39] sm:$0xff] }
 0x4ae   : > { %9568 = vmatprep.mubr.msk.f32.mxu1 %vm202_vm0, %v11645_v3  ;;  %v6580_v3 = vld [vmem:[#allocation3 + $0x49] sm:$0xff] }
 0x4b1   : > { %9569 = vmatmul.mubr.msk.f32.gmra.mrb[4].mxu1 %vm202_vm0, %v11649_v5  ;;  %v6581_v5 = vld [vmem:[#allocation3 + $0x51] sm:$0xff] }
 0x4b2   : > { %9571 = vmatprep.mubr.msk.f32.mxu1 %vm202_vm0, %v11653_v1  ;;  %v6582_v1 = vld [vmem:[#allocation3 + $0x61] sm:$0xff] }
 0x4b5   : > { %9572 = vmatmul.mubr.msk.f32.gmra.mrb[6].mxu1 %vm202_vm0, %v11657_v4  ;;  %v6583_v4 = vld [vmem:[#allocation3 + $0x69] sm:$0xff] }
 0x4b6   : > { %9574 = vmatprep.mubr.msk.f32.mxu1 %vm202_vm0, %v11661_v28  ;;  %v6584_v28 = vld [vmem:[#allocation3 + $0x79] sm:$0xff] }
 0x4b9   : > { %9575 = vmatmul.mubr.msk.f32.gmra.mrb[8].mxu1 %vm202_vm0, %v11665_v30  ;;  %v6585_v30 = vld [vmem:[#allocation3 + $0x81] sm:$0xff] }
 0x4ba   : > { %9577 = vmatprep.mubr.msk.f32.mxu1 %vm202_vm0, %v11669_v63  ;;  %v6586_v63 = vld [vmem:[#allocation3 + $0x91] sm:$0xff] }
 0x4bd   : > { %9578 = vmatmul.mubr.msk.f32.gmra.mrb[10].mxu1 %vm202_vm0, %v11673_v35  ;;  %v6587_v35 = vld [vmem:[#allocation3 + $0x99] sm:$0xff] }
 0x4be   : > { %9580 = vmatprep.mubr.msk.f32.mxu1 %vm202_vm0, %v11677_v7  ;;  %v6588_v7 = vld [vmem:[#allocation3 + $0xa9] sm:$0xff] }
 0x4c1   : > { %9581 = vmatmul.mubr.msk.f32.gmra.mrb[12].mxu1 %vm202_vm0, %v11681_v8  ;;  %v12715_v8 = vld [vmem:[#allocation16_spill] sm:$0xff] }
 0x4c2   : > { %9583 = vmatprep.mubr.msk.f32.mxu1 %vm202_vm0, %v11685_v10  ;;  %v12716_v10 = vld [vmem:[#allocation20_spill] sm:$0xff] }
 0x4c5   : > { %9584 = vmatmul.mubr.msk.f32.gmra.mrb[14].mxu1 %vm202_vm0, %v11689_v9  ;;  %v12717_v9 = vld [vmem:[#allocation22_spill] sm:$0xff] }
 0x4c6   : > { %9586 = vmatprep.mubr.msk.f32.mxu1 %vm202_vm0, %v11693_v11  ;;  %v12718_v11 = vld [vmem:[#allocation26_spill] sm:$0xff] }
 0x4c9   : > { %9587 = vmatmul.mubr.msk.f32.gmra.mrb[16].mxu1 %vm202_vm0, %v11697_v43  ;;  %v6995_v43 = vld [vmem:[#allocation3 + $0x19a] sm:$0xff] }
 0x4ca   : > { %9589 = vmatprep.mubr.msk.f32.mxu1 %vm202_vm0, %v11701_v47  ;;  %v12265_v47 = vld [vmem:[%s12445_s3 + $0x2] ss:$0 sm:$0xff] }
 0x4cd   : > { %9590 = vmatmul.mubr.msk.f32.gmra.mrb[18].mxu1 %vm202_vm0, %v11705_v48  ;;  %v12270_v48 = vld [vmem:[%s12445_s3 + $0x3] ss:$0 sm:$0xff] }
 0x4ce   : > { %9592 = vmatprep.mubr.msk.f32.mxu1 %vm202_vm0, %v11709_v50 }
 0x4d1   : > { %9593 = vmatmul.mubr.msk.f32.gmra.mrb[20].mxu1 %vm202_vm0, %v11713_v51 }
 0x4d2   : > { %9595 = vmatprep.mubr.msk.f32.mxu1 %vm202_vm0, %v11717_v53 }
 0x4d5   : > { %9596 = vmatmul.mubr.msk.f32.gmra.mrb[22].mxu1 %vm202_vm0, %v11721_v56  ;;  %v7425_v56 = vld [vmem:[%s10520_s25 + $0x8] sm:$0xff] }
 0x4d6   : > { %9598 = vmatprep.mubr.msk.f32.mxu1 %vm202_vm0, %v11725_v57 }
 0x4d9   : > { %9599 = vmatmul.mubr.msk.f32.gmra.mrb[24].mxu1 %vm202_vm0, %v11729_v59 }
 0x4da   : > { %9601 = vmatprep.mubr.msk.f32.mxu1 %vm202_vm0, %v11733_v61  ;;  %v7424_v61 = vld [vmem:[%s10520_s25] sm:$0xff] }
 0x4dd   : > { %9602 = vmatmul.mubr.msk.f32.gmra.mrb[26].mxu1 %vm202_vm0, %v11737_v24 }
 0x4de   : > { %9604 = vmatprep.mubr.msk.f32.mxu1 %vm202_vm0, %v11934_v31 }
 0x4e1   : > { %9605 = vmatmul.mubr.msk.f32.gmra.mrb[28].mxu1 %vm202_vm0, %v11938_v32 }
 0x4e2   : > { %9607 = vmatprep.mubr.msk.f32.mxu1 %vm202_vm0, %v6221_v37 }
 0x4e5   : > { %9608 = vmatmul.mubr.msk.f32.gmra.mrb[30].mxu1 %vm202_vm0, %v6222_v41  ;;  %v7428_v41 = vld [vmem:[%s10520_s25 + $0x20] sm:$0xff] }
 0x4e6   : > { %9612 = vmatprep.mubr.msk.f32.mxu1 %vm202_vm0, %v6578_v23 }
 0x4e9   : > { %9613 = vmatmul.mubr.msk.f32.vlgmr.msra.gmra.mrb[0].mxu1 %vm202_vm0, %v6579_v42 }
 0x4ea   : > { %9661 = vmatpush3.msra.mxu1 %v8177_v0  ;;  %9615 = vmatprep.mubr.msk.f32.mxu1 %vm202_vm0, %v6580_v3 }
 0x4ed   : > { %9616 = vmatmul.mubr.msk.f32.gmra.mrb[2].mxu1 %vm202_vm0, %v6581_v5 }
 0x4ee   : > { %9618 = vmatprep.mubr.msk.f32.mxu1 %vm202_vm0, %v6582_v1 }
 0x4f1   : > { %9619 = vmatmul.mubr.msk.f32.gmra.mrb[4].mxu1 %vm202_vm0, %v6583_v4 }
 0x4f2   : > { %9621 = vmatprep.mubr.msk.f32.mxu1 %vm202_vm0, %v6584_v28 }
 0x4f5   : > { %9622 = vmatmul.mubr.msk.f32.gmra.mrb[6].mxu1 %vm202_vm0, %v6585_v30  ;;  %v7431_v30 = vld [vmem:[%s10520_s25 + $0x38] sm:$0xff] }
 0x4f6   : > { %9624 = vmatprep.mubr.msk.f32.mxu1 %vm202_vm0, %v6586_v63 }
 0x4f9   : > { %9625 = vmatmul.mubr.msk.f32.gmra.mrb[8].mxu1 %vm202_vm0, %v6587_v35 }
 0x4fa   : > { %9627 = vmatprep.mubr.msk.f32.mxu1 %vm202_vm0, %v6588_v7 }
 0x4fd   : > { %9628 = vmatmul.mubr.msk.f32.gmra.mrb[10].mxu1 %vm202_vm0, %v11506_v46  ;;  %v6608_v46 = vld [vmem:[#allocation3 + $0x199] sm:$0xff] }
 0x4fe   : > { %9630 = vmatprep.mubr.msk.f32.mxu1 %vm202_vm0, %v11514_v54  ;;  %v6609_v54 = vld [vmem:[#allocation3 + $0x1a1] sm:$0xff] }
 0x501   : > { %9631 = vmatmul.mubr.msk.f32.gmra.mrb[12].mxu1 %vm202_vm0, %v11520_v58  ;;  %v12702_v58 = vld [vmem:[#allocation30_spill] sm:$0xff] }
 0x502   : > { %9633 = vmatprep.mubr.msk.f32.mxu1 %vm202_vm0, %v11528_v17  ;;  %v12703_v17 = vld [vmem:[#allocation32_spill] sm:$0xff] }
 0x505   : > { %9634 = vmatmul.mubr.msk.f32.gmra.mrb[14].mxu1 %vm202_vm0, %v11534_v19  ;;  %v12704_v19 = vld [vmem:[#allocation4_spill] sm:$0xff] }
 0x506   : > { %9636 = vmatprep.mubr.msk.f32.mxu1 %vm202_vm0, %v11542_v38  ;;  %v12705_v38 = vld [vmem:[#allocation5_spill] sm:$0xff] }
 0x509   : > { %9637 = vmatmul.mubr.msk.f32.gmra.mrb[16].mxu1 %vm202_vm0, %v11548_v40  ;;  %v12706_v40 = vld [vmem:[#allocation6_spill] sm:$0xff] }
 0x50a   : > { %9639 = vmatprep.mubr.msk.f32.mxu1 %vm202_vm0, %v11556_v33  ;;  %v12707_v33 = vld [vmem:[#allocation7_spill] sm:$0xff] }
 0x50d   : > { %9640 = vmatmul.mubr.msk.f32.gmra.mrb[18].mxu1 %vm202_vm0, %v11562_v29  ;;  %v12708_v29 = vld [vmem:[#allocation34_spill] sm:$0xff] }
 0x50e   : > { %9642 = vmatprep.mubr.msk.f32.mxu1 %vm202_vm0, %v11570_v44  ;;  %v12709_v44 = vld [vmem:[#allocation35_spill] sm:$0xff] }
 0x511   : > { %9643 = vmatmul.mubr.msk.f32.gmra.mrb[20].mxu1 %vm202_vm0, %v11576_v49  ;;  %v12710_v49 = vld [vmem:[#allocation10_spill] sm:$0xff] }
 0x512   : > { %9645 = vmatprep.mubr.msk.f32.mxu1 %vm202_vm0, %v11584_v60  ;;  %v12711_v60 = vld [vmem:[#allocation11_spill] sm:$0xff] }
 0x515   : > { %9646 = vmatmul.mubr.msk.f32.gmra.mrb[22].mxu1 %vm202_vm0, %v11590_v14  ;;  %v12712_v14 = vld [vmem:[#allocation12_spill] sm:$0xff] }
 0x516   : > { %9648 = vmatprep.mubr.msk.f32.mxu1 %vm202_vm0, %v11595_v62  ;;  %v12713_v62 = vld [vmem:[#allocation13_spill] sm:$0xff] }
 0x519   : > { %9649 = vmatmul.mubr.msk.f32.gmra.mrb[24].mxu1 %vm202_vm0, %v11600_v25  ;;  %v12714_v25 = vld [vmem:[#allocation14_spill] sm:$0xff] }
 0x51a   : > { %9651 = vmatprep.mubr.msk.f32.mxu1 %vm202_vm0, %v12674_v36  ;;  %v7427_v36 = vld [vmem:[%s10520_s25 + $0x18] sm:$0xff] }
 0x51d   : > { %9652 = vmatmul.mubr.msk.f32.gmra.mrb[26].mxu1 %vm202_vm0, %v12675_v45 }
 0x51e   : > { %9654 = vmatprep.mubr.msk.f32.mxu1 %vm202_vm0, %v12005_v52 }
 0x521   : > { %9655 = vmatmul.mubr.msk.f32.gmra.mrb[28].mxu1 %vm202_vm0, %v12009_v55 }
 0x522   : > { %9657 = vmatprep.mubr.msk.f32.mxu1 %vm202_vm0, %v6608_v46  ;;  %v7430_v46 = vld [vmem:[%s10520_s25 + $0x30] sm:$0xff] }
 0x525   : > { %9658 = vmatmul.mubr.msk.f32.gmra.mrb[30].mxu1 %vm202_vm0, %v6609_v54 }
 0x526   : > { %9662 = vmatprep.mubr.msk.f32.mxu1 %vm202_vm0, %v12678_v27 }
 0x529   : > { %9663 = vmatmul.mubr.msk.f32.vlgmr.msra.gmra.mrb[0].mxu1 %vm202_vm0, %v12679_v2 }
 0x52a   : > { %9665 = vmatprep.mubr.msk.f32.mxu1 %vm202_vm0, %v12702_v58 }
 0x52d   : > { %9666 = vmatmul.mubr.msk.f32.gmra.mrb[2].mxu1 %vm202_vm0, %v12703_v17 }
 0x52e   : > { %9668 = vmatprep.mubr.msk.f32.mxu1 %vm202_vm0, %v12704_v19 }
 0x531   : > { %9669 = vmatmul.mubr.msk.f32.gmra.mrb[4].mxu1 %vm202_vm0, %v12705_v38 }
 0x532   : > { %9671 = vmatprep.mubr.msk.f32.mxu1 %vm202_vm0, %v12706_v40 }
 0x535   : > { %9672 = vmatmul.mubr.msk.f32.gmra.mrb[6].mxu1 %vm202_vm0, %v12707_v33 }
 0x536   : > { %9674 = vmatprep.mubr.msk.f32.mxu1 %vm202_vm0, %v12708_v29  ;;  %v7433_v29 = vld [vmem:[%s10520_s25 + $0x48] sm:$0xff] }
 0x539   : > { %9675 = vmatmul.mubr.msk.f32.gmra.mrb[8].mxu1 %vm202_vm0, %v12709_v44 }
 0x53a   : > { %9677 = vmatprep.mubr.msk.f32.mxu1 %vm202_vm0, %v12710_v49 }
 0x53d   : > { %9678 = vmatmul.mubr.msk.f32.gmra.mrb[10].mxu1 %vm202_vm0, %v12711_v60 }
 0x53e   : > { %9680 = vmatprep.mubr.msk.f32.mxu1 %vm202_vm0, %v12712_v14  ;;  %v7432_v14 = vld [vmem:[%s10520_s25 + $0x40] sm:$0xff] }
 0x541   : > { %9681 = vmatmul.mubr.msk.f32.gmra.mrb[12].mxu1 %vm202_vm0, %v12713_v62 }
 0x542   : > { %9683 = vmatprep.mubr.msk.f32.mxu1 %vm202_vm0, %v12714_v25 }
 0x545   : > { %9684 = vmatmul.mubr.msk.f32.gmra.mrb[14].mxu1 %vm202_vm0, %v12693_v22  ;;  %v7429_v22 = vld [vmem:[%s10520_s25 + $0x28] sm:$0xff] }
 0x546   : > { %9686 = vmatprep.mubr.msk.f32.mxu1 %vm202_vm0, %v12715_v8 }
 0x549   : > { %9687 = vmatmul.mubr.msk.f32.gmra.mrb[16].mxu1 %vm202_vm0, %v12695_v21 }
 0x54a   : > { %9689 = vmatprep.mubr.msk.f32.mxu1 %vm202_vm0, %v12696_v39 }
 0x54d   : > { %9690 = vmatmul.mubr.msk.f32.gmra.mrb[18].mxu1 %vm202_vm0, %v12697_v34 }
 0x54e   : > { %9692 = vmatprep.mubr.msk.f32.mxu1 %vm202_vm0, %v12716_v10 }
 0x551   : > { %9693 = vmatmul.mubr.msk.f32.gmra.mrb[20].mxu1 %vm202_vm0, %v12699_v12 }
 0x552   : > { %9695 = vmatprep.mubr.msk.f32.mxu1 %vm202_vm0, %v12717_v9 }
 0x555   : > { %9696 = vmatmul.mubr.msk.f32.gmra.mrb[22].mxu1 %vm202_vm0, %v11850_v20  ;;  %v6996_v20 = vld [vmem:[#allocation3 + $0x1a2] sm:$0xff] }
 0x556   : > { %9698 = vmatprep.mubr.msk.f32.mxu1 %vm202_vm0, %v12701_v13 }
 0x559   : > { %9699 = vmatmul.mubr.msk.f32.gmra.mrb[24].mxu1 %vm202_vm0, %v11858_v15 }
 0x55a   : > { %9701 = vmatprep.mubr.msk.f32.mxu1 %vm202_vm0, %v12718_v11 }
 0x55d   : > { %9702 = vmatmul.mubr.msk.f32.gmra.mrb[26].mxu1 %vm202_vm0, %v11866_v26 }
 0x55e   : > { %9704 = vmatprep.mubr.msk.f32.mxu1 %vm202_vm0, %v12076_v6 }
 0x561   : > { %9705 = vmatmul.mubr.msk.f32.gmra.mrb[28].mxu1 %vm202_vm0, %v12080_v18 }
 0x562   : > { %9707 = vmatprep.mubr.msk.f32.mxu1 %vm202_vm0, %v6995_v43 }
 0x565   : > { %9708 = vmatmul.mubr.msk.f32.gmra.mrb[30].mxu1 %vm202_vm0, %v6996_v20  ;;  %v7435_v20 = vld [vmem:[%s10520_s25 + $0x58] sm:$0xff] }
 0x5fc   : > { %v9664_v50 = vpop.f32.mrb[0].mxu1 }
 0x5fd   : > { %v7357_v51 = vmul.f32 %v9664_v50, %v12265_v47  ;;  %v7161_v53 = vpop.f32.mrb[1].mxu1 }
 0x5fe   : > { %v7356_v57 = vmul.f32 %v12265_v47, %v7161_v53 }
 0x5ff   : > { %v7393_v59 = vadd.f32 %v12270_v48, %v7357_v51 }
 0x600   : > { %v7392_v24 = vadd.f32 %v12270_v48, %v7356_v57  ;;  %v9667_v15 = vpop.f32.mrb[2].mxu1 }
 0x601   : > { %v7457_v0 = vadd.f32 %v7425_v56, %v7393_v59  ;;  %v7359_v26 = vmul.f32 %v9667_v15, %v12265_v47  ;;  %v7171_v31 = vpop.f32.mrb[3].mxu1  ;;  %v7434_v56 = vld [vmem:[%s10520_s25 + $0x50] sm:$0xff] }
 0x602   : > { %v7456_v32 = vadd.f32 %v7424_v61, %v7392_v24  ;;  %v7358_v45 = vmul.f32 %v12265_v47, %v7171_v31  ;;  %v7437_v31 = vld [vmem:[%s10520_s25 + $0x68] sm:$0xff] }
 0x603   : > { %v7489_v52 = vmax.f32 %v7457_v0, 0.0  ;;  %v7395_v55 = vadd.f32 %v12270_v48, %v7359_v26 }
 0x604   : > { %v7488_v27 = vmax.f32 %v7456_v32, 0.0  ;;  %v7394_v2 = vadd.f32 %v12270_v48, %v7358_v45  ;;  %v9670_v39 = vpop.f32.mrb[4].mxu1 }
 0x605   : > { %7521 = vst.msk [vmem:[%s12284_s23 + $0x8] sm:$0xff] %vm202_vm0, %v7489_v52  ;;  %v7459_v34 = vadd.f32 %v7427_v36, %v7395_v55  ;;  %v7361_v6 = vmul.f32 %v9670_v39, %v12265_v47  ;;  %v7181_v12 = vpop.f32.mrb[5].mxu1  ;;  %v7436_v52 = vld [vmem:[%s10520_s25 + $0x60] sm:$0xff] }
 0x606   : > { %7520 = vst.msk [vmem:[%s12284_s23] sm:$0xff] %vm202_vm0, %v7488_v27  ;;  %v7458_v18 = vadd.f32 %v7426_v16, %v7394_v2  ;;  %v7360_v13 = vmul.f32 %v12265_v47, %v7181_v12  ;;  %v7439_v12 = vld [vmem:[%s10520_s25 + $0x78] sm:$0xff] }
 0x607   : > { %v7491_v21 = vmax.f32 %v7459_v34, 0.0  ;;  %v7397_v37 = vadd.f32 %v12270_v48, %v7361_v6 }
 0x608   : > { %v7490_v23 = vmax.f32 %v7458_v18, 0.0  ;;  %v7396_v42 = vadd.f32 %v12270_v48, %v7360_v13  ;;  %v9673_v3 = vpop.f32.mrb[6].mxu1 }
 0x609   : > { %7523 = vst.msk [vmem:[%s12284_s23 + $0x18] sm:$0xff] %vm202_vm0, %v7491_v21  ;;  %v7461_v5 = vadd.f32 %v7429_v22, %v7397_v37  ;;  %v7363_v1 = vmul.f32 %v9673_v3, %v12265_v47  ;;  %v7191_v4 = vpop.f32.mrb[7].mxu1  ;;  %v7438_v21 = vld [vmem:[%s10520_s25 + $0x70] sm:$0xff] }
 0x60a   : > { %7522 = vst.msk [vmem:[%s12284_s23 + $0x10] sm:$0xff] %vm202_vm0, %v7490_v23  ;;  %v7460_v28 = vadd.f32 %v7428_v41, %v7396_v42  ;;  %v7362_v63 = vmul.f32 %v12265_v47, %v7191_v4  ;;  %v7441_v4 = vld [vmem:[%s10520_s25 + $0x88] sm:$0xff] }
 0x60b   : > { %v7493_v35 = vmax.f32 %v7461_v5, 0.0  ;;  %v7399_v7 = vadd.f32 %v12270_v48, %v7363_v1 }
 0x60c   : > { %v7492_v54 = vmax.f32 %v7460_v28, 0.0  ;;  %v7398_v58 = vadd.f32 %v12270_v48, %v7362_v63  ;;  %v9676_v17 = vpop.f32.mrb[8].mxu1 }
 0x60d   : > { %7525 = vst.msk [vmem:[%s12284_s23 + $0x28] sm:$0xff] %vm202_vm0, %v7493_v35  ;;  %v7463_v19 = vadd.f32 %v7431_v30, %v7399_v7  ;;  %v7365_v38 = vmul.f32 %v9676_v17, %v12265_v47  ;;  %v7201_v40 = vpop.f32.mrb[9].mxu1  ;;  %v7440_v35 = vld [vmem:[%s10520_s25 + $0x80] sm:$0xff] }
 0x60e   : > { %7524 = vst.msk [vmem:[%s12284_s23 + $0x20] sm:$0xff] %vm202_vm0, %v7492_v54  ;;  %v7462_v33 = vadd.f32 %v7430_v46, %v7398_v58  ;;  %v7364_v44 = vmul.f32 %v12265_v47, %v7201_v40  ;;  %v7443_v40 = vld [vmem:[%s10520_s25 + $0x98] sm:$0xff] }
 0x60f   : > { %v7495_v49 = vmax.f32 %v7463_v19, 0.0  ;;  %v7401_v60 = vadd.f32 %v12270_v48, %v7365_v38 }
 0x610   : > { %v7494_v62 = vmax.f32 %v7462_v33, 0.0  ;;  %v7400_v25 = vadd.f32 %v12270_v48, %v7364_v44  ;;  %v9679_v8 = vpop.f32.mrb[10].mxu1 }
 0x611   : > { %7527 = vst.msk [vmem:[%s12284_s23 + $0x38] sm:$0xff] %vm202_vm0, %v7495_v49  ;;  %v7465_v10 = vadd.f32 %v7433_v29, %v7401_v60  ;;  %v7367_v9 = vmul.f32 %v9679_v8, %v12265_v47  ;;  %v7211_v11 = vpop.f32.mrb[11].mxu1  ;;  %v7442_v49 = vld [vmem:[%s10520_s25 + $0x90] sm:$0xff] }
 0x612   : > { %7526 = vst.msk [vmem:[%s12284_s23 + $0x30] sm:$0xff] %vm202_vm0, %v7494_v62  ;;  %v7464_v43 = vadd.f32 %v7432_v14, %v7400_v25  ;;  %v7366_v50 = vmul.f32 %v12265_v47, %v7211_v11  ;;  %v7445_v11 = vld [vmem:[%s10520_s25 + $0xa8] sm:$0xff] }
 0x613   : > { %v7497_v51 = vmax.f32 %v7465_v10, 0.0  ;;  %v7403_v53 = vadd.f32 %v12270_v48, %v7367_v9 }
 0x614   : > { %v7496_v57 = vmax.f32 %v7464_v43, 0.0  ;;  %v7402_v59 = vadd.f32 %v12270_v48, %v7366_v50  ;;  %v9682_v61 = vpop.f32.mrb[12].mxu1 }
 0x615   : > { %7529 = vst.msk [vmem:[%s12284_s23 + $0x48] sm:$0xff] %vm202_vm0, %v7497_v51  ;;  %v7467_v24 = vadd.f32 %v7435_v20, %v7403_v53  ;;  %v7369_v15 = vmul.f32 %v9682_v61, %v12265_v47  ;;  %v7221_v0 = vpop.f32.mrb[13].mxu1  ;;  %v7444_v51 = vld [vmem:[%s10520_s25 + $0xa0] sm:$0xff] }
 0x616   : > { %7528 = vst.msk [vmem:[%s12284_s23 + $0x40] sm:$0xff] %vm202_vm0, %v7496_v57  ;;  %v7466_v26 = vadd.f32 %v7434_v56, %v7402_v59  ;;  %v7368_v32 = vmul.f32 %v12265_v47, %v7221_v0  ;;  %v7447_v0 = vld [vmem:[%s10520_s25 + $0xb8] sm:$0xff] }
 0x617   : > { %v7499_v36 = vmax.f32 %v7467_v24, 0.0  ;;  %v7405_v45 = vadd.f32 %v12270_v48, %v7369_v15 }
 0x618   : > { %v7498_v55 = vmax.f32 %v7466_v26, 0.0  ;;  %v7404_v16 = vadd.f32 %v12270_v48, %v7368_v32  ;;  %v9685_v27 = vpop.f32.mrb[14].mxu1 }
 0x619   : > { %7531 = vst.msk [vmem:[%s12284_s23 + $0x58] sm:$0xff] %vm202_vm0, %v7499_v36  ;;  %v7469_v2 = vadd.f32 %v7437_v31, %v7405_v45  ;;  %v7371_v39 = vmul.f32 %v9685_v27, %v12265_v47  ;;  %v7231_v34 = vpop.f32.mrb[15].mxu1  ;;  %v7446_v36 = vld [vmem:[%s10520_s25 + $0xb0] sm:$0xff] }
 0x61a   : > { %7530 = vst.msk [vmem:[%s12284_s23 + $0x50] sm:$0xff] %vm202_vm0, %v7498_v55  ;;  %v7468_v6 = vadd.f32 %v7436_v52, %v7404_v16  ;;  %v7370_v18 = vmul.f32 %v12265_v47, %v7231_v34  ;;  %v7449_v34 = vld [vmem:[%s10520_s25 + $0xc8] sm:$0xff] }
 0x61b   : > { %v7501_v22 = vmax.f32 %v7469_v2, 0.0  ;;  %v7407_v13 = vadd.f32 %v12270_v48, %v7371_v39 }
 0x61c   : > { %v7500_v37 = vmax.f32 %v7468_v6, 0.0  ;;  %v7406_v41 = vadd.f32 %v12270_v48, %v7370_v18  ;;  %v9688_v23 = vpop.f32.mrb[16].mxu1 }
 0x61d   : > { %7533 = vst.msk [vmem:[%s12284_s23 + $0x68] sm:$0xff] %vm202_vm0, %v7501_v22  ;;  %v7471_v42 = vadd.f32 %v7439_v12, %v7407_v13  ;;  %v7373_v3 = vmul.f32 %v9688_v23, %v12265_v47  ;;  %v7241_v5 = vpop.f32.mrb[17].mxu1  ;;  %v7448_v22 = vld [vmem:[%s10520_s25 + $0xc0] sm:$0xff] }
 0x61e   : > { %7532 = vst.msk [vmem:[%s12284_s23 + $0x60] sm:$0xff] %vm202_vm0, %v7500_v37  ;;  %v7470_v1 = vadd.f32 %v7438_v21, %v7406_v41  ;;  %v7372_v28 = vmul.f32 %v12265_v47, %v7241_v5  ;;  %v7451_v5 = vld [vmem:[%s10520_s25 + $0xd8] sm:$0xff] }
 0x61f   : > { %v7503_v30 = vmax.f32 %v7471_v42, 0.0  ;;  %v7409_v63 = vadd.f32 %v12270_v48, %v7373_v3 }
 0x620   : > { %v7502_v7 = vmax.f32 %v7470_v1, 0.0  ;;  %v7408_v46 = vadd.f32 %v12270_v48, %v7372_v28  ;;  %v9691_v54 = vpop.f32.mrb[18].mxu1 }
 0x621   : > { %7535 = vst.msk [vmem:[%s12284_s23 + $0x78] sm:$0xff] %vm202_vm0, %v7503_v30  ;;  %v7473_v58 = vadd.f32 %v7441_v4, %v7409_v63  ;;  %v7375_v17 = vmul.f32 %v9691_v54, %v12265_v47  ;;  %v7251_v19 = vpop.f32.mrb[19].mxu1  ;;  %v7450_v30 = vld [vmem:[%s10520_s25 + $0xd0] sm:$0xff] }
 0x622   : > { %7534 = vst.msk [vmem:[%s12284_s23 + $0x70] sm:$0xff] %vm202_vm0, %v7502_v7  ;;  %v7472_v38 = vadd.f32 %v7440_v35, %v7408_v46  ;;  %v7374_v33 = vmul.f32 %v12265_v47, %v7251_v19  ;;  %v7453_v19 = vld [vmem:[%s10520_s25 + $0xe8] sm:$0xff] }
 0x623   : > { %v7505_v29 = vmax.f32 %v7473_v58, 0.0  ;;  %v7411_v44 = vadd.f32 %v12270_v48, %v7375_v17 }
 0x624   : > { %v7504_v60 = vmax.f32 %v7472_v38, 0.0  ;;  %v7410_v14 = vadd.f32 %v12270_v48, %v7374_v33  ;;  %v9694_v62 = vpop.f32.mrb[20].mxu1 }
 0x625   : > { %7537 = vst.msk [vmem:[%s12284_s23 + $0x88] sm:$0xff] %vm202_vm0, %v7505_v29  ;;  %v7475_v25 = vadd.f32 %v7443_v40, %v7411_v44  ;;  %v7377_v8 = vmul.f32 %v9694_v62, %v12265_v47  ;;  %v7261_v10 = vpop.f32.mrb[21].mxu1  ;;  %v7452_v29 = vld [vmem:[%s10520_s25 + $0xe0] sm:$0xff] }
 0x626   : > { %7536 = vst.msk [vmem:[%s12284_s23 + $0x80] sm:$0xff] %vm202_vm0, %v7504_v60  ;;  %v7474_v9 = vadd.f32 %v7442_v49, %v7410_v14  ;;  %v7376_v43 = vmul.f32 %v12265_v47, %v7261_v10  ;;  %v7455_v10 = vld [vmem:[%s10520_s25 + $0xf8] sm:$0xff] }
 0x627   : > { %v7507_v20 = vmax.f32 %v7475_v25, 0.0  ;;  %v7413_v50 = vadd.f32 %v12270_v48, %v7377_v8 }
 0x628   : > { %v7506_v53 = vmax.f32 %v7474_v9, 0.0  ;;  %v7412_v56 = vadd.f32 %v12270_v48, %v7376_v43  ;;  %v9697_v57 = vpop.f32.mrb[22].mxu1 }
 0x629   : > { %7539 = vst.msk [vmem:[%s12284_s23 + $0x98] sm:$0xff] %vm202_vm0, %v7507_v20  ;;  %v7477_v59 = vadd.f32 %v7445_v11, %v7413_v50  ;;  %v7379_v61 = vmul.f32 %v9697_v57, %v12265_v47  ;;  %v7271_v24 = vpop.f32.mrb[23].mxu1  ;;  %v7454_v20 = vld [vmem:[%s10520_s25 + $0xf0] sm:$0xff] }
 0x62a   : > { %7538 = vst.msk [vmem:[%s12284_s23 + $0x90] sm:$0xff] %vm202_vm0, %v7506_v53  ;;  %v7476_v15 = vadd.f32 %v7444_v51, %v7412_v56  ;;  %v7378_v26 = vmul.f32 %v12265_v47, %v7271_v24 }
 0x62b   : > { %v7509_v31 = vmax.f32 %v7477_v59, 0.0  ;;  %v7415_v32 = vadd.f32 %v12270_v48, %v7379_v61 }
 0x62c   : > { %v7508_v45 = vmax.f32 %v7476_v15, 0.0  ;;  %v7414_v52 = vadd.f32 %v12270_v48, %v7378_v26  ;;  %v9700_v55 = vpop.f32.mrb[24].mxu1 }
 0x62d   : > { %7541 = vst.msk [vmem:[%s12284_s23 + $0xa8] sm:$0xff] %vm202_vm0, %v7509_v31  ;;  %v7479_v16 = vadd.f32 %v7447_v0, %v7415_v32  ;;  %v7381_v27 = vmul.f32 %v9700_v55, %v12265_v47  ;;  %v7281_v2 = vpop.f32.mrb[25].mxu1 }
 0x62e   : > { %7540 = vst.msk [vmem:[%s12284_s23 + $0xa0] sm:$0xff] %vm202_vm0, %v7508_v45  ;;  %v7478_v39 = vadd.f32 %v7446_v36, %v7414_v52  ;;  %v7380_v6 = vmul.f32 %v12265_v47, %v7281_v2 }
 0x62f   : > { %v7511_v12 = vmax.f32 %v7479_v16, 0.0  ;;  %v7417_v18 = vadd.f32 %v12270_v48, %v7381_v27 }
 0x630   : > { %v7510_v13 = vmax.f32 %v7478_v39, 0.0  ;;  %v7416_v21 = vadd.f32 %v12270_v48, %v7380_v6  ;;  %v9703_v37 = vpop.f32.mrb[26].mxu1 }
 0x631   : > { %7543 = vst.msk [vmem:[%s12284_s23 + $0xb8] sm:$0xff] %vm202_vm0, %v7511_v12  ;;  %v7481_v41 = vadd.f32 %v7449_v34, %v7417_v18  ;;  %v7383_v23 = vmul.f32 %v9703_v37, %v12265_v47  ;;  %v7291_v42 = vpop.f32.mrb[27].mxu1 }
 0x632   : > { %7542 = vst.msk [vmem:[%s12284_s23 + $0xb0] sm:$0xff] %vm202_vm0, %v7510_v13  ;;  %v7480_v3 = vadd.f32 %v7448_v22, %v7416_v21  ;;  %v7382_v1 = vmul.f32 %v12265_v47, %v7291_v42 }
 0x633   : > { %v7513_v4 = vmax.f32 %v7481_v41, 0.0  ;;  %v7419_v28 = vadd.f32 %v12270_v48, %v7383_v23 }
 0x634   : > { %v7512_v63 = vmax.f32 %v7480_v3, 0.0  ;;  %v7418_v35 = vadd.f32 %v12270_v48, %v7382_v1  ;;  %v9706_v7 = vpop.f32.mrb[28].mxu1 }
 0x635   : > { %7545 = vst.msk [vmem:[%s12284_s23 + $0xc8] sm:$0xff] %vm202_vm0, %v7513_v4  ;;  %v7483_v46 = vadd.f32 %v7451_v5, %v7419_v28  ;;  %v7385_v54 = vmul.f32 %v9706_v7, %v12265_v47  ;;  %v7301_v58 = vpop.f32.mrb[29].mxu1 }
 0x636   : > { %7544 = vst.msk [vmem:[%s12284_s23 + $0xc0] sm:$0xff] %vm202_vm0, %v7512_v63  ;;  %v7482_v17 = vadd.f32 %v7450_v30, %v7418_v35  ;;  %v7384_v38 = vmul.f32 %v12265_v47, %v7301_v58 }
 0x637   : > { %v7515_v40 = vmax.f32 %v7483_v46, 0.0  ;;  %v7421_v33 = vadd.f32 %v12270_v48, %v7385_v54 }
 0x638   : > { %v7514_v44 = vmax.f32 %v7482_v17, 0.0  ;;  %v7420_v49 = vadd.f32 %v12270_v48, %v7384_v38  ;;  %v9709_v60 = vpop.f32.mrb[30].mxu1 }
 0x639   : > { %7547 = vst.msk [vmem:[%s12284_s23 + $0xd8] sm:$0xff] %vm202_vm0, %v7515_v40  ;;  %v7485_v14 = vadd.f32 %v7453_v19, %v7421_v33  ;;  %v7387_v62 = vmul.f32 %v9709_v60, %v12265_v47  ;;  %v7311_v25 = vpop.f32.mrb[31].mxu1 }
 0x63a   : > { %7546 = vst.msk [vmem:[%s12284_s23 + $0xd0] sm:$0xff] %vm202_vm0, %v7514_v44  ;;  %v7484_v8 = vadd.f32 %v7452_v29, %v7420_v49  ;;  %v7386_v9 = vmul.f32 %v12265_v47, %v7311_v25 }
 0x63b   : > { %v7517_v11 = vmax.f32 %v7485_v14, 0.0  ;;  %v7423_v43 = vadd.f32 %v12270_v48, %v7387_v62 }
 0x63c   : > { %v7516_v50 = vmax.f32 %v7484_v8, 0.0  ;;  %v7422_v51 = vadd.f32 %v12270_v48, %v7386_v9 }
 0x63d   : > { %7549 = vst.msk [vmem:[%s12284_s23 + $0xe8] sm:$0xff] %vm202_vm0, %v7517_v11  ;;  %v7487_v53 = vadd.f32 %v7455_v10, %v7423_v43 }
 0x63e   : > { %7548 = vst.msk [vmem:[%s12284_s23 + $0xe0] sm:$0xff] %vm202_vm0, %v7516_v50  ;;  %v7486_v56 = vadd.f32 %v7454_v20, %v7422_v51 }
 0x63f   : > { %v7519_v57 = vmax.f32 %v7487_v53, 0.0 }
 0x640   : > { %v7518_v59 = vmax.f32 %v7486_v56, 0.0 }
 0x641   : > { %7551 = vst.msk [vmem:[%s12284_s23 + $0xf8] sm:$0xff] %vm202_vm0, %v7519_v57 }
 0x642   : > { %7550 = vst.msk [vmem:[%s12284_s23 + $0xf0] sm:$0xff] %vm202_vm0, %v7518_v59 }
 0x643 PF: > { %s14_s15 = sadd.s32 1, %s10237_s15  }
 0x644   : > { %p11_p4 = scmp.ge.s32.totalorder %s14_s15, 4  }
 0x646   :  { %13 = sbr.rel (!%p11_p4) target bundleno = 1 (0x1), region = 86 }

</bundles_post_ra>
